<compile_context>
chip_gen: v5e
topology: v5e:2x2
jax: 0.10.0
libtpu: 0.0.40
codegen_flags: <defaults>
</compile_context>

<pallas_src>
import jax
import jax.numpy as jnp
from jax.experimental import pallas as pl
from jax.experimental.pallas import tpu as pltpu

# ------------------------- model configuration -------------------------
DIM = 32          # model dim
HEADS = 4         # attention heads (dh = 8)
DEPTH = 2         # transformer depth
N_Q = 3           # number of codebooks
NUM_TOKENS = 24   # output vocabulary (projection size)
VOCAB = NUM_TOKENS + 3   # + mask / pad / special token ids (MotionTokenizerParams)
FF_MULT = 4       # FeedForward inner = 128
AUDIO_DIM = 16    # audio_input_dim
TEXT_DIM = 24     # text_input_dim
LN_EPS = 1e-5
FF = DIM * FF_MULT


# -------------------- trace-time helpers (used inside the kernel) --------------------
def _layernorm(y, g):
    """F.layer_norm over last dim, weight=g, bias=0 (the module's LayerNorm class)."""
    mu = jnp.mean(y, axis=-1, keepdims=True)
    var = jnp.mean((y - mu) ** 2, axis=-1, keepdims=True)
    return (y - mu) * jax.lax.rsqrt(var + LN_EPS) * g


def _erf(x):
    # Abramowitz & Stegun 7.1.26 rational approximation, |err| < 1.5e-7 -- fp32-exact
    # stand-in for erf (avoids relying on an erf lowering inside Mosaic).
    p = 0.3275911
    a1, a2, a3, a4, a5 = 0.254829592, -0.284496736, 1.421413741, -1.453152027, 1.061405429
    ax = jnp.abs(x)
    t = 1.0 / (1.0 + p * ax)
    poly = ((((a5 * t + a4) * t + a3) * t + a2) * t + a1) * t
    y = 1.0 - poly * jnp.exp(-ax * ax)
    return jnp.where(x >= 0, y, -y)


def _gelu_exact(x):
    """nn.GELU() (exact erf form): 0.5 * x * (1 + erf(x / sqrt(2)))."""
    return 0.5 * x * (1.0 + _erf(x * 0.7071067811865476))


def _mha_heads(q, k, v, bias, wo, null_k=None, null_v=None):
    """Multi-head attention over 2-D values (one batch element), heads statically unrolled.

    q: (Sq, D); k, v: (Tk, D); bias: (1, Tk) additive (0 valid / -1e9 masked);
    wo: (D, D) output projection. null_k/null_v: (1, D) learned always-valid null key/value
    (handled analytically instead of concatenating a token).  Returns (Sq, D).
    """
    d = q.shape[-1]
    dh = d // HEADS
    scale = dh ** -0.5
    out = jnp.zeros((q.shape[0], wo.shape[1]), jnp.float32)
    for h in range(HEADS):
        sl = slice(h * dh, (h + 1) * dh)
        qh, kh, vh = q[:, sl], k[:, sl], v[:, sl]
        s = jnp.einsum("qd,kd->qk", qh, kh,
                       preferred_element_type=jnp.float32) * scale + bias
        if null_k is not None:
            s_null = jnp.sum(qh * null_k[:, sl], axis=-1, keepdims=True) * scale
            m = jnp.maximum(jnp.max(s, axis=-1, keepdims=True), s_null)
            p = jnp.exp(s - m)
            p_null = jnp.exp(s_null - m)
            denom = jnp.sum(p, axis=-1, keepdims=True) + p_null
            o = (jnp.einsum("qk,kd->qd", p, vh, preferred_element_type=jnp.float32)
                 + p_null * null_v[:, sl]) / denom
        else:
            m = jnp.max(s, axis=-1, keepdims=True)
            p = jnp.exp(s - m)
            o = jnp.einsum("qk,kd->qd", p, vh,
                           preferred_element_type=jnp.float32) \
                / jnp.sum(p, axis=-1, keepdims=True)
        out = out + jnp.dot(o, wo[sl, :], preferred_element_type=jnp.float32)
    return out


# ------------------------------ the fused kernel ------------------------------
def _fused_transformer_kernel(
        x_ref, ctx_ref, sbias_ref, cbias_ref,
        wqkv_sa_ref, wo_sa_ref,
        wq_ca_ref, wkv_ca_ref, wo_ca_ref, nullk_ref, nullv_ref,
        ff_w1_ref, ff_g_ref, ff_w2_ref,
        g_sa_ref, g_ca_ref, g_out_ref, g_final_ref, head_w_ref,
        embed_ref, logits_ref):
    """One grid step = one batch element; whole DEPTH-layer transformer + output heads."""
    D = x_ref.shape[-1]
    x = x_ref[0]          # (S, D)
    ctx = ctx_ref[0]      # (Tc, D)
    sbias = sbias_ref[0]  # (1, S)   additive key-padding bias (self-attn)
    cbias = cbias_ref[0]  # (1, Tc)  additive key-padding bias (cross-attn)

    for l in range(DEPTH):
        # ---- self-attention (residual taken on the normed x, as in the module) ----
        x = _layernorm(x, g_sa_ref[...])
        qkv = jnp.dot(x, wqkv_sa_ref[l], preferred_element_type=jnp.float32)   # (S, 3D)
        x = _mha_heads(qkv[:, :D], qkv[:, D:2 * D], qkv[:, 2 * D:],
                       sbias, wo_sa_ref[l]) + x

        # ---- cross-attention (query normed, residual on x; learned null k/v, never masked) ----
        xq = _layernorm(x, g_ca_ref[...])
        q = jnp.dot(xq, wq_ca_ref[l], preferred_element_type=jnp.float32)      # (S, D)
        kv = jnp.dot(ctx, wkv_ca_ref[l], preferred_element_type=jnp.float32)   # (Tc, 2D)
        x = _mha_heads(q, kv[:, :D], kv[:, D:], cbias, wo_ca_ref[l],
                       null_k=nullk_ref[l], null_v=nullv_ref[l]) + x

        # ---- FeedForward: Linear -> GELU(erf) -> LayerNorm(inner) -> Linear ----
        h = jnp.dot(x, ff_w1_ref[l], preferred_element_type=jnp.float32)       # (S, FF)
        h = _gelu_exact(h)
        h = _layernorm(h, ff_g_ref[l])
        h = jnp.dot(h, ff_w2_ref[l], preferred_element_type=jnp.float32)       # (S, D)
        x = _layernorm(h + x, g_out_ref[...])                                  # norm_out

    embed = _layernorm(x, g_final_ref[...])                                    # out_norm
    embed_ref[0] = embed
    # stacked per-codebook output heads: (S, D) @ (D, N_Q*NUM_TOKENS)
    logits_ref[0] = jnp.dot(embed, head_w_ref[...], preferred_element_type=jnp.float32)


def fused_transformer(x0, ctx, sbias, cbias, p):
    """Single pallas_call for the whole transformer + output heads.  grid=(B,), parallel."""
    B, S, D = x0.shape
    Tc = ctx.shape[1]
    L = DEPTH
    KNT = p["head_w"].shape[-1]

    def full(shape):   # replicated (weight) block: whole array every grid step
        return pl.BlockSpec(shape, lambda b: (0,) * len(shape))

    def per_b(shape):  # leading batch axis blocked per grid step
        return pl.BlockSpec((1,) + shape[1:], lambda b: (b,) + (0,) * (len(shape) - 1))

    embed, logits = pl.pallas_call(
        _fused_transformer_kernel,
        out_shape=(jax.ShapeDtypeStruct((B, S, D), jnp.float32),
                   jax.ShapeDtypeStruct((B, S, KNT), jnp.float32)),
        grid=(B,),
        in_specs=[
            per_b((B, S, D)),        # x0
            per_b((B, Tc, D)),       # ctx
            per_b((B, 1, S)),        # self-attn additive bias
            per_b((B, 1, Tc)),       # cross-attn additive bias
            full((L, D, 3 * D)),     # fused Wq|Wk|Wv (self)
            full((L, D, D)),         # Wo (self)
            full((L, D, D)),         # Wq (cross)
            full((L, D, 2 * D)),     # fused Wk|Wv (cross)
            full((L, D, D)),         # Wo (cross)
            full((L, 1, D)),         # null_k (head-major flattened)
            full((L, 1, D)),         # null_v
            full((L, D, FF)),        # FF W1
            full((L, 1, FF)),        # FF inner LayerNorm gamma
            full((L, FF, D)),        # FF W2
            full((1, D)),            # norm_sa gamma
            full((1, D)),            # norm_cross gamma
            full((1, D)),            # norm_out gamma
            full((1, D)),            # out_norm gamma
            full((D, KNT)),          # stacked output heads
        ],
        out_specs=(per_b((B, S, D)), per_b((B, S, KNT))),
        compiler_params=pltpu.CompilerParams(
            dimension_semantics=("parallel",)),
    )(x0, ctx, sbias, cbias,
      p["wqkv_sa"], p["wo_sa"],
      p["wq_ca"], p["wkv_ca"], p["wo_ca"], p["null_k"], p["null_v"],
      p["ff_w1"], p["ff_ln_g"], p["ff_w2"],
      p["norm_sa_g"], p["norm_cross_g"], p["norm_out_g"], p["out_norm_g"],
      p["head_w"])
    return embed, logits


# ------------------------------- XLA glue --------------------------------
def scaled_sinusoidal(seq_len, dim, scale):
    """ScaledSinusoidalEmbedding: cat(sin, cos)(pos * inv_freq) * scale."""
    half = dim // 2
    inv_freq = 10000.0 ** -(jnp.arange(half, dtype=jnp.float32) / half)
    pos = jnp.arange(seq_len, dtype=jnp.float32)
    emb = pos[:, None] * inv_freq[None, :]
    return jnp.concatenate([jnp.sin(emb), jnp.cos(emb)], axis=-1) * scale


def conv1d_stride2(x, w):
    """PyTorch nn.Conv1d(C, C, 3, stride=2, padding=1, bias=False) on channels-last (B, N, C).
    ~3K MACs total -> kept as XLA glue; all transformer compute is inside the Pallas kernel."""
    B, N, C = x.shape
    xp = jnp.pad(x, ((0, 0), (1, 1), (0, 0)))
    n_out = (N + 2 - 3) // 2 + 1
    idx = 2 * jnp.arange(n_out)
    patches = jnp.stack([xp[:, idx + j, :] for j in range(3)], axis=-1)  # (B, n_out, C_in, 3)
    return jnp.einsum("bncj,ocj->bno", patches, w)                       # w: (C_out, C_in, 3)


def mlm_forward(params, sequence, sequence_mask, audio, text, text_mask):
    """MLMModel.forward (labels=None, return_embed=False) -> (logits, embed)."""
    B, K, S = sequence.shape

    # token embedding: sum over codebooks (trivial gathers, XLA glue)
    x = jnp.zeros((B, S, DIM), jnp.float32)
    for k in range(K):
        x = x + jnp.take(params["token_emb"][k], sequence[:, k], axis=0)
    # positional embedding; post_emb_norm / emb_dropout are identity
    x = x + scaled_sinusoidal(S, DIM, params["pos_scale"])[None]

    # _prepare_inputs: downsample_audio (2x Conv1d stride 2) -> project_audio; project_text
    a = conv1d_stride2(audio, params["conv1_w"])
    a = conv1d_stride2(a, params["conv2_w"])
    a = jnp.einsum("bnc,cd->bnd", a, params["proj_audio"])
    t = jnp.einsum("bnc,cd->bnd", text, params["proj_text"])
    context = jnp.concatenate([a, t], axis=1)
    Na = a.shape[1]
    # TODO(synk): upstream ConditionFuser (and its mask downsampling) not provided; both
    #             conditions are fused via cross-attention and the audio cross mask is
    #             taken as all-valid after downsampling.
    ctx_mask = jnp.concatenate([jnp.ones((B, Na), bool), text_mask.astype(bool)], axis=1)

    neg = jnp.float32(-1e9)
    zero = jnp.float32(0.0)
    sbias = jnp.where(sequence_mask.astype(bool), zero, neg)[:, None, :]   # (B, 1, S)
    cbias = jnp.where(ctx_mask, zero, neg)[:, None, :]                     # (B, 1, Tc)

    embed, logits_flat = fused_transformer(x, context, sbias, cbias, params)
    # (B, S, K*NT) -> (B, K, S, NT); no prepend/quality trimming in this config
    logits = logits_flat.reshape(B, S, K, NUM_TOKENS).transpose(0, 2, 1, 3)
    return logits, embed


# ------------------------------ parameters ---------------------------------
def init_params(key):
    ks = iter(jax.random.split(key, 20))

    def nrm(shape, std=0.02):
        return jax.random.normal(next(ks), shape, jnp.float32) * std

    L, D = DEPTH, DIM
    return {
        "token_emb": nrm((N_Q, VOCAB, D)),
        "pos_scale": jnp.float32(D ** -0.5),
        "conv1_w": nrm((AUDIO_DIM, AUDIO_DIM, 3)),
        "conv2_w": nrm((AUDIO_DIM, AUDIO_DIM, 3)),
        "proj_audio": nrm((AUDIO_DIM, D)),
        "proj_text": nrm((TEXT_DIM, D)),
        # block-level norms (shared across depth, as in TransformerBlockMuseCustom)
        "norm_sa_g": jnp.ones((1, D), jnp.float32),
        "norm_cross_g": jnp.ones((1, D), jnp.float32),
        "norm_out_g": jnp.ones((1, D), jnp.float32),
        "out_norm_g": jnp.ones((1, D), jnp.float32),
        # per-layer weights, stacked over depth; projections stored as (in, out)
        "wqkv_sa": nrm((L, D, 3 * D)),
        "wo_sa": nrm((L, D, D)),
        "wq_ca": nrm((L, D, D)),
        "wkv_ca": nrm((L, D, 2 * D)),
        "wo_ca": nrm((L, D, D)),
        "null_k": nrm((L, 1, D), std=1.0),   # head h occupies lanes [h*dh:(h+1)*dh]
        "null_v": nrm((L, 1, D), std=1.0),
        "ff_w1": nrm((L, D, FF)),
        "ff_ln_g": jnp.ones((L, 1, FF), jnp.float32),
        "ff_w2": nrm((L, FF, D)),
        # 3 codebook output heads stacked along the lane axis: (D, N_Q * NUM_TOKENS)
        "head_w": nrm((D, N_Q * NUM_TOKENS)),
    }


# --------------------------------- main -------------------------------------
if __name__ == "__main__":
    key = jax.random.PRNGKey(0)
    k_par, k_seq, k_aud, k_txt = jax.random.split(key, 4)

    B, S = 2, 8
    N_AUDIO, N_TEXT = 16, 4

    params = init_params(k_par)
    sequence = jax.random.randint(k_seq, (B, N_Q, S), 0, NUM_TOKENS, dtype=jnp.int32)
    sequence_mask = jnp.ones((B, S), dtype=bool)
    audio = jax.random.normal(k_aud, (B, N_AUDIO, AUDIO_DIM), jnp.float32)
    text = jax.random.normal(k_txt, (B, N_TEXT, TEXT_DIM), jnp.float32)
    text_mask = jnp.ones((B, N_TEXT), dtype=bool)

    fwd = jax.jit(mlm_forward)
    logits, embed = fwd(params, sequence, sequence_mask, audio, text, text_mask)
    jax.block_until_ready((logits, embed))

    assert logits.shape == (B, N_Q, S, NUM_TOKENS)
    assert embed.shape == (B, S, DIM)
    assert bool(jnp.all(jnp.isfinite(logits))) and bool(jnp.all(jnp.isfinite(embed)))
    print("KERNEL_OK")
</pallas_src>

<mosaic_0001>
module attributes {stable_mosaic.version = 11 : i64} {
  func.func @_fused_transformer_kernel(%arg0: i32, %arg1: memref<1x8x32xf32, #tpu.memory_space<vmem>>, %arg2: memref<1x8x32xf32, #tpu.memory_space<vmem>>, %arg3: memref<1x1x8xf32, #tpu.memory_space<vmem>>, %arg4: memref<1x1x8xf32, #tpu.memory_space<vmem>>, %arg5: memref<2x32x96xf32, #tpu.memory_space<vmem>>, %arg6: memref<2x32x32xf32, #tpu.memory_space<vmem>>, %arg7: memref<2x32x32xf32, #tpu.memory_space<vmem>>, %arg8: memref<2x32x64xf32, #tpu.memory_space<vmem>>, %arg9: memref<2x32x32xf32, #tpu.memory_space<vmem>>, %arg10: memref<2x1x32xf32, #tpu.memory_space<vmem>>, %arg11: memref<2x1x32xf32, #tpu.memory_space<vmem>>, %arg12: memref<2x32x128xf32, #tpu.memory_space<vmem>>, %arg13: memref<2x1x128xf32, #tpu.memory_space<vmem>>, %arg14: memref<2x128x32xf32, #tpu.memory_space<vmem>>, %arg15: memref<1x32xf32, #tpu.memory_space<vmem>>, %arg16: memref<1x32xf32, #tpu.memory_space<vmem>>, %arg17: memref<1x32xf32, #tpu.memory_space<vmem>>, %arg18: memref<1x32xf32, #tpu.memory_space<vmem>>, %arg19: memref<32x72xf32, #tpu.memory_space<vmem>>, %arg20: memref<1x8x32xf32, #tpu.memory_space<vmem>>, %arg21: memref<1x8x72xf32, #tpu.memory_space<vmem>>) attributes {dimension_semantics = [#tpu.dimension_semantics<parallel>], iteration_bounds = array<i64: 2>, scalar_prefetch = 0 : i64, scratch_operands = 0 : i64, tpu.core_type = #tpu.core_type<tc>, window_params = [{transform_indices = @transform_0, window_bounds = array<i64: 1, 8, 32>}, {transform_indices = @transform_1, window_bounds = array<i64: 1, 8, 32>}, {transform_indices = @transform_2, window_bounds = array<i64: 1, 1, 8>}, {transform_indices = @transform_3, window_bounds = array<i64: 1, 1, 8>}, {pipeline_mode = #tpu.pipeline_mode<synchronous>, transform_indices = @transform_4, window_bounds = array<i64: 2, 32, 96>}, {pipeline_mode = #tpu.pipeline_mode<synchronous>, transform_indices = @transform_5, window_bounds = array<i64: 2, 32, 32>}, {pipeline_mode = #tpu.pipeline_mode<synchronous>, transform_indices = @transform_6, window_bounds = array<i64: 2, 32, 32>}, {pipeline_mode = #tpu.pipeline_mode<synchronous>, transform_indices = @transform_7, window_bounds = array<i64: 2, 32, 64>}, {pipeline_mode = #tpu.pipeline_mode<synchronous>, transform_indices = @transform_8, window_bounds = array<i64: 2, 32, 32>}, {pipeline_mode = #tpu.pipeline_mode<synchronous>, transform_indices = @transform_9, window_bounds = array<i64: 2, 1, 32>}, {pipeline_mode = #tpu.pipeline_mode<synchronous>, transform_indices = @transform_10, window_bounds = array<i64: 2, 1, 32>}, {pipeline_mode = #tpu.pipeline_mode<synchronous>, transform_indices = @transform_11, window_bounds = array<i64: 2, 32, 128>}, {pipeline_mode = #tpu.pipeline_mode<synchronous>, transform_indices = @transform_12, window_bounds = array<i64: 2, 1, 128>}, {pipeline_mode = #tpu.pipeline_mode<synchronous>, transform_indices = @transform_13, window_bounds = array<i64: 2, 128, 32>}, {pipeline_mode = #tpu.pipeline_mode<synchronous>, transform_indices = @transform_14, window_bounds = array<i64: 1, 32>}, {pipeline_mode = #tpu.pipeline_mode<synchronous>, transform_indices = @transform_15, window_bounds = array<i64: 1, 32>}, {pipeline_mode = #tpu.pipeline_mode<synchronous>, transform_indices = @transform_16, window_bounds = array<i64: 1, 32>}, {pipeline_mode = #tpu.pipeline_mode<synchronous>, transform_indices = @transform_17, window_bounds = array<i64: 1, 32>}, {pipeline_mode = #tpu.pipeline_mode<synchronous>, transform_indices = @transform_18, window_bounds = array<i64: 32, 72>}, {transform_indices = @transform_19, window_bounds = array<i64: 1, 8, 32>}, {transform_indices = @transform_20, window_bounds = array<i64: 1, 8, 72>}]} {
    %c0 = arith.constant 0 : index
    %c0_0 = arith.constant 0 : index
    %c0_1 = arith.constant 0 : index
    %0 = vector.load %arg1[%c0, %c0_0, %c0_1] : memref<1x8x32xf32, #tpu.memory_space<vmem>>, vector<1x8x32xf32>
    %1 = vector.shape_cast %0 : vector<1x8x32xf32> to vector<8x32xf32>
    %c0_2 = arith.constant 0 : index
    %c0_3 = arith.constant 0 : index
    %c0_4 = arith.constant 0 : index
    %2 = vector.load %arg2[%c0_2, %c0_3, %c0_4] : memref<1x8x32xf32, #tpu.memory_space<vmem>>, vector<1x8x32xf32>
    %3 = vector.shape_cast %2 : vector<1x8x32xf32> to vector<8x32xf32>
    %c0_5 = arith.constant 0 : index
    %c0_6 = arith.constant 0 : index
    %c0_7 = arith.constant 0 : index
    %4 = vector.load %arg3[%c0_5, %c0_6, %c0_7] : memref<1x1x8xf32, #tpu.memory_space<vmem>>, vector<1x1x8xf32>
    %5 = vector.shape_cast %4 : vector<1x1x8xf32> to vector<1x8xf32>
    %c0_8 = arith.constant 0 : index
    %c0_9 = arith.constant 0 : index
    %c0_10 = arith.constant 0 : index
    %6 = vector.load %arg4[%c0_8, %c0_9, %c0_10] : memref<1x1x8xf32, #tpu.memory_space<vmem>>, vector<1x1x8xf32>
    %7 = vector.shape_cast %6 : vector<1x1x8xf32> to vector<1x8xf32>
    %c0_11 = arith.constant 0 : index
    %c0_12 = arith.constant 0 : index
    %8 = vector.load %arg15[%c0_11, %c0_12] : memref<1x32xf32, #tpu.memory_space<vmem>>, vector<1x32xf32>
    %cst = arith.constant dense<0.000000e+00> : vector<8xf32>
    %9 = vector.multi_reduction <add>, %1, %cst [1] : vector<8x32xf32> to vector<8xf32>
    %10 = vector.shape_cast %9 : vector<8xf32> to vector<8x1xf32>
    %cst_13 = arith.constant 3.200000e+01 : f32
    %11 = vector.broadcast %cst_13 : f32 to vector<8x1xf32>
    %12 = arith.divf %10, %11 : vector<8x1xf32>
    %13 = vector.broadcast %12 : vector<8x1xf32> to vector<8x32xf32>
    %14 = arith.subf %1, %13 : vector<8x32xf32>
    %15 = arith.mulf %14, %14 : vector<8x32xf32>
    %cst_14 = arith.constant dense<0.000000e+00> : vector<8xf32>
    %16 = vector.multi_reduction <add>, %15, %cst_14 [1] : vector<8x32xf32> to vector<8xf32>
    %17 = vector.shape_cast %16 : vector<8xf32> to vector<8x1xf32>
    %cst_15 = arith.constant 3.200000e+01 : f32
    %18 = vector.broadcast %cst_15 : f32 to vector<8x1xf32>
    %19 = arith.divf %17, %18 : vector<8x1xf32>
    %20 = vector.broadcast %12 : vector<8x1xf32> to vector<8x32xf32>
    %21 = arith.subf %1, %20 : vector<8x32xf32>
    %cst_16 = arith.constant 9.99999974E-6 : f32
    %22 = vector.broadcast %cst_16 : f32 to vector<8x1xf32>
    %23 = arith.addf %19, %22 : vector<8x1xf32>
    %24 = math.rsqrt %23 : vector<8x1xf32>
    %25 = vector.broadcast %24 : vector<8x1xf32> to vector<8x32xf32>
    %26 = arith.mulf %21, %25 : vector<8x32xf32>
    %27 = vector.broadcast %8 : vector<1x32xf32> to vector<8x32xf32>
    %28 = arith.mulf %26, %27 : vector<8x32xf32>
    %c0_17 = arith.constant 0 : index
    %c0_18 = arith.constant 0 : index
    %c0_19 = arith.constant 0 : index
    %29 = vector.load %arg5[%c0_17, %c0_18, %c0_19] : memref<2x32x96xf32, #tpu.memory_space<vmem>>, vector<1x32x96xf32>
    %30 = vector.shape_cast %29 : vector<1x32x96xf32> to vector<32x96xf32>
    %cst_20 = arith.constant dense<0.000000e+00> : vector<8x96xf32>
    %31 = tpu.matmul %28, %30, %cst_20 {dimension_numbers = #tpu.dot_dimension_numbers<[1], [0], [0], [1], [0, 0, 1, 1], [], []>} : vector<8x32xf32>, vector<32x96xf32>, vector<8x96xf32> -> vector<8x96xf32>
    %32 = vector.extract_strided_slice %31 {offsets = [0, 0], sizes = [8, 32], strides = [1, 1]} : vector<8x96xf32> to vector<8x32xf32>
    %33 = vector.extract_strided_slice %31 {offsets = [0, 32], sizes = [8, 32], strides = [1, 1]} : vector<8x96xf32> to vector<8x32xf32>
    %34 = vector.extract_strided_slice %31 {offsets = [0, 64], sizes = [8, 32], strides = [1, 1]} : vector<8x96xf32> to vector<8x32xf32>
    %c0_21 = arith.constant 0 : index
    %c0_22 = arith.constant 0 : index
    %c0_23 = arith.constant 0 : index
    %35 = vector.load %arg6[%c0_21, %c0_22, %c0_23] : memref<2x32x32xf32, #tpu.memory_space<vmem>>, vector<1x32x32xf32>
    %36 = vector.shape_cast %35 : vector<1x32x32xf32> to vector<32x32xf32>
    %cst_24 = arith.constant 0.000000e+00 : f32
    %37 = vector.broadcast %cst_24 : f32 to vector<8x32xf32>
    %38 = vector.extract_strided_slice %32 {offsets = [0, 0], sizes = [8, 8], strides = [1, 1]} : vector<8x32xf32> to vector<8x8xf32>
    %39 = vector.extract_strided_slice %33 {offsets = [0, 0], sizes = [8, 8], strides = [1, 1]} : vector<8x32xf32> to vector<8x8xf32>
    %40 = vector.extract_strided_slice %34 {offsets = [0, 0], sizes = [8, 8], strides = [1, 1]} : vector<8x32xf32> to vector<8x8xf32>
    "tpu.trace_start"() <{level = 10 : i32, message = "qd,kd->qk"}> : () -> ()
    %cst_25 = arith.constant dense<0.000000e+00> : vector<8x8xf32>
    %41 = tpu.matmul %38, %39, %cst_25 {dimension_numbers = #tpu.dot_dimension_numbers<[1], [1], [0], [0], [0, 0, 1, 0], [], []>} : vector<8x8xf32>, vector<8x8xf32>, vector<8x8xf32> -> vector<8x8xf32>
    "tpu.trace_stop"() : () -> ()
    %cst_26 = arith.constant 0.353553385 : f32
    %42 = vector.broadcast %cst_26 : f32 to vector<8x8xf32>
    %43 = arith.mulf %41, %42 : vector<8x8xf32>
    %44 = vector.broadcast %5 : vector<1x8xf32> to vector<8x8xf32>
    %45 = arith.addf %43, %44 : vector<8x8xf32>
    %cst_27 = arith.constant dense<0xFF800000> : vector<8xf32>
    %46 = vector.multi_reduction <maximumf>, %45, %cst_27 [1] : vector<8x8xf32> to vector<8xf32>
    %47 = vector.shape_cast %46 : vector<8xf32> to vector<8x1xf32>
    %48 = vector.broadcast %47 : vector<8x1xf32> to vector<8x8xf32>
    %49 = arith.subf %45, %48 : vector<8x8xf32>
    %50 = math.exp %49 : vector<8x8xf32>
    "tpu.trace_start"() <{level = 10 : i32, message = "qk,kd->qd"}> : () -> ()
    %cst_28 = arith.constant dense<0.000000e+00> : vector<8x8xf32>
    %51 = tpu.matmul %50, %40, %cst_28 {dimension_numbers = #tpu.dot_dimension_numbers<[1], [0], [0], [1], [0, 0, 1, 1], [], []>} : vector<8x8xf32>, vector<8x8xf32>, vector<8x8xf32> -> vector<8x8xf32>
    "tpu.trace_stop"() : () -> ()
    %cst_29 = arith.constant dense<0.000000e+00> : vector<8xf32>
    %52 = vector.multi_reduction <add>, %50, %cst_29 [1] : vector<8x8xf32> to vector<8xf32>
    %53 = vector.shape_cast %52 : vector<8xf32> to vector<8x1xf32>
    %54 = vector.broadcast %53 : vector<8x1xf32> to vector<8x8xf32>
    %55 = arith.divf %51, %54 : vector<8x8xf32>
    %56 = vector.extract_strided_slice %36 {offsets = [0, 0], sizes = [8, 32], strides = [1, 1]} : vector<32x32xf32> to vector<8x32xf32>
    %cst_30 = arith.constant dense<0.000000e+00> : vector<8x32xf32>
    %57 = tpu.matmul %55, %56, %cst_30 {dimension_numbers = #tpu.dot_dimension_numbers<[1], [0], [0], [1], [0, 0, 1, 1], [], []>} : vector<8x8xf32>, vector<8x32xf32>, vector<8x32xf32> -> vector<8x32xf32>
    %58 = arith.addf %37, %57 : vector<8x32xf32>
    %59 = vector.extract_strided_slice %32 {offsets = [0, 8], sizes = [8, 8], strides = [1, 1]} : vector<8x32xf32> to vector<8x8xf32>
    %60 = vector.extract_strided_slice %33 {offsets = [0, 8], sizes = [8, 8], strides = [1, 1]} : vector<8x32xf32> to vector<8x8xf32>
    %61 = vector.extract_strided_slice %34 {offsets = [0, 8], sizes = [8, 8], strides = [1, 1]} : vector<8x32xf32> to vector<8x8xf32>
    "tpu.trace_start"() <{level = 10 : i32, message = "qd,kd->qk"}> : () -> ()
    %cst_31 = arith.constant dense<0.000000e+00> : vector<8x8xf32>
    %62 = tpu.matmul %59, %60, %cst_31 {dimension_numbers = #tpu.dot_dimension_numbers<[1], [1], [0], [0], [0, 0, 1, 0], [], []>} : vector<8x8xf32>, vector<8x8xf32>, vector<8x8xf32> -> vector<8x8xf32>
    "tpu.trace_stop"() : () -> ()
    %cst_32 = arith.constant 0.353553385 : f32
    %63 = vector.broadcast %cst_32 : f32 to vector<8x8xf32>
    %64 = arith.mulf %62, %63 : vector<8x8xf32>
    %65 = vector.broadcast %5 : vector<1x8xf32> to vector<8x8xf32>
    %66 = arith.addf %64, %65 : vector<8x8xf32>
    %cst_33 = arith.constant dense<0xFF800000> : vector<8xf32>
    %67 = vector.multi_reduction <maximumf>, %66, %cst_33 [1] : vector<8x8xf32> to vector<8xf32>
    %68 = vector.shape_cast %67 : vector<8xf32> to vector<8x1xf32>
    %69 = vector.broadcast %68 : vector<8x1xf32> to vector<8x8xf32>
    %70 = arith.subf %66, %69 : vector<8x8xf32>
    %71 = math.exp %70 : vector<8x8xf32>
    "tpu.trace_start"() <{level = 10 : i32, message = "qk,kd->qd"}> : () -> ()
    %cst_34 = arith.constant dense<0.000000e+00> : vector<8x8xf32>
    %72 = tpu.matmul %71, %61, %cst_34 {dimension_numbers = #tpu.dot_dimension_numbers<[1], [0], [0], [1], [0, 0, 1, 1], [], []>} : vector<8x8xf32>, vector<8x8xf32>, vector<8x8xf32> -> vector<8x8xf32>
    "tpu.trace_stop"() : () -> ()
    %cst_35 = arith.constant dense<0.000000e+00> : vector<8xf32>
    %73 = vector.multi_reduction <add>, %71, %cst_35 [1] : vector<8x8xf32> to vector<8xf32>
    %74 = vector.shape_cast %73 : vector<8xf32> to vector<8x1xf32>
    %75 = vector.broadcast %74 : vector<8x1xf32> to vector<8x8xf32>
    %76 = arith.divf %72, %75 : vector<8x8xf32>
    %77 = vector.extract_strided_slice %36 {offsets = [8, 0], sizes = [8, 32], strides = [1, 1]} : vector<32x32xf32> to vector<8x32xf32>
    %cst_36 = arith.constant dense<0.000000e+00> : vector<8x32xf32>
    %78 = tpu.matmul %76, %77, %cst_36 {dimension_numbers = #tpu.dot_dimension_numbers<[1], [0], [0], [1], [0, 0, 1, 1], [], []>} : vector<8x8xf32>, vector<8x32xf32>, vector<8x32xf32> -> vector<8x32xf32>
    %79 = arith.addf %58, %78 : vector<8x32xf32>
    %80 = vector.extract_strided_slice %32 {offsets = [0, 16], sizes = [8, 8], strides = [1, 1]} : vector<8x32xf32> to vector<8x8xf32>
    %81 = vector.extract_strided_slice %33 {offsets = [0, 16], sizes = [8, 8], strides = [1, 1]} : vector<8x32xf32> to vector<8x8xf32>
    %82 = vector.extract_strided_slice %34 {offsets = [0, 16], sizes = [8, 8], strides = [1, 1]} : vector<8x32xf32> to vector<8x8xf32>
    "tpu.trace_start"() <{level = 10 : i32, message = "qd,kd->qk"}> : () -> ()
    %cst_37 = arith.constant dense<0.000000e+00> : vector<8x8xf32>
    %83 = tpu.matmul %80, %81, %cst_37 {dimension_numbers = #tpu.dot_dimension_numbers<[1], [1], [0], [0], [0, 0, 1, 0], [], []>} : vector<8x8xf32>, vector<8x8xf32>, vector<8x8xf32> -> vector<8x8xf32>
    "tpu.trace_stop"() : () -> ()
    %cst_38 = arith.constant 0.353553385 : f32
    %84 = vector.broadcast %cst_38 : f32 to vector<8x8xf32>
    %85 = arith.mulf %83, %84 : vector<8x8xf32>
    %86 = vector.broadcast %5 : vector<1x8xf32> to vector<8x8xf32>
    %87 = arith.addf %85, %86 : vector<8x8xf32>
    %cst_39 = arith.constant dense<0xFF800000> : vector<8xf32>
    %88 = vector.multi_reduction <maximumf>, %87, %cst_39 [1] : vector<8x8xf32> to vector<8xf32>
    %89 = vector.shape_cast %88 : vector<8xf32> to vector<8x1xf32>
    %90 = vector.broadcast %89 : vector<8x1xf32> to vector<8x8xf32>
    %91 = arith.subf %87, %90 : vector<8x8xf32>
    %92 = math.exp %91 : vector<8x8xf32>
    "tpu.trace_start"() <{level = 10 : i32, message = "qk,kd->qd"}> : () -> ()
    %cst_40 = arith.constant dense<0.000000e+00> : vector<8x8xf32>
    %93 = tpu.matmul %92, %82, %cst_40 {dimension_numbers = #tpu.dot_dimension_numbers<[1], [0], [0], [1], [0, 0, 1, 1], [], []>} : vector<8x8xf32>, vector<8x8xf32>, vector<8x8xf32> -> vector<8x8xf32>
    "tpu.trace_stop"() : () -> ()
    %cst_41 = arith.constant dense<0.000000e+00> : vector<8xf32>
    %94 = vector.multi_reduction <add>, %92, %cst_41 [1] : vector<8x8xf32> to vector<8xf32>
    %95 = vector.shape_cast %94 : vector<8xf32> to vector<8x1xf32>
    %96 = vector.broadcast %95 : vector<8x1xf32> to vector<8x8xf32>
    %97 = arith.divf %93, %96 : vector<8x8xf32>
    %98 = vector.extract_strided_slice %36 {offsets = [16, 0], sizes = [8, 32], strides = [1, 1]} : vector<32x32xf32> to vector<8x32xf32>
    %cst_42 = arith.constant dense<0.000000e+00> : vector<8x32xf32>
    %99 = tpu.matmul %97, %98, %cst_42 {dimension_numbers = #tpu.dot_dimension_numbers<[1], [0], [0], [1], [0, 0, 1, 1], [], []>} : vector<8x8xf32>, vector<8x32xf32>, vector<8x32xf32> -> vector<8x32xf32>
    %100 = arith.addf %79, %99 : vector<8x32xf32>
    %101 = vector.extract_strided_slice %32 {offsets = [0, 24], sizes = [8, 8], strides = [1, 1]} : vector<8x32xf32> to vector<8x8xf32>
    %102 = vector.extract_strided_slice %33 {offsets = [0, 24], sizes = [8, 8], strides = [1, 1]} : vector<8x32xf32> to vector<8x8xf32>
    %103 = vector.extract_strided_slice %34 {offsets = [0, 24], sizes = [8, 8], strides = [1, 1]} : vector<8x32xf32> to vector<8x8xf32>
    "tpu.trace_start"() <{level = 10 : i32, message = "qd,kd->qk"}> : () -> ()
    %cst_43 = arith.constant dense<0.000000e+00> : vector<8x8xf32>
    %104 = tpu.matmul %101, %102, %cst_43 {dimension_numbers = #tpu.dot_dimension_numbers<[1], [1], [0], [0], [0, 0, 1, 0], [], []>} : vector<8x8xf32>, vector<8x8xf32>, vector<8x8xf32> -> vector<8x8xf32>
    "tpu.trace_stop"() : () -> ()
    %cst_44 = arith.constant 0.353553385 : f32
    %105 = vector.broadcast %cst_44 : f32 to vector<8x8xf32>
    %106 = arith.mulf %104, %105 : vector<8x8xf32>
    %107 = vector.broadcast %5 : vector<1x8xf32> to vector<8x8xf32>
    %108 = arith.addf %106, %107 : vector<8x8xf32>
    %cst_45 = arith.constant dense<0xFF800000> : vector<8xf32>
    %109 = vector.multi_reduction <maximumf>, %108, %cst_45 [1] : vector<8x8xf32> to vector<8xf32>
    %110 = vector.shape_cast %109 : vector<8xf32> to vector<8x1xf32>
    %111 = vector.broadcast %110 : vector<8x1xf32> to vector<8x8xf32>
    %112 = arith.subf %108, %111 : vector<8x8xf32>
    %113 = math.exp %112 : vector<8x8xf32>
    "tpu.trace_start"() <{level = 10 : i32, message = "qk,kd->qd"}> : () -> ()
    %cst_46 = arith.constant dense<0.000000e+00> : vector<8x8xf32>
    %114 = tpu.matmul %113, %103, %cst_46 {dimension_numbers = #tpu.dot_dimension_numbers<[1], [0], [0], [1], [0, 0, 1, 1], [], []>} : vector<8x8xf32>, vector<8x8xf32>, vector<8x8xf32> -> vector<8x8xf32>
    "tpu.trace_stop"() : () -> ()
    %cst_47 = arith.constant dense<0.000000e+00> : vector<8xf32>
    %115 = vector.multi_reduction <add>, %113, %cst_47 [1] : vector<8x8xf32> to vector<8xf32>
    %116 = vector.shape_cast %115 : vector<8xf32> to vector<8x1xf32>
    %117 = vector.broadcast %116 : vector<8x1xf32> to vector<8x8xf32>
    %118 = arith.divf %114, %117 : vector<8x8xf32>
    %119 = vector.extract_strided_slice %36 {offsets = [24, 0], sizes = [8, 32], strides = [1, 1]} : vector<32x32xf32> to vector<8x32xf32>
    %cst_48 = arith.constant dense<0.000000e+00> : vector<8x32xf32>
    %120 = tpu.matmul %118, %119, %cst_48 {dimension_numbers = #tpu.dot_dimension_numbers<[1], [0], [0], [1], [0, 0, 1, 1], [], []>} : vector<8x8xf32>, vector<8x32xf32>, vector<8x32xf32> -> vector<8x32xf32>
    %121 = arith.addf %100, %120 : vector<8x32xf32>
    %122 = arith.addf %121, %28 : vector<8x32xf32>
    %c0_49 = arith.constant 0 : index
    %c0_50 = arith.constant 0 : index
    %123 = vector.load %arg16[%c0_49, %c0_50] : memref<1x32xf32, #tpu.memory_space<vmem>>, vector<1x32xf32>
    %cst_51 = arith.constant dense<0.000000e+00> : vector<8xf32>
    %124 = vector.multi_reduction <add>, %122, %cst_51 [1] : vector<8x32xf32> to vector<8xf32>
    %125 = vector.shape_cast %124 : vector<8xf32> to vector<8x1xf32>
    %cst_52 = arith.constant 3.200000e+01 : f32
    %126 = vector.broadcast %cst_52 : f32 to vector<8x1xf32>
    %127 = arith.divf %125, %126 : vector<8x1xf32>
    %128 = vector.broadcast %127 : vector<8x1xf32> to vector<8x32xf32>
    %129 = arith.subf %122, %128 : vector<8x32xf32>
    %130 = arith.mulf %129, %129 : vector<8x32xf32>
    %cst_53 = arith.constant dense<0.000000e+00> : vector<8xf32>
    %131 = vector.multi_reduction <add>, %130, %cst_53 [1] : vector<8x32xf32> to vector<8xf32>
    %132 = vector.shape_cast %131 : vector<8xf32> to vector<8x1xf32>
    %cst_54 = arith.constant 3.200000e+01 : f32
    %133 = vector.broadcast %cst_54 : f32 to vector<8x1xf32>
    %134 = arith.divf %132, %133 : vector<8x1xf32>
    %135 = vector.broadcast %127 : vector<8x1xf32> to vector<8x32xf32>
    %136 = arith.subf %122, %135 : vector<8x32xf32>
    %cst_55 = arith.constant 9.99999974E-6 : f32
    %137 = vector.broadcast %cst_55 : f32 to vector<8x1xf32>
    %138 = arith.addf %134, %137 : vector<8x1xf32>
    %139 = math.rsqrt %138 : vector<8x1xf32>
    %140 = vector.broadcast %139 : vector<8x1xf32> to vector<8x32xf32>
    %141 = arith.mulf %136, %140 : vector<8x32xf32>
    %142 = vector.broadcast %123 : vector<1x32xf32> to vector<8x32xf32>
    %143 = arith.mulf %141, %142 : vector<8x32xf32>
    %c0_56 = arith.constant 0 : index
    %c0_57 = arith.constant 0 : index
    %c0_58 = arith.constant 0 : index
    %144 = vector.load %arg7[%c0_56, %c0_57, %c0_58] : memref<2x32x32xf32, #tpu.memory_space<vmem>>, vector<1x32x32xf32>
    %145 = vector.shape_cast %144 : vector<1x32x32xf32> to vector<32x32xf32>
    %cst_59 = arith.constant dense<0.000000e+00> : vector<8x32xf32>
    %146 = tpu.matmul %143, %145, %cst_59 {dimension_numbers = #tpu.dot_dimension_numbers<[1], [0], [0], [1], [0, 0, 1, 1], [], []>} : vector<8x32xf32>, vector<32x32xf32>, vector<8x32xf32> -> vector<8x32xf32>
    %c0_60 = arith.constant 0 : index
    %c0_61 = arith.constant 0 : index
    %c0_62 = arith.constant 0 : index
    %147 = vector.load %arg8[%c0_60, %c0_61, %c0_62] : memref<2x32x64xf32, #tpu.memory_space<vmem>>, vector<1x32x64xf32>
    %148 = vector.shape_cast %147 : vector<1x32x64xf32> to vector<32x64xf32>
    %cst_63 = arith.constant dense<0.000000e+00> : vector<8x64xf32>
    %149 = tpu.matmul %3, %148, %cst_63 {dimension_numbers = #tpu.dot_dimension_numbers<[1], [0], [0], [1], [0, 0, 1, 1], [], []>} : vector<8x32xf32>, vector<32x64xf32>, vector<8x64xf32> -> vector<8x64xf32>
    %150 = vector.extract_strided_slice %149 {offsets = [0, 0], sizes = [8, 32], strides = [1, 1]} : vector<8x64xf32> to vector<8x32xf32>
    %151 = vector.extract_strided_slice %149 {offsets = [0, 32], sizes = [8, 32], strides = [1, 1]} : vector<8x64xf32> to vector<8x32xf32>
    %c0_64 = arith.constant 0 : index
    %c0_65 = arith.constant 0 : index
    %c0_66 = arith.constant 0 : index
    %152 = vector.load %arg9[%c0_64, %c0_65, %c0_66] : memref<2x32x32xf32, #tpu.memory_space<vmem>>, vector<1x32x32xf32>
    %153 = vector.shape_cast %152 : vector<1x32x32xf32> to vector<32x32xf32>
    %c0_67 = arith.constant 0 : index
    %c0_68 = arith.constant 0 : index
    %c0_69 = arith.constant 0 : index
    %154 = vector.load %arg10[%c0_67, %c0_68, %c0_69] : memref<2x1x32xf32, #tpu.memory_space<vmem>>, vector<1x1x32xf32>
    %155 = vector.shape_cast %154 : vector<1x1x32xf32> to vector<1x32xf32>
    %c0_70 = arith.constant 0 : index
    %c0_71 = arith.constant 0 : index
    %c0_72 = arith.constant 0 : index
    %156 = vector.load %arg11[%c0_70, %c0_71, %c0_72] : memref<2x1x32xf32, #tpu.memory_space<vmem>>, vector<1x1x32xf32>
    %157 = vector.shape_cast %156 : vector<1x1x32xf32> to vector<1x32xf32>
    %cst_73 = arith.constant 0.000000e+00 : f32
    %158 = vector.broadcast %cst_73 : f32 to vector<8x32xf32>
    %159 = vector.extract_strided_slice %146 {offsets = [0, 0], sizes = [8, 8], strides = [1, 1]} : vector<8x32xf32> to vector<8x8xf32>
    %160 = vector.extract_strided_slice %150 {offsets = [0, 0], sizes = [8, 8], strides = [1, 1]} : vector<8x32xf32> to vector<8x8xf32>
    %161 = vector.extract_strided_slice %151 {offsets = [0, 0], sizes = [8, 8], strides = [1, 1]} : vector<8x32xf32> to vector<8x8xf32>
    "tpu.trace_start"() <{level = 10 : i32, message = "qd,kd->qk"}> : () -> ()
    %cst_74 = arith.constant dense<0.000000e+00> : vector<8x8xf32>
    %162 = tpu.matmul %159, %160, %cst_74 {dimension_numbers = #tpu.dot_dimension_numbers<[1], [1], [0], [0], [0, 0, 1, 0], [], []>} : vector<8x8xf32>, vector<8x8xf32>, vector<8x8xf32> -> vector<8x8xf32>
    "tpu.trace_stop"() : () -> ()
    %cst_75 = arith.constant 0.353553385 : f32
    %163 = vector.broadcast %cst_75 : f32 to vector<8x8xf32>
    %164 = arith.mulf %162, %163 : vector<8x8xf32>
    %165 = vector.broadcast %7 : vector<1x8xf32> to vector<8x8xf32>
    %166 = arith.addf %164, %165 : vector<8x8xf32>
    %167 = vector.extract_strided_slice %155 {offsets = [0, 0], sizes = [1, 8], strides = [1, 1]} : vector<1x32xf32> to vector<1x8xf32>
    %168 = vector.broadcast %167 : vector<1x8xf32> to vector<8x8xf32>
    %169 = arith.mulf %159, %168 : vector<8x8xf32>
    %cst_76 = arith.constant dense<0.000000e+00> : vector<8xf32>
    %170 = vector.multi_reduction <add>, %169, %cst_76 [1] : vector<8x8xf32> to vector<8xf32>
    %171 = vector.shape_cast %170 : vector<8xf32> to vector<8x1xf32>
    %cst_77 = arith.constant 0.353553385 : f32
    %172 = vector.broadcast %cst_77 : f32 to vector<8x1xf32>
    %173 = arith.mulf %171, %172 : vector<8x1xf32>
    %cst_78 = arith.constant dense<0xFF800000> : vector<8xf32>
    %174 = vector.multi_reduction <maximumf>, %166, %cst_78 [1] : vector<8x8xf32> to vector<8xf32>
    %175 = vector.shape_cast %174 : vector<8xf32> to vector<8x1xf32>
    %176 = arith.maximumf %175, %173 : vector<8x1xf32>
    %177 = vector.broadcast %176 : vector<8x1xf32> to vector<8x8xf32>
    %178 = arith.subf %166, %177 : vector<8x8xf32>
    %179 = math.exp %178 : vector<8x8xf32>
    %180 = arith.subf %173, %176 : vector<8x1xf32>
    %181 = math.exp %180 : vector<8x1xf32>
    %cst_79 = arith.constant dense<0.000000e+00> : vector<8xf32>
    %182 = vector.multi_reduction <add>, %179, %cst_79 [1] : vector<8x8xf32> to vector<8xf32>
    %183 = vector.shape_cast %182 : vector<8xf32> to vector<8x1xf32>
    %184 = arith.addf %183, %181 : vector<8x1xf32>
    "tpu.trace_start"() <{level = 10 : i32, message = "qk,kd->qd"}> : () -> ()
    %cst_80 = arith.constant dense<0.000000e+00> : vector<8x8xf32>
    %185 = tpu.matmul %179, %161, %cst_80 {dimension_numbers = #tpu.dot_dimension_numbers<[1], [0], [0], [1], [0, 0, 1, 1], [], []>} : vector<8x8xf32>, vector<8x8xf32>, vector<8x8xf32> -> vector<8x8xf32>
    "tpu.trace_stop"() : () -> ()
    %186 = vector.extract_strided_slice %157 {offsets = [0, 0], sizes = [1, 8], strides = [1, 1]} : vector<1x32xf32> to vector<1x8xf32>
    %187 = vector.broadcast %181 : vector<8x1xf32> to vector<8x8xf32>
    %188 = vector.broadcast %186 : vector<1x8xf32> to vector<8x8xf32>
    %189 = arith.mulf %187, %188 : vector<8x8xf32>
    %190 = arith.addf %185, %189 : vector<8x8xf32>
    %191 = vector.broadcast %184 : vector<8x1xf32> to vector<8x8xf32>
    %192 = arith.divf %190, %191 : vector<8x8xf32>
    %193 = vector.extract_strided_slice %153 {offsets = [0, 0], sizes = [8, 32], strides = [1, 1]} : vector<32x32xf32> to vector<8x32xf32>
    %cst_81 = arith.constant dense<0.000000e+00> : vector<8x32xf32>
    %194 = tpu.matmul %192, %193, %cst_81 {dimension_numbers = #tpu.dot_dimension_numbers<[1], [0], [0], [1], [0, 0, 1, 1], [], []>} : vector<8x8xf32>, vector<8x32xf32>, vector<8x32xf32> -> vector<8x32xf32>
    %195 = arith.addf %158, %194 : vector<8x32xf32>
    %196 = vector.extract_strided_slice %146 {offsets = [0, 8], sizes = [8, 8], strides = [1, 1]} : vector<8x32xf32> to vector<8x8xf32>
    %197 = vector.extract_strided_slice %150 {offsets = [0, 8], sizes = [8, 8], strides = [1, 1]} : vector<8x32xf32> to vector<8x8xf32>
    %198 = vector.extract_strided_slice %151 {offsets = [0, 8], sizes = [8, 8], strides = [1, 1]} : vector<8x32xf32> to vector<8x8xf32>
    "tpu.trace_start"() <{level = 10 : i32, message = "qd,kd->qk"}> : () -> ()
    %cst_82 = arith.constant dense<0.000000e+00> : vector<8x8xf32>
    %199 = tpu.matmul %196, %197, %cst_82 {dimension_numbers = #tpu.dot_dimension_numbers<[1], [1], [0], [0], [0, 0, 1, 0], [], []>} : vector<8x8xf32>, vector<8x8xf32>, vector<8x8xf32> -> vector<8x8xf32>
    "tpu.trace_stop"() : () -> ()
    %cst_83 = arith.constant 0.353553385 : f32
    %200 = vector.broadcast %cst_83 : f32 to vector<8x8xf32>
    %201 = arith.mulf %199, %200 : vector<8x8xf32>
    %202 = vector.broadcast %7 : vector<1x8xf32> to vector<8x8xf32>
    %203 = arith.addf %201, %202 : vector<8x8xf32>
    %204 = vector.extract_strided_slice %155 {offsets = [0, 8], sizes = [1, 8], strides = [1, 1]} : vector<1x32xf32> to vector<1x8xf32>
    %205 = vector.broadcast %204 : vector<1x8xf32> to vector<8x8xf32>
    %206 = arith.mulf %196, %205 : vector<8x8xf32>
    %cst_84 = arith.constant dense<0.000000e+00> : vector<8xf32>
    %207 = vector.multi_reduction <add>, %206, %cst_84 [1] : vector<8x8xf32> to vector<8xf32>
    %208 = vector.shape_cast %207 : vector<8xf32> to vector<8x1xf32>
    %cst_85 = arith.constant 0.353553385 : f32
    %209 = vector.broadcast %cst_85 : f32 to vector<8x1xf32>
    %210 = arith.mulf %208, %209 : vector<8x1xf32>
    %cst_86 = arith.constant dense<0xFF800000> : vector<8xf32>
    %211 = vector.multi_reduction <maximumf>, %203, %cst_86 [1] : vector<8x8xf32> to vector<8xf32>
    %212 = vector.shape_cast %211 : vector<8xf32> to vector<8x1xf32>
    %213 = arith.maximumf %212, %210 : vector<8x1xf32>
    %214 = vector.broadcast %213 : vector<8x1xf32> to vector<8x8xf32>
    %215 = arith.subf %203, %214 : vector<8x8xf32>
    %216 = math.exp %215 : vector<8x8xf32>
    %217 = arith.subf %210, %213 : vector<8x1xf32>
    %218 = math.exp %217 : vector<8x1xf32>
    %cst_87 = arith.constant dense<0.000000e+00> : vector<8xf32>
    %219 = vector.multi_reduction <add>, %216, %cst_87 [1] : vector<8x8xf32> to vector<8xf32>
    %220 = vector.shape_cast %219 : vector<8xf32> to vector<8x1xf32>
    %221 = arith.addf %220, %218 : vector<8x1xf32>
    "tpu.trace_start"() <{level = 10 : i32, message = "qk,kd->qd"}> : () -> ()
    %cst_88 = arith.constant dense<0.000000e+00> : vector<8x8xf32>
    %222 = tpu.matmul %216, %198, %cst_88 {dimension_numbers = #tpu.dot_dimension_numbers<[1], [0], [0], [1], [0, 0, 1, 1], [], []>} : vector<8x8xf32>, vector<8x8xf32>, vector<8x8xf32> -> vector<8x8xf32>
    "tpu.trace_stop"() : () -> ()
    %223 = vector.extract_strided_slice %157 {offsets = [0, 8], sizes = [1, 8], strides = [1, 1]} : vector<1x32xf32> to vector<1x8xf32>
    %224 = vector.broadcast %218 : vector<8x1xf32> to vector<8x8xf32>
    %225 = vector.broadcast %223 : vector<1x8xf32> to vector<8x8xf32>
    %226 = arith.mulf %224, %225 : vector<8x8xf32>
    %227 = arith.addf %222, %226 : vector<8x8xf32>
    %228 = vector.broadcast %221 : vector<8x1xf32> to vector<8x8xf32>
    %229 = arith.divf %227, %228 : vector<8x8xf32>
    %230 = vector.extract_strided_slice %153 {offsets = [8, 0], sizes = [8, 32], strides = [1, 1]} : vector<32x32xf32> to vector<8x32xf32>
    %cst_89 = arith.constant dense<0.000000e+00> : vector<8x32xf32>
    %231 = tpu.matmul %229, %230, %cst_89 {dimension_numbers = #tpu.dot_dimension_numbers<[1], [0], [0], [1], [0, 0, 1, 1], [], []>} : vector<8x8xf32>, vector<8x32xf32>, vector<8x32xf32> -> vector<8x32xf32>
    %232 = arith.addf %195, %231 : vector<8x32xf32>
    %233 = vector.extract_strided_slice %146 {offsets = [0, 16], sizes = [8, 8], strides = [1, 1]} : vector<8x32xf32> to vector<8x8xf32>
    %234 = vector.extract_strided_slice %150 {offsets = [0, 16], sizes = [8, 8], strides = [1, 1]} : vector<8x32xf32> to vector<8x8xf32>
    %235 = vector.extract_strided_slice %151 {offsets = [0, 16], sizes = [8, 8], strides = [1, 1]} : vector<8x32xf32> to vector<8x8xf32>
    "tpu.trace_start"() <{level = 10 : i32, message = "qd,kd->qk"}> : () -> ()
    %cst_90 = arith.constant dense<0.000000e+00> : vector<8x8xf32>
    %236 = tpu.matmul %233, %234, %cst_90 {dimension_numbers = #tpu.dot_dimension_numbers<[1], [1], [0], [0], [0, 0, 1, 0], [], []>} : vector<8x8xf32>, vector<8x8xf32>, vector<8x8xf32> -> vector<8x8xf32>
    "tpu.trace_stop"() : () -> ()
    %cst_91 = arith.constant 0.353553385 : f32
    %237 = vector.broadcast %cst_91 : f32 to vector<8x8xf32>
    %238 = arith.mulf %236, %237 : vector<8x8xf32>
    %239 = vector.broadcast %7 : vector<1x8xf32> to vector<8x8xf32>
    %240 = arith.addf %238, %239 : vector<8x8xf32>
    %241 = vector.extract_strided_slice %155 {offsets = [0, 16], sizes = [1, 8], strides = [1, 1]} : vector<1x32xf32> to vector<1x8xf32>
    %242 = vector.broadcast %241 : vector<1x8xf32> to vector<8x8xf32>
    %243 = arith.mulf %233, %242 : vector<8x8xf32>
    %cst_92 = arith.constant dense<0.000000e+00> : vector<8xf32>
    %244 = vector.multi_reduction <add>, %243, %cst_92 [1] : vector<8x8xf32> to vector<8xf32>
    %245 = vector.shape_cast %244 : vector<8xf32> to vector<8x1xf32>
    %cst_93 = arith.constant 0.353553385 : f32
    %246 = vector.broadcast %cst_93 : f32 to vector<8x1xf32>
    %247 = arith.mulf %245, %246 : vector<8x1xf32>
    %cst_94 = arith.constant dense<0xFF800000> : vector<8xf32>
    %248 = vector.multi_reduction <maximumf>, %240, %cst_94 [1] : vector<8x8xf32> to vector<8xf32>
    %249 = vector.shape_cast %248 : vector<8xf32> to vector<8x1xf32>
    %250 = arith.maximumf %249, %247 : vector<8x1xf32>
    %251 = vector.broadcast %250 : vector<8x1xf32> to vector<8x8xf32>
    %252 = arith.subf %240, %251 : vector<8x8xf32>
    %253 = math.exp %252 : vector<8x8xf32>
    %254 = arith.subf %247, %250 : vector<8x1xf32>
    %255 = math.exp %254 : vector<8x1xf32>
    %cst_95 = arith.constant dense<0.000000e+00> : vector<8xf32>
    %256 = vector.multi_reduction <add>, %253, %cst_95 [1] : vector<8x8xf32> to vector<8xf32>
    %257 = vector.shape_cast %256 : vector<8xf32> to vector<8x1xf32>
    %258 = arith.addf %257, %255 : vector<8x1xf32>
    "tpu.trace_start"() <{level = 10 : i32, message = "qk,kd->qd"}> : () -> ()
    %cst_96 = arith.constant dense<0.000000e+00> : vector<8x8xf32>
    %259 = tpu.matmul %253, %235, %cst_96 {dimension_numbers = #tpu.dot_dimension_numbers<[1], [0], [0], [1], [0, 0, 1, 1], [], []>} : vector<8x8xf32>, vector<8x8xf32>, vector<8x8xf32> -> vector<8x8xf32>
    "tpu.trace_stop"() : () -> ()
    %260 = vector.extract_strided_slice %157 {offsets = [0, 16], sizes = [1, 8], strides = [1, 1]} : vector<1x32xf32> to vector<1x8xf32>
    %261 = vector.broadcast %255 : vector<8x1xf32> to vector<8x8xf32>
    %262 = vector.broadcast %260 : vector<1x8xf32> to vector<8x8xf32>
    %263 = arith.mulf %261, %262 : vector<8x8xf32>
    %264 = arith.addf %259, %263 : vector<8x8xf32>
    %265 = vector.broadcast %258 : vector<8x1xf32> to vector<8x8xf32>
    %266 = arith.divf %264, %265 : vector<8x8xf32>
    %267 = vector.extract_strided_slice %153 {offsets = [16, 0], sizes = [8, 32], strides = [1, 1]} : vector<32x32xf32> to vector<8x32xf32>
    %cst_97 = arith.constant dense<0.000000e+00> : vector<8x32xf32>
    %268 = tpu.matmul %266, %267, %cst_97 {dimension_numbers = #tpu.dot_dimension_numbers<[1], [0], [0], [1], [0, 0, 1, 1], [], []>} : vector<8x8xf32>, vector<8x32xf32>, vector<8x32xf32> -> vector<8x32xf32>
    %269 = arith.addf %232, %268 : vector<8x32xf32>
    %270 = vector.extract_strided_slice %146 {offsets = [0, 24], sizes = [8, 8], strides = [1, 1]} : vector<8x32xf32> to vector<8x8xf32>
    %271 = vector.extract_strided_slice %150 {offsets = [0, 24], sizes = [8, 8], strides = [1, 1]} : vector<8x32xf32> to vector<8x8xf32>
    %272 = vector.extract_strided_slice %151 {offsets = [0, 24], sizes = [8, 8], strides = [1, 1]} : vector<8x32xf32> to vector<8x8xf32>
    "tpu.trace_start"() <{level = 10 : i32, message = "qd,kd->qk"}> : () -> ()
    %cst_98 = arith.constant dense<0.000000e+00> : vector<8x8xf32>
    %273 = tpu.matmul %270, %271, %cst_98 {dimension_numbers = #tpu.dot_dimension_numbers<[1], [1], [0], [0], [0, 0, 1, 0], [], []>} : vector<8x8xf32>, vector<8x8xf32>, vector<8x8xf32> -> vector<8x8xf32>
    "tpu.trace_stop"() : () -> ()
    %cst_99 = arith.constant 0.353553385 : f32
    %274 = vector.broadcast %cst_99 : f32 to vector<8x8xf32>
    %275 = arith.mulf %273, %274 : vector<8x8xf32>
    %276 = vector.broadcast %7 : vector<1x8xf32> to vector<8x8xf32>
    %277 = arith.addf %275, %276 : vector<8x8xf32>
    %278 = vector.extract_strided_slice %155 {offsets = [0, 24], sizes = [1, 8], strides = [1, 1]} : vector<1x32xf32> to vector<1x8xf32>
    %279 = vector.broadcast %278 : vector<1x8xf32> to vector<8x8xf32>
    %280 = arith.mulf %270, %279 : vector<8x8xf32>
    %cst_100 = arith.constant dense<0.000000e+00> : vector<8xf32>
    %281 = vector.multi_reduction <add>, %280, %cst_100 [1] : vector<8x8xf32> to vector<8xf32>
    %282 = vector.shape_cast %281 : vector<8xf32> to vector<8x1xf32>
    %cst_101 = arith.constant 0.353553385 : f32
    %283 = vector.broadcast %cst_101 : f32 to vector<8x1xf32>
    %284 = arith.mulf %282, %283 : vector<8x1xf32>
    %cst_102 = arith.constant dense<0xFF800000> : vector<8xf32>
    %285 = vector.multi_reduction <maximumf>, %277, %cst_102 [1] : vector<8x8xf32> to vector<8xf32>
    %286 = vector.shape_cast %285 : vector<8xf32> to vector<8x1xf32>
    %287 = arith.maximumf %286, %284 : vector<8x1xf32>
    %288 = vector.broadcast %287 : vector<8x1xf32> to vector<8x8xf32>
    %289 = arith.subf %277, %288 : vector<8x8xf32>
    %290 = math.exp %289 : vector<8x8xf32>
    %291 = arith.subf %284, %287 : vector<8x1xf32>
    %292 = math.exp %291 : vector<8x1xf32>
    %cst_103 = arith.constant dense<0.000000e+00> : vector<8xf32>
    %293 = vector.multi_reduction <add>, %290, %cst_103 [1] : vector<8x8xf32> to vector<8xf32>
    %294 = vector.shape_cast %293 : vector<8xf32> to vector<8x1xf32>
    %295 = arith.addf %294, %292 : vector<8x1xf32>
    "tpu.trace_start"() <{level = 10 : i32, message = "qk,kd->qd"}> : () -> ()
    %cst_104 = arith.constant dense<0.000000e+00> : vector<8x8xf32>
    %296 = tpu.matmul %290, %272, %cst_104 {dimension_numbers = #tpu.dot_dimension_numbers<[1], [0], [0], [1], [0, 0, 1, 1], [], []>} : vector<8x8xf32>, vector<8x8xf32>, vector<8x8xf32> -> vector<8x8xf32>
    "tpu.trace_stop"() : () -> ()
    %297 = vector.extract_strided_slice %157 {offsets = [0, 24], sizes = [1, 8], strides = [1, 1]} : vector<1x32xf32> to vector<1x8xf32>
    %298 = vector.broadcast %292 : vector<8x1xf32> to vector<8x8xf32>
    %299 = vector.broadcast %297 : vector<1x8xf32> to vector<8x8xf32>
    %300 = arith.mulf %298, %299 : vector<8x8xf32>
    %301 = arith.addf %296, %300 : vector<8x8xf32>
    %302 = vector.broadcast %295 : vector<8x1xf32> to vector<8x8xf32>
    %303 = arith.divf %301, %302 : vector<8x8xf32>
    %304 = vector.extract_strided_slice %153 {offsets = [24, 0], sizes = [8, 32], strides = [1, 1]} : vector<32x32xf32> to vector<8x32xf32>
    %cst_105 = arith.constant dense<0.000000e+00> : vector<8x32xf32>
    %305 = tpu.matmul %303, %304, %cst_105 {dimension_numbers = #tpu.dot_dimension_numbers<[1], [0], [0], [1], [0, 0, 1, 1], [], []>} : vector<8x8xf32>, vector<8x32xf32>, vector<8x32xf32> -> vector<8x32xf32>
    %306 = arith.addf %269, %305 : vector<8x32xf32>
    %307 = arith.addf %306, %122 : vector<8x32xf32>
    %c0_106 = arith.constant 0 : index
    %c0_107 = arith.constant 0 : index
    %c0_108 = arith.constant 0 : index
    %308 = vector.load %arg12[%c0_106, %c0_107, %c0_108] : memref<2x32x128xf32, #tpu.memory_space<vmem>>, vector<1x32x128xf32>
    %309 = vector.shape_cast %308 : vector<1x32x128xf32> to vector<32x128xf32>
    %cst_109 = arith.constant dense<0.000000e+00> : vector<8x128xf32>
    %310 = tpu.matmul %307, %309, %cst_109 {dimension_numbers = #tpu.dot_dimension_numbers<[1], [0], [0], [1], [0, 0, 1, 1], [], []>} : vector<8x32xf32>, vector<32x128xf32>, vector<8x128xf32> -> vector<8x128xf32>
    %cst_110 = arith.constant 5.000000e-01 : f32
    %311 = vector.broadcast %cst_110 : f32 to vector<8x128xf32>
    %312 = arith.mulf %311, %310 : vector<8x128xf32>
    %cst_111 = arith.constant 0.707106769 : f32
    %313 = vector.broadcast %cst_111 : f32 to vector<8x128xf32>
    %314 = arith.mulf %310, %313 : vector<8x128xf32>
    %315 = math.absf %314 : vector<8x128xf32>
    %cst_112 = arith.constant 0.327591091 : f32
    %316 = vector.broadcast %cst_112 : f32 to vector<8x128xf32>
    %317 = arith.mulf %316, %315 : vector<8x128xf32>
    %cst_113 = arith.constant 1.000000e+00 : f32
    %318 = vector.broadcast %cst_113 : f32 to vector<8x128xf32>
    %319 = arith.addf %318, %317 : vector<8x128xf32>
    %cst_114 = arith.constant 1.000000e+00 : f32
    %320 = vector.broadcast %cst_114 : f32 to vector<8x128xf32>
    %321 = arith.divf %320, %319 : vector<8x128xf32>
    %cst_115 = arith.constant 1.06140542 : f32
    %322 = vector.broadcast %cst_115 : f32 to vector<8x128xf32>
    %323 = arith.mulf %322, %321 : vector<8x128xf32>
    %cst_116 = arith.constant -1.45315206 : f32
    %324 = vector.broadcast %cst_116 : f32 to vector<8x128xf32>
    %325 = arith.addf %323, %324 : vector<8x128xf32>
    %326 = arith.mulf %325, %321 : vector<8x128xf32>
    %cst_117 = arith.constant 1.42141378 : f32
    %327 = vector.broadcast %cst_117 : f32 to vector<8x128xf32>
    %328 = arith.addf %326, %327 : vector<8x128xf32>
    %329 = arith.mulf %328, %321 : vector<8x128xf32>
    %cst_118 = arith.constant -0.284496725 : f32
    %330 = vector.broadcast %cst_118 : f32 to vector<8x128xf32>
    %331 = arith.addf %329, %330 : vector<8x128xf32>
    %332 = arith.mulf %331, %321 : vector<8x128xf32>
    %cst_119 = arith.constant 0.254829586 : f32
    %333 = vector.broadcast %cst_119 : f32 to vector<8x128xf32>
    %334 = arith.addf %332, %333 : vector<8x128xf32>
    %335 = arith.mulf %334, %321 : vector<8x128xf32>
    %cst_120 = arith.constant 0.000000e+00 : f32
    %336 = vector.broadcast %cst_120 : f32 to vector<8x128xf32>
    %337 = arith.subf %336, %315 : vector<8x128xf32>
    %338 = arith.mulf %337, %315 : vector<8x128xf32>
    %339 = math.exp %338 : vector<8x128xf32>
    %340 = arith.mulf %335, %339 : vector<8x128xf32>
    %cst_121 = arith.constant 1.000000e+00 : f32
    %341 = vector.broadcast %cst_121 : f32 to vector<8x128xf32>
    %342 = arith.subf %341, %340 : vector<8x128xf32>
    %cst_122 = arith.constant 0.000000e+00 : f32
    %343 = vector.broadcast %cst_122 : f32 to vector<8x128xf32>
    %344 = arith.cmpf oge, %314, %343 : vector<8x128xf32>
    %cst_123 = arith.constant 0.000000e+00 : f32
    %345 = vector.broadcast %cst_123 : f32 to vector<8x128xf32>
    %346 = arith.subf %345, %342 : vector<8x128xf32>
    %347 = arith.select %344, %342, %346 : vector<8x128xi1>, vector<8x128xf32>
    %cst_124 = arith.constant 1.000000e+00 : f32
    %348 = vector.broadcast %cst_124 : f32 to vector<8x128xf32>
    %349 = arith.addf %348, %347 : vector<8x128xf32>
    %350 = arith.mulf %312, %349 : vector<8x128xf32>
    %c0_125 = arith.constant 0 : index
    %c0_126 = arith.constant 0 : index
    %c0_127 = arith.constant 0 : index
    %351 = vector.load %arg13[%c0_125, %c0_126, %c0_127] : memref<2x1x128xf32, #tpu.memory_space<vmem>>, vector<1x1x128xf32>
    %352 = vector.shape_cast %351 : vector<1x1x128xf32> to vector<1x128xf32>
    %cst_128 = arith.constant dense<0.000000e+00> : vector<8xf32>
    %353 = vector.multi_reduction <add>, %350, %cst_128 [1] : vector<8x128xf32> to vector<8xf32>
    %354 = vector.shape_cast %353 : vector<8xf32> to vector<8x1xf32>
    %cst_129 = arith.constant 1.280000e+02 : f32
    %355 = vector.broadcast %cst_129 : f32 to vector<8x1xf32>
    %356 = arith.divf %354, %355 : vector<8x1xf32>
    %357 = vector.broadcast %356 : vector<8x1xf32> to vector<8x128xf32>
    %358 = arith.subf %350, %357 : vector<8x128xf32>
    %359 = arith.mulf %358, %358 : vector<8x128xf32>
    %cst_130 = arith.constant dense<0.000000e+00> : vector<8xf32>
    %360 = vector.multi_reduction <add>, %359, %cst_130 [1] : vector<8x128xf32> to vector<8xf32>
    %361 = vector.shape_cast %360 : vector<8xf32> to vector<8x1xf32>
    %cst_131 = arith.constant 1.280000e+02 : f32
    %362 = vector.broadcast %cst_131 : f32 to vector<8x1xf32>
    %363 = arith.divf %361, %362 : vector<8x1xf32>
    %364 = vector.broadcast %356 : vector<8x1xf32> to vector<8x128xf32>
    %365 = arith.subf %350, %364 : vector<8x128xf32>
    %cst_132 = arith.constant 9.99999974E-6 : f32
    %366 = vector.broadcast %cst_132 : f32 to vector<8x1xf32>
    %367 = arith.addf %363, %366 : vector<8x1xf32>
    %368 = math.rsqrt %367 : vector<8x1xf32>
    %369 = vector.broadcast %368 : vector<8x1xf32> to vector<8x128xf32>
    %370 = arith.mulf %365, %369 : vector<8x128xf32>
    %371 = vector.broadcast %352 : vector<1x128xf32> to vector<8x128xf32>
    %372 = arith.mulf %370, %371 : vector<8x128xf32>
    %c0_133 = arith.constant 0 : index
    %c0_134 = arith.constant 0 : index
    %c0_135 = arith.constant 0 : index
    %373 = vector.load %arg14[%c0_133, %c0_134, %c0_135] : memref<2x128x32xf32, #tpu.memory_space<vmem>>, vector<1x128x32xf32>
    %374 = vector.shape_cast %373 : vector<1x128x32xf32> to vector<128x32xf32>
    %cst_136 = arith.constant dense<0.000000e+00> : vector<8x32xf32>
    %375 = tpu.matmul %372, %374, %cst_136 {dimension_numbers = #tpu.dot_dimension_numbers<[1], [0], [0], [1], [0, 0, 1, 1], [], []>} : vector<8x128xf32>, vector<128x32xf32>, vector<8x32xf32> -> vector<8x32xf32>
    %376 = arith.addf %375, %307 : vector<8x32xf32>
    %c0_137 = arith.constant 0 : index
    %c0_138 = arith.constant 0 : index
    %377 = vector.load %arg17[%c0_137, %c0_138] : memref<1x32xf32, #tpu.memory_space<vmem>>, vector<1x32xf32>
    %cst_139 = arith.constant dense<0.000000e+00> : vector<8xf32>
    %378 = vector.multi_reduction <add>, %376, %cst_139 [1] : vector<8x32xf32> to vector<8xf32>
    %379 = vector.shape_cast %378 : vector<8xf32> to vector<8x1xf32>
    %cst_140 = arith.constant 3.200000e+01 : f32
    %380 = vector.broadcast %cst_140 : f32 to vector<8x1xf32>
    %381 = arith.divf %379, %380 : vector<8x1xf32>
    %382 = vector.broadcast %381 : vector<8x1xf32> to vector<8x32xf32>
    %383 = arith.subf %376, %382 : vector<8x32xf32>
    %384 = arith.mulf %383, %383 : vector<8x32xf32>
    %cst_141 = arith.constant dense<0.000000e+00> : vector<8xf32>
    %385 = vector.multi_reduction <add>, %384, %cst_141 [1] : vector<8x32xf32> to vector<8xf32>
    %386 = vector.shape_cast %385 : vector<8xf32> to vector<8x1xf32>
    %cst_142 = arith.constant 3.200000e+01 : f32
    %387 = vector.broadcast %cst_142 : f32 to vector<8x1xf32>
    %388 = arith.divf %386, %387 : vector<8x1xf32>
    %389 = vector.broadcast %381 : vector<8x1xf32> to vector<8x32xf32>
    %390 = arith.subf %376, %389 : vector<8x32xf32>
    %cst_143 = arith.constant 9.99999974E-6 : f32
    %391 = vector.broadcast %cst_143 : f32 to vector<8x1xf32>
    %392 = arith.addf %388, %391 : vector<8x1xf32>
    %393 = math.rsqrt %392 : vector<8x1xf32>
    %394 = vector.broadcast %393 : vector<8x1xf32> to vector<8x32xf32>
    %395 = arith.mulf %390, %394 : vector<8x32xf32>
    %396 = vector.broadcast %377 : vector<1x32xf32> to vector<8x32xf32>
    %397 = arith.mulf %395, %396 : vector<8x32xf32>
    %c0_144 = arith.constant 0 : index
    %c0_145 = arith.constant 0 : index
    %398 = vector.load %arg15[%c0_144, %c0_145] : memref<1x32xf32, #tpu.memory_space<vmem>>, vector<1x32xf32>
    %cst_146 = arith.constant dense<0.000000e+00> : vector<8xf32>
    %399 = vector.multi_reduction <add>, %397, %cst_146 [1] : vector<8x32xf32> to vector<8xf32>
    %400 = vector.shape_cast %399 : vector<8xf32> to vector<8x1xf32>
    %cst_147 = arith.constant 3.200000e+01 : f32
    %401 = vector.broadcast %cst_147 : f32 to vector<8x1xf32>
    %402 = arith.divf %400, %401 : vector<8x1xf32>
    %403 = vector.broadcast %402 : vector<8x1xf32> to vector<8x32xf32>
    %404 = arith.subf %397, %403 : vector<8x32xf32>
    %405 = arith.mulf %404, %404 : vector<8x32xf32>
    %cst_148 = arith.constant dense<0.000000e+00> : vector<8xf32>
    %406 = vector.multi_reduction <add>, %405, %cst_148 [1] : vector<8x32xf32> to vector<8xf32>
    %407 = vector.shape_cast %406 : vector<8xf32> to vector<8x1xf32>
    %cst_149 = arith.constant 3.200000e+01 : f32
    %408 = vector.broadcast %cst_149 : f32 to vector<8x1xf32>
    %409 = arith.divf %407, %408 : vector<8x1xf32>
    %410 = vector.broadcast %402 : vector<8x1xf32> to vector<8x32xf32>
    %411 = arith.subf %397, %410 : vector<8x32xf32>
    %cst_150 = arith.constant 9.99999974E-6 : f32
    %412 = vector.broadcast %cst_150 : f32 to vector<8x1xf32>
    %413 = arith.addf %409, %412 : vector<8x1xf32>
    %414 = math.rsqrt %413 : vector<8x1xf32>
    %415 = vector.broadcast %414 : vector<8x1xf32> to vector<8x32xf32>
    %416 = arith.mulf %411, %415 : vector<8x32xf32>
    %417 = vector.broadcast %398 : vector<1x32xf32> to vector<8x32xf32>
    %418 = arith.mulf %416, %417 : vector<8x32xf32>
    %c1 = arith.constant 1 : index
    %c0_151 = arith.constant 0 : index
    %c0_152 = arith.constant 0 : index
    %419 = vector.load %arg5[%c1, %c0_151, %c0_152] : memref<2x32x96xf32, #tpu.memory_space<vmem>>, vector<1x32x96xf32>
    %420 = vector.shape_cast %419 : vector<1x32x96xf32> to vector<32x96xf32>
    %cst_153 = arith.constant dense<0.000000e+00> : vector<8x96xf32>
    %421 = tpu.matmul %418, %420, %cst_153 {dimension_numbers = #tpu.dot_dimension_numbers<[1], [0], [0], [1], [0, 0, 1, 1], [], []>} : vector<8x32xf32>, vector<32x96xf32>, vector<8x96xf32> -> vector<8x96xf32>
    %422 = vector.extract_strided_slice %421 {offsets = [0, 0], sizes = [8, 32], strides = [1, 1]} : vector<8x96xf32> to vector<8x32xf32>
    %423 = vector.extract_strided_slice %421 {offsets = [0, 32], sizes = [8, 32], strides = [1, 1]} : vector<8x96xf32> to vector<8x32xf32>
    %424 = vector.extract_strided_slice %421 {offsets = [0, 64], sizes = [8, 32], strides = [1, 1]} : vector<8x96xf32> to vector<8x32xf32>
    %c1_154 = arith.constant 1 : index
    %c0_155 = arith.constant 0 : index
    %c0_156 = arith.constant 0 : index
    %425 = vector.load %arg6[%c1_154, %c0_155, %c0_156] : memref<2x32x32xf32, #tpu.memory_space<vmem>>, vector<1x32x32xf32>
    %426 = vector.shape_cast %425 : vector<1x32x32xf32> to vector<32x32xf32>
    %cst_157 = arith.constant 0.000000e+00 : f32
    %427 = vector.broadcast %cst_157 : f32 to vector<8x32xf32>
    %428 = vector.extract_strided_slice %422 {offsets = [0, 0], sizes = [8, 8], strides = [1, 1]} : vector<8x32xf32> to vector<8x8xf32>
    %429 = vector.extract_strided_slice %423 {offsets = [0, 0], sizes = [8, 8], strides = [1, 1]} : vector<8x32xf32> to vector<8x8xf32>
    %430 = vector.extract_strided_slice %424 {offsets = [0, 0], sizes = [8, 8], strides = [1, 1]} : vector<8x32xf32> to vector<8x8xf32>
    "tpu.trace_start"() <{level = 10 : i32, message = "qd,kd->qk"}> : () -> ()
    %cst_158 = arith.constant dense<0.000000e+00> : vector<8x8xf32>
    %431 = tpu.matmul %428, %429, %cst_158 {dimension_numbers = #tpu.dot_dimension_numbers<[1], [1], [0], [0], [0, 0, 1, 0], [], []>} : vector<8x8xf32>, vector<8x8xf32>, vector<8x8xf32> -> vector<8x8xf32>
    "tpu.trace_stop"() : () -> ()
    %cst_159 = arith.constant 0.353553385 : f32
    %432 = vector.broadcast %cst_159 : f32 to vector<8x8xf32>
    %433 = arith.mulf %431, %432 : vector<8x8xf32>
    %434 = vector.broadcast %5 : vector<1x8xf32> to vector<8x8xf32>
    %435 = arith.addf %433, %434 : vector<8x8xf32>
    %cst_160 = arith.constant dense<0xFF800000> : vector<8xf32>
    %436 = vector.multi_reduction <maximumf>, %435, %cst_160 [1] : vector<8x8xf32> to vector<8xf32>
    %437 = vector.shape_cast %436 : vector<8xf32> to vector<8x1xf32>
    %438 = vector.broadcast %437 : vector<8x1xf32> to vector<8x8xf32>
    %439 = arith.subf %435, %438 : vector<8x8xf32>
    %440 = math.exp %439 : vector<8x8xf32>
    "tpu.trace_start"() <{level = 10 : i32, message = "qk,kd->qd"}> : () -> ()
    %cst_161 = arith.constant dense<0.000000e+00> : vector<8x8xf32>
    %441 = tpu.matmul %440, %430, %cst_161 {dimension_numbers = #tpu.dot_dimension_numbers<[1], [0], [0], [1], [0, 0, 1, 1], [], []>} : vector<8x8xf32>, vector<8x8xf32>, vector<8x8xf32> -> vector<8x8xf32>
    "tpu.trace_stop"() : () -> ()
    %cst_162 = arith.constant dense<0.000000e+00> : vector<8xf32>
    %442 = vector.multi_reduction <add>, %440, %cst_162 [1] : vector<8x8xf32> to vector<8xf32>
    %443 = vector.shape_cast %442 : vector<8xf32> to vector<8x1xf32>
    %444 = vector.broadcast %443 : vector<8x1xf32> to vector<8x8xf32>
    %445 = arith.divf %441, %444 : vector<8x8xf32>
    %446 = vector.extract_strided_slice %426 {offsets = [0, 0], sizes = [8, 32], strides = [1, 1]} : vector<32x32xf32> to vector<8x32xf32>
    %cst_163 = arith.constant dense<0.000000e+00> : vector<8x32xf32>
    %447 = tpu.matmul %445, %446, %cst_163 {dimension_numbers = #tpu.dot_dimension_numbers<[1], [0], [0], [1], [0, 0, 1, 1], [], []>} : vector<8x8xf32>, vector<8x32xf32>, vector<8x32xf32> -> vector<8x32xf32>
    %448 = arith.addf %427, %447 : vector<8x32xf32>
    %449 = vector.extract_strided_slice %422 {offsets = [0, 8], sizes = [8, 8], strides = [1, 1]} : vector<8x32xf32> to vector<8x8xf32>
    %450 = vector.extract_strided_slice %423 {offsets = [0, 8], sizes = [8, 8], strides = [1, 1]} : vector<8x32xf32> to vector<8x8xf32>
    %451 = vector.extract_strided_slice %424 {offsets = [0, 8], sizes = [8, 8], strides = [1, 1]} : vector<8x32xf32> to vector<8x8xf32>
    "tpu.trace_start"() <{level = 10 : i32, message = "qd,kd->qk"}> : () -> ()
    %cst_164 = arith.constant dense<0.000000e+00> : vector<8x8xf32>
    %452 = tpu.matmul %449, %450, %cst_164 {dimension_numbers = #tpu.dot_dimension_numbers<[1], [1], [0], [0], [0, 0, 1, 0], [], []>} : vector<8x8xf32>, vector<8x8xf32>, vector<8x8xf32> -> vector<8x8xf32>
    "tpu.trace_stop"() : () -> ()
    %cst_165 = arith.constant 0.353553385 : f32
    %453 = vector.broadcast %cst_165 : f32 to vector<8x8xf32>
    %454 = arith.mulf %452, %453 : vector<8x8xf32>
    %455 = vector.broadcast %5 : vector<1x8xf32> to vector<8x8xf32>
    %456 = arith.addf %454, %455 : vector<8x8xf32>
    %cst_166 = arith.constant dense<0xFF800000> : vector<8xf32>
    %457 = vector.multi_reduction <maximumf>, %456, %cst_166 [1] : vector<8x8xf32> to vector<8xf32>
    %458 = vector.shape_cast %457 : vector<8xf32> to vector<8x1xf32>
    %459 = vector.broadcast %458 : vector<8x1xf32> to vector<8x8xf32>
    %460 = arith.subf %456, %459 : vector<8x8xf32>
    %461 = math.exp %460 : vector<8x8xf32>
    "tpu.trace_start"() <{level = 10 : i32, message = "qk,kd->qd"}> : () -> ()
    %cst_167 = arith.constant dense<0.000000e+00> : vector<8x8xf32>
    %462 = tpu.matmul %461, %451, %cst_167 {dimension_numbers = #tpu.dot_dimension_numbers<[1], [0], [0], [1], [0, 0, 1, 1], [], []>} : vector<8x8xf32>, vector<8x8xf32>, vector<8x8xf32> -> vector<8x8xf32>
    "tpu.trace_stop"() : () -> ()
    %cst_168 = arith.constant dense<0.000000e+00> : vector<8xf32>
    %463 = vector.multi_reduction <add>, %461, %cst_168 [1] : vector<8x8xf32> to vector<8xf32>
    %464 = vector.shape_cast %463 : vector<8xf32> to vector<8x1xf32>
    %465 = vector.broadcast %464 : vector<8x1xf32> to vector<8x8xf32>
    %466 = arith.divf %462, %465 : vector<8x8xf32>
    %467 = vector.extract_strided_slice %426 {offsets = [8, 0], sizes = [8, 32], strides = [1, 1]} : vector<32x32xf32> to vector<8x32xf32>
    %cst_169 = arith.constant dense<0.000000e+00> : vector<8x32xf32>
    %468 = tpu.matmul %466, %467, %cst_169 {dimension_numbers = #tpu.dot_dimension_numbers<[1], [0], [0], [1], [0, 0, 1, 1], [], []>} : vector<8x8xf32>, vector<8x32xf32>, vector<8x32xf32> -> vector<8x32xf32>
    %469 = arith.addf %448, %468 : vector<8x32xf32>
    %470 = vector.extract_strided_slice %422 {offsets = [0, 16], sizes = [8, 8], strides = [1, 1]} : vector<8x32xf32> to vector<8x8xf32>
    %471 = vector.extract_strided_slice %423 {offsets = [0, 16], sizes = [8, 8], strides = [1, 1]} : vector<8x32xf32> to vector<8x8xf32>
    %472 = vector.extract_strided_slice %424 {offsets = [0, 16], sizes = [8, 8], strides = [1, 1]} : vector<8x32xf32> to vector<8x8xf32>
    "tpu.trace_start"() <{level = 10 : i32, message = "qd,kd->qk"}> : () -> ()
    %cst_170 = arith.constant dense<0.000000e+00> : vector<8x8xf32>
    %473 = tpu.matmul %470, %471, %cst_170 {dimension_numbers = #tpu.dot_dimension_numbers<[1], [1], [0], [0], [0, 0, 1, 0], [], []>} : vector<8x8xf32>, vector<8x8xf32>, vector<8x8xf32> -> vector<8x8xf32>
    "tpu.trace_stop"() : () -> ()
    %cst_171 = arith.constant 0.353553385 : f32
    %474 = vector.broadcast %cst_171 : f32 to vector<8x8xf32>
    %475 = arith.mulf %473, %474 : vector<8x8xf32>
    %476 = vector.broadcast %5 : vector<1x8xf32> to vector<8x8xf32>
    %477 = arith.addf %475, %476 : vector<8x8xf32>
    %cst_172 = arith.constant dense<0xFF800000> : vector<8xf32>
    %478 = vector.multi_reduction <maximumf>, %477, %cst_172 [1] : vector<8x8xf32> to vector<8xf32>
    %479 = vector.shape_cast %478 : vector<8xf32> to vector<8x1xf32>
    %480 = vector.broadcast %479 : vector<8x1xf32> to vector<8x8xf32>
    %481 = arith.subf %477, %480 : vector<8x8xf32>
    %482 = math.exp %481 : vector<8x8xf32>
    "tpu.trace_start"() <{level = 10 : i32, message = "qk,kd->qd"}> : () -> ()
    %cst_173 = arith.constant dense<0.000000e+00> : vector<8x8xf32>
    %483 = tpu.matmul %482, %472, %cst_173 {dimension_numbers = #tpu.dot_dimension_numbers<[1], [0], [0], [1], [0, 0, 1, 1], [], []>} : vector<8x8xf32>, vector<8x8xf32>, vector<8x8xf32> -> vector<8x8xf32>
    "tpu.trace_stop"() : () -> ()
    %cst_174 = arith.constant dense<0.000000e+00> : vector<8xf32>
    %484 = vector.multi_reduction <add>, %482, %cst_174 [1] : vector<8x8xf32> to vector<8xf32>
    %485 = vector.shape_cast %484 : vector<8xf32> to vector<8x1xf32>
    %486 = vector.broadcast %485 : vector<8x1xf32> to vector<8x8xf32>
    %487 = arith.divf %483, %486 : vector<8x8xf32>
    %488 = vector.extract_strided_slice %426 {offsets = [16, 0], sizes = [8, 32], strides = [1, 1]} : vector<32x32xf32> to vector<8x32xf32>
    %cst_175 = arith.constant dense<0.000000e+00> : vector<8x32xf32>
    %489 = tpu.matmul %487, %488, %cst_175 {dimension_numbers = #tpu.dot_dimension_numbers<[1], [0], [0], [1], [0, 0, 1, 1], [], []>} : vector<8x8xf32>, vector<8x32xf32>, vector<8x32xf32> -> vector<8x32xf32>
    %490 = arith.addf %469, %489 : vector<8x32xf32>
    %491 = vector.extract_strided_slice %422 {offsets = [0, 24], sizes = [8, 8], strides = [1, 1]} : vector<8x32xf32> to vector<8x8xf32>
    %492 = vector.extract_strided_slice %423 {offsets = [0, 24], sizes = [8, 8], strides = [1, 1]} : vector<8x32xf32> to vector<8x8xf32>
    %493 = vector.extract_strided_slice %424 {offsets = [0, 24], sizes = [8, 8], strides = [1, 1]} : vector<8x32xf32> to vector<8x8xf32>
    "tpu.trace_start"() <{level = 10 : i32, message = "qd,kd->qk"}> : () -> ()
    %cst_176 = arith.constant dense<0.000000e+00> : vector<8x8xf32>
    %494 = tpu.matmul %491, %492, %cst_176 {dimension_numbers = #tpu.dot_dimension_numbers<[1], [1], [0], [0], [0, 0, 1, 0], [], []>} : vector<8x8xf32>, vector<8x8xf32>, vector<8x8xf32> -> vector<8x8xf32>
    "tpu.trace_stop"() : () -> ()
    %cst_177 = arith.constant 0.353553385 : f32
    %495 = vector.broadcast %cst_177 : f32 to vector<8x8xf32>
    %496 = arith.mulf %494, %495 : vector<8x8xf32>
    %497 = vector.broadcast %5 : vector<1x8xf32> to vector<8x8xf32>
    %498 = arith.addf %496, %497 : vector<8x8xf32>
    %cst_178 = arith.constant dense<0xFF800000> : vector<8xf32>
    %499 = vector.multi_reduction <maximumf>, %498, %cst_178 [1] : vector<8x8xf32> to vector<8xf32>
    %500 = vector.shape_cast %499 : vector<8xf32> to vector<8x1xf32>
    %501 = vector.broadcast %500 : vector<8x1xf32> to vector<8x8xf32>
    %502 = arith.subf %498, %501 : vector<8x8xf32>
    %503 = math.exp %502 : vector<8x8xf32>
    "tpu.trace_start"() <{level = 10 : i32, message = "qk,kd->qd"}> : () -> ()
    %cst_179 = arith.constant dense<0.000000e+00> : vector<8x8xf32>
    %504 = tpu.matmul %503, %493, %cst_179 {dimension_numbers = #tpu.dot_dimension_numbers<[1], [0], [0], [1], [0, 0, 1, 1], [], []>} : vector<8x8xf32>, vector<8x8xf32>, vector<8x8xf32> -> vector<8x8xf32>
    "tpu.trace_stop"() : () -> ()
    %cst_180 = arith.constant dense<0.000000e+00> : vector<8xf32>
    %505 = vector.multi_reduction <add>, %503, %cst_180 [1] : vector<8x8xf32> to vector<8xf32>
    %506 = vector.shape_cast %505 : vector<8xf32> to vector<8x1xf32>
    %507 = vector.broadcast %506 : vector<8x1xf32> to vector<8x8xf32>
    %508 = arith.divf %504, %507 : vector<8x8xf32>
    %509 = vector.extract_strided_slice %426 {offsets = [24, 0], sizes = [8, 32], strides = [1, 1]} : vector<32x32xf32> to vector<8x32xf32>
    %cst_181 = arith.constant dense<0.000000e+00> : vector<8x32xf32>
    %510 = tpu.matmul %508, %509, %cst_181 {dimension_numbers = #tpu.dot_dimension_numbers<[1], [0], [0], [1], [0, 0, 1, 1], [], []>} : vector<8x8xf32>, vector<8x32xf32>, vector<8x32xf32> -> vector<8x32xf32>
    %511 = arith.addf %490, %510 : vector<8x32xf32>
    %512 = arith.addf %511, %418 : vector<8x32xf32>
    %c0_182 = arith.constant 0 : index
    %c0_183 = arith.constant 0 : index
    %513 = vector.load %arg16[%c0_182, %c0_183] : memref<1x32xf32, #tpu.memory_space<vmem>>, vector<1x32xf32>
    %cst_184 = arith.constant dense<0.000000e+00> : vector<8xf32>
    %514 = vector.multi_reduction <add>, %512, %cst_184 [1] : vector<8x32xf32> to vector<8xf32>
    %515 = vector.shape_cast %514 : vector<8xf32> to vector<8x1xf32>
    %cst_185 = arith.constant 3.200000e+01 : f32
    %516 = vector.broadcast %cst_185 : f32 to vector<8x1xf32>
    %517 = arith.divf %515, %516 : vector<8x1xf32>
    %518 = vector.broadcast %517 : vector<8x1xf32> to vector<8x32xf32>
    %519 = arith.subf %512, %518 : vector<8x32xf32>
    %520 = arith.mulf %519, %519 : vector<8x32xf32>
    %cst_186 = arith.constant dense<0.000000e+00> : vector<8xf32>
    %521 = vector.multi_reduction <add>, %520, %cst_186 [1] : vector<8x32xf32> to vector<8xf32>
    %522 = vector.shape_cast %521 : vector<8xf32> to vector<8x1xf32>
    %cst_187 = arith.constant 3.200000e+01 : f32
    %523 = vector.broadcast %cst_187 : f32 to vector<8x1xf32>
    %524 = arith.divf %522, %523 : vector<8x1xf32>
    %525 = vector.broadcast %517 : vector<8x1xf32> to vector<8x32xf32>
    %526 = arith.subf %512, %525 : vector<8x32xf32>
    %cst_188 = arith.constant 9.99999974E-6 : f32
    %527 = vector.broadcast %cst_188 : f32 to vector<8x1xf32>
    %528 = arith.addf %524, %527 : vector<8x1xf32>
    %529 = math.rsqrt %528 : vector<8x1xf32>
    %530 = vector.broadcast %529 : vector<8x1xf32> to vector<8x32xf32>
    %531 = arith.mulf %526, %530 : vector<8x32xf32>
    %532 = vector.broadcast %513 : vector<1x32xf32> to vector<8x32xf32>
    %533 = arith.mulf %531, %532 : vector<8x32xf32>
    %c1_189 = arith.constant 1 : index
    %c0_190 = arith.constant 0 : index
    %c0_191 = arith.constant 0 : index
    %534 = vector.load %arg7[%c1_189, %c0_190, %c0_191] : memref<2x32x32xf32, #tpu.memory_space<vmem>>, vector<1x32x32xf32>
    %535 = vector.shape_cast %534 : vector<1x32x32xf32> to vector<32x32xf32>
    %cst_192 = arith.constant dense<0.000000e+00> : vector<8x32xf32>
    %536 = tpu.matmul %533, %535, %cst_192 {dimension_numbers = #tpu.dot_dimension_numbers<[1], [0], [0], [1], [0, 0, 1, 1], [], []>} : vector<8x32xf32>, vector<32x32xf32>, vector<8x32xf32> -> vector<8x32xf32>
    %c1_193 = arith.constant 1 : index
    %c0_194 = arith.constant 0 : index
    %c0_195 = arith.constant 0 : index
    %537 = vector.load %arg8[%c1_193, %c0_194, %c0_195] : memref<2x32x64xf32, #tpu.memory_space<vmem>>, vector<1x32x64xf32>
    %538 = vector.shape_cast %537 : vector<1x32x64xf32> to vector<32x64xf32>
    %cst_196 = arith.constant dense<0.000000e+00> : vector<8x64xf32>
    %539 = tpu.matmul %3, %538, %cst_196 {dimension_numbers = #tpu.dot_dimension_numbers<[1], [0], [0], [1], [0, 0, 1, 1], [], []>} : vector<8x32xf32>, vector<32x64xf32>, vector<8x64xf32> -> vector<8x64xf32>
    %540 = vector.extract_strided_slice %539 {offsets = [0, 0], sizes = [8, 32], strides = [1, 1]} : vector<8x64xf32> to vector<8x32xf32>
    %541 = vector.extract_strided_slice %539 {offsets = [0, 32], sizes = [8, 32], strides = [1, 1]} : vector<8x64xf32> to vector<8x32xf32>
    %c1_197 = arith.constant 1 : index
    %c0_198 = arith.constant 0 : index
    %c0_199 = arith.constant 0 : index
    %542 = vector.load %arg9[%c1_197, %c0_198, %c0_199] : memref<2x32x32xf32, #tpu.memory_space<vmem>>, vector<1x32x32xf32>
    %543 = vector.shape_cast %542 : vector<1x32x32xf32> to vector<32x32xf32>
    %c1_200 = arith.constant 1 : index
    %c0_201 = arith.constant 0 : index
    %c0_202 = arith.constant 0 : index
    %544 = vector.load %arg10[%c1_200, %c0_201, %c0_202] : memref<2x1x32xf32, #tpu.memory_space<vmem>>, vector<1x1x32xf32>
    %545 = vector.shape_cast %544 : vector<1x1x32xf32> to vector<1x32xf32>
    %c1_203 = arith.constant 1 : index
    %c0_204 = arith.constant 0 : index
    %c0_205 = arith.constant 0 : index
    %546 = vector.load %arg11[%c1_203, %c0_204, %c0_205] : memref<2x1x32xf32, #tpu.memory_space<vmem>>, vector<1x1x32xf32>
    %547 = vector.shape_cast %546 : vector<1x1x32xf32> to vector<1x32xf32>
    %cst_206 = arith.constant 0.000000e+00 : f32
    %548 = vector.broadcast %cst_206 : f32 to vector<8x32xf32>
    %549 = vector.extract_strided_slice %536 {offsets = [0, 0], sizes = [8, 8], strides = [1, 1]} : vector<8x32xf32> to vector<8x8xf32>
    %550 = vector.extract_strided_slice %540 {offsets = [0, 0], sizes = [8, 8], strides = [1, 1]} : vector<8x32xf32> to vector<8x8xf32>
    %551 = vector.extract_strided_slice %541 {offsets = [0, 0], sizes = [8, 8], strides = [1, 1]} : vector<8x32xf32> to vector<8x8xf32>
    "tpu.trace_start"() <{level = 10 : i32, message = "qd,kd->qk"}> : () -> ()
    %cst_207 = arith.constant dense<0.000000e+00> : vector<8x8xf32>
    %552 = tpu.matmul %549, %550, %cst_207 {dimension_numbers = #tpu.dot_dimension_numbers<[1], [1], [0], [0], [0, 0, 1, 0], [], []>} : vector<8x8xf32>, vector<8x8xf32>, vector<8x8xf32> -> vector<8x8xf32>
    "tpu.trace_stop"() : () -> ()
    %cst_208 = arith.constant 0.353553385 : f32
    %553 = vector.broadcast %cst_208 : f32 to vector<8x8xf32>
    %554 = arith.mulf %552, %553 : vector<8x8xf32>
    %555 = vector.broadcast %7 : vector<1x8xf32> to vector<8x8xf32>
    %556 = arith.addf %554, %555 : vector<8x8xf32>
    %557 = vector.extract_strided_slice %545 {offsets = [0, 0], sizes = [1, 8], strides = [1, 1]} : vector<1x32xf32> to vector<1x8xf32>
    %558 = vector.broadcast %557 : vector<1x8xf32> to vector<8x8xf32>
    %559 = arith.mulf %549, %558 : vector<8x8xf32>
    %cst_209 = arith.constant dense<0.000000e+00> : vector<8xf32>
    %560 = vector.multi_reduction <add>, %559, %cst_209 [1] : vector<8x8xf32> to vector<8xf32>
    %561 = vector.shape_cast %560 : vector<8xf32> to vector<8x1xf32>
    %cst_210 = arith.constant 0.353553385 : f32
    %562 = vector.broadcast %cst_210 : f32 to vector<8x1xf32>
    %563 = arith.mulf %561, %562 : vector<8x1xf32>
    %cst_211 = arith.constant dense<0xFF800000> : vector<8xf32>
    %564 = vector.multi_reduction <maximumf>, %556, %cst_211 [1] : vector<8x8xf32> to vector<8xf32>
    %565 = vector.shape_cast %564 : vector<8xf32> to vector<8x1xf32>
    %566 = arith.maximumf %565, %563 : vector<8x1xf32>
    %567 = vector.broadcast %566 : vector<8x1xf32> to vector<8x8xf32>
    %568 = arith.subf %556, %567 : vector<8x8xf32>
    %569 = math.exp %568 : vector<8x8xf32>
    %570 = arith.subf %563, %566 : vector<8x1xf32>
    %571 = math.exp %570 : vector<8x1xf32>
    %cst_212 = arith.constant dense<0.000000e+00> : vector<8xf32>
    %572 = vector.multi_reduction <add>, %569, %cst_212 [1] : vector<8x8xf32> to vector<8xf32>
    %573 = vector.shape_cast %572 : vector<8xf32> to vector<8x1xf32>
    %574 = arith.addf %573, %571 : vector<8x1xf32>
    "tpu.trace_start"() <{level = 10 : i32, message = "qk,kd->qd"}> : () -> ()
    %cst_213 = arith.constant dense<0.000000e+00> : vector<8x8xf32>
    %575 = tpu.matmul %569, %551, %cst_213 {dimension_numbers = #tpu.dot_dimension_numbers<[1], [0], [0], [1], [0, 0, 1, 1], [], []>} : vector<8x8xf32>, vector<8x8xf32>, vector<8x8xf32> -> vector<8x8xf32>
    "tpu.trace_stop"() : () -> ()
    %576 = vector.extract_strided_slice %547 {offsets = [0, 0], sizes = [1, 8], strides = [1, 1]} : vector<1x32xf32> to vector<1x8xf32>
    %577 = vector.broadcast %571 : vector<8x1xf32> to vector<8x8xf32>
    %578 = vector.broadcast %576 : vector<1x8xf32> to vector<8x8xf32>
    %579 = arith.mulf %577, %578 : vector<8x8xf32>
    %580 = arith.addf %575, %579 : vector<8x8xf32>
    %581 = vector.broadcast %574 : vector<8x1xf32> to vector<8x8xf32>
    %582 = arith.divf %580, %581 : vector<8x8xf32>
    %583 = vector.extract_strided_slice %543 {offsets = [0, 0], sizes = [8, 32], strides = [1, 1]} : vector<32x32xf32> to vector<8x32xf32>
    %cst_214 = arith.constant dense<0.000000e+00> : vector<8x32xf32>
    %584 = tpu.matmul %582, %583, %cst_214 {dimension_numbers = #tpu.dot_dimension_numbers<[1], [0], [0], [1], [0, 0, 1, 1], [], []>} : vector<8x8xf32>, vector<8x32xf32>, vector<8x32xf32> -> vector<8x32xf32>
    %585 = arith.addf %548, %584 : vector<8x32xf32>
    %586 = vector.extract_strided_slice %536 {offsets = [0, 8], sizes = [8, 8], strides = [1, 1]} : vector<8x32xf32> to vector<8x8xf32>
    %587 = vector.extract_strided_slice %540 {offsets = [0, 8], sizes = [8, 8], strides = [1, 1]} : vector<8x32xf32> to vector<8x8xf32>
    %588 = vector.extract_strided_slice %541 {offsets = [0, 8], sizes = [8, 8], strides = [1, 1]} : vector<8x32xf32> to vector<8x8xf32>
    "tpu.trace_start"() <{level = 10 : i32, message = "qd,kd->qk"}> : () -> ()
    %cst_215 = arith.constant dense<0.000000e+00> : vector<8x8xf32>
    %589 = tpu.matmul %586, %587, %cst_215 {dimension_numbers = #tpu.dot_dimension_numbers<[1], [1], [0], [0], [0, 0, 1, 0], [], []>} : vector<8x8xf32>, vector<8x8xf32>, vector<8x8xf32> -> vector<8x8xf32>
    "tpu.trace_stop"() : () -> ()
    %cst_216 = arith.constant 0.353553385 : f32
    %590 = vector.broadcast %cst_216 : f32 to vector<8x8xf32>
    %591 = arith.mulf %589, %590 : vector<8x8xf32>
    %592 = vector.broadcast %7 : vector<1x8xf32> to vector<8x8xf32>
    %593 = arith.addf %591, %592 : vector<8x8xf32>
    %594 = vector.extract_strided_slice %545 {offsets = [0, 8], sizes = [1, 8], strides = [1, 1]} : vector<1x32xf32> to vector<1x8xf32>
    %595 = vector.broadcast %594 : vector<1x8xf32> to vector<8x8xf32>
    %596 = arith.mulf %586, %595 : vector<8x8xf32>
    %cst_217 = arith.constant dense<0.000000e+00> : vector<8xf32>
    %597 = vector.multi_reduction <add>, %596, %cst_217 [1] : vector<8x8xf32> to vector<8xf32>
    %598 = vector.shape_cast %597 : vector<8xf32> to vector<8x1xf32>
    %cst_218 = arith.constant 0.353553385 : f32
    %599 = vector.broadcast %cst_218 : f32 to vector<8x1xf32>
    %600 = arith.mulf %598, %599 : vector<8x1xf32>
    %cst_219 = arith.constant dense<0xFF800000> : vector<8xf32>
    %601 = vector.multi_reduction <maximumf>, %593, %cst_219 [1] : vector<8x8xf32> to vector<8xf32>
    %602 = vector.shape_cast %601 : vector<8xf32> to vector<8x1xf32>
    %603 = arith.maximumf %602, %600 : vector<8x1xf32>
    %604 = vector.broadcast %603 : vector<8x1xf32> to vector<8x8xf32>
    %605 = arith.subf %593, %604 : vector<8x8xf32>
    %606 = math.exp %605 : vector<8x8xf32>
    %607 = arith.subf %600, %603 : vector<8x1xf32>
    %608 = math.exp %607 : vector<8x1xf32>
    %cst_220 = arith.constant dense<0.000000e+00> : vector<8xf32>
    %609 = vector.multi_reduction <add>, %606, %cst_220 [1] : vector<8x8xf32> to vector<8xf32>
    %610 = vector.shape_cast %609 : vector<8xf32> to vector<8x1xf32>
    %611 = arith.addf %610, %608 : vector<8x1xf32>
    "tpu.trace_start"() <{level = 10 : i32, message = "qk,kd->qd"}> : () -> ()
    %cst_221 = arith.constant dense<0.000000e+00> : vector<8x8xf32>
    %612 = tpu.matmul %606, %588, %cst_221 {dimension_numbers = #tpu.dot_dimension_numbers<[1], [0], [0], [1], [0, 0, 1, 1], [], []>} : vector<8x8xf32>, vector<8x8xf32>, vector<8x8xf32> -> vector<8x8xf32>
    "tpu.trace_stop"() : () -> ()
    %613 = vector.extract_strided_slice %547 {offsets = [0, 8], sizes = [1, 8], strides = [1, 1]} : vector<1x32xf32> to vector<1x8xf32>
    %614 = vector.broadcast %608 : vector<8x1xf32> to vector<8x8xf32>
    %615 = vector.broadcast %613 : vector<1x8xf32> to vector<8x8xf32>
    %616 = arith.mulf %614, %615 : vector<8x8xf32>
    %617 = arith.addf %612, %616 : vector<8x8xf32>
    %618 = vector.broadcast %611 : vector<8x1xf32> to vector<8x8xf32>
    %619 = arith.divf %617, %618 : vector<8x8xf32>
    %620 = vector.extract_strided_slice %543 {offsets = [8, 0], sizes = [8, 32], strides = [1, 1]} : vector<32x32xf32> to vector<8x32xf32>
    %cst_222 = arith.constant dense<0.000000e+00> : vector<8x32xf32>
    %621 = tpu.matmul %619, %620, %cst_222 {dimension_numbers = #tpu.dot_dimension_numbers<[1], [0], [0], [1], [0, 0, 1, 1], [], []>} : vector<8x8xf32>, vector<8x32xf32>, vector<8x32xf32> -> vector<8x32xf32>
    %622 = arith.addf %585, %621 : vector<8x32xf32>
    %623 = vector.extract_strided_slice %536 {offsets = [0, 16], sizes = [8, 8], strides = [1, 1]} : vector<8x32xf32> to vector<8x8xf32>
    %624 = vector.extract_strided_slice %540 {offsets = [0, 16], sizes = [8, 8], strides = [1, 1]} : vector<8x32xf32> to vector<8x8xf32>
    %625 = vector.extract_strided_slice %541 {offsets = [0, 16], sizes = [8, 8], strides = [1, 1]} : vector<8x32xf32> to vector<8x8xf32>
    "tpu.trace_start"() <{level = 10 : i32, message = "qd,kd->qk"}> : () -> ()
    %cst_223 = arith.constant dense<0.000000e+00> : vector<8x8xf32>
    %626 = tpu.matmul %623, %624, %cst_223 {dimension_numbers = #tpu.dot_dimension_numbers<[1], [1], [0], [0], [0, 0, 1, 0], [], []>} : vector<8x8xf32>, vector<8x8xf32>, vector<8x8xf32> -> vector<8x8xf32>
    "tpu.trace_stop"() : () -> ()
    %cst_224 = arith.constant 0.353553385 : f32
    %627 = vector.broadcast %cst_224 : f32 to vector<8x8xf32>
    %628 = arith.mulf %626, %627 : vector<8x8xf32>
    %629 = vector.broadcast %7 : vector<1x8xf32> to vector<8x8xf32>
    %630 = arith.addf %628, %629 : vector<8x8xf32>
    %631 = vector.extract_strided_slice %545 {offsets = [0, 16], sizes = [1, 8], strides = [1, 1]} : vector<1x32xf32> to vector<1x8xf32>
    %632 = vector.broadcast %631 : vector<1x8xf32> to vector<8x8xf32>
    %633 = arith.mulf %623, %632 : vector<8x8xf32>
    %cst_225 = arith.constant dense<0.000000e+00> : vector<8xf32>
    %634 = vector.multi_reduction <add>, %633, %cst_225 [1] : vector<8x8xf32> to vector<8xf32>
    %635 = vector.shape_cast %634 : vector<8xf32> to vector<8x1xf32>
    %cst_226 = arith.constant 0.353553385 : f32
    %636 = vector.broadcast %cst_226 : f32 to vector<8x1xf32>
    %637 = arith.mulf %635, %636 : vector<8x1xf32>
    %cst_227 = arith.constant dense<0xFF800000> : vector<8xf32>
    %638 = vector.multi_reduction <maximumf>, %630, %cst_227 [1] : vector<8x8xf32> to vector<8xf32>
    %639 = vector.shape_cast %638 : vector<8xf32> to vector<8x1xf32>
    %640 = arith.maximumf %639, %637 : vector<8x1xf32>
    %641 = vector.broadcast %640 : vector<8x1xf32> to vector<8x8xf32>
    %642 = arith.subf %630, %641 : vector<8x8xf32>
    %643 = math.exp %642 : vector<8x8xf32>
    %644 = arith.subf %637, %640 : vector<8x1xf32>
    %645 = math.exp %644 : vector<8x1xf32>
    %cst_228 = arith.constant dense<0.000000e+00> : vector<8xf32>
    %646 = vector.multi_reduction <add>, %643, %cst_228 [1] : vector<8x8xf32> to vector<8xf32>
    %647 = vector.shape_cast %646 : vector<8xf32> to vector<8x1xf32>
    %648 = arith.addf %647, %645 : vector<8x1xf32>
    "tpu.trace_start"() <{level = 10 : i32, message = "qk,kd->qd"}> : () -> ()
    %cst_229 = arith.constant dense<0.000000e+00> : vector<8x8xf32>
    %649 = tpu.matmul %643, %625, %cst_229 {dimension_numbers = #tpu.dot_dimension_numbers<[1], [0], [0], [1], [0, 0, 1, 1], [], []>} : vector<8x8xf32>, vector<8x8xf32>, vector<8x8xf32> -> vector<8x8xf32>
    "tpu.trace_stop"() : () -> ()
    %650 = vector.extract_strided_slice %547 {offsets = [0, 16], sizes = [1, 8], strides = [1, 1]} : vector<1x32xf32> to vector<1x8xf32>
    %651 = vector.broadcast %645 : vector<8x1xf32> to vector<8x8xf32>
    %652 = vector.broadcast %650 : vector<1x8xf32> to vector<8x8xf32>
    %653 = arith.mulf %651, %652 : vector<8x8xf32>
    %654 = arith.addf %649, %653 : vector<8x8xf32>
    %655 = vector.broadcast %648 : vector<8x1xf32> to vector<8x8xf32>
    %656 = arith.divf %654, %655 : vector<8x8xf32>
    %657 = vector.extract_strided_slice %543 {offsets = [16, 0], sizes = [8, 32], strides = [1, 1]} : vector<32x32xf32> to vector<8x32xf32>
    %cst_230 = arith.constant dense<0.000000e+00> : vector<8x32xf32>
    %658 = tpu.matmul %656, %657, %cst_230 {dimension_numbers = #tpu.dot_dimension_numbers<[1], [0], [0], [1], [0, 0, 1, 1], [], []>} : vector<8x8xf32>, vector<8x32xf32>, vector<8x32xf32> -> vector<8x32xf32>
    %659 = arith.addf %622, %658 : vector<8x32xf32>
    %660 = vector.extract_strided_slice %536 {offsets = [0, 24], sizes = [8, 8], strides = [1, 1]} : vector<8x32xf32> to vector<8x8xf32>
    %661 = vector.extract_strided_slice %540 {offsets = [0, 24], sizes = [8, 8], strides = [1, 1]} : vector<8x32xf32> to vector<8x8xf32>
    %662 = vector.extract_strided_slice %541 {offsets = [0, 24], sizes = [8, 8], strides = [1, 1]} : vector<8x32xf32> to vector<8x8xf32>
    "tpu.trace_start"() <{level = 10 : i32, message = "qd,kd->qk"}> : () -> ()
    %cst_231 = arith.constant dense<0.000000e+00> : vector<8x8xf32>
    %663 = tpu.matmul %660, %661, %cst_231 {dimension_numbers = #tpu.dot_dimension_numbers<[1], [1], [0], [0], [0, 0, 1, 0], [], []>} : vector<8x8xf32>, vector<8x8xf32>, vector<8x8xf32> -> vector<8x8xf32>
    "tpu.trace_stop"() : () -> ()
    %cst_232 = arith.constant 0.353553385 : f32
    %664 = vector.broadcast %cst_232 : f32 to vector<8x8xf32>
    %665 = arith.mulf %663, %664 : vector<8x8xf32>
    %666 = vector.broadcast %7 : vector<1x8xf32> to vector<8x8xf32>
    %667 = arith.addf %665, %666 : vector<8x8xf32>
    %668 = vector.extract_strided_slice %545 {offsets = [0, 24], sizes = [1, 8], strides = [1, 1]} : vector<1x32xf32> to vector<1x8xf32>
    %669 = vector.broadcast %668 : vector<1x8xf32> to vector<8x8xf32>
    %670 = arith.mulf %660, %669 : vector<8x8xf32>
    %cst_233 = arith.constant dense<0.000000e+00> : vector<8xf32>
    %671 = vector.multi_reduction <add>, %670, %cst_233 [1] : vector<8x8xf32> to vector<8xf32>
    %672 = vector.shape_cast %671 : vector<8xf32> to vector<8x1xf32>
    %cst_234 = arith.constant 0.353553385 : f32
    %673 = vector.broadcast %cst_234 : f32 to vector<8x1xf32>
    %674 = arith.mulf %672, %673 : vector<8x1xf32>
    %cst_235 = arith.constant dense<0xFF800000> : vector<8xf32>
    %675 = vector.multi_reduction <maximumf>, %667, %cst_235 [1] : vector<8x8xf32> to vector<8xf32>
    %676 = vector.shape_cast %675 : vector<8xf32> to vector<8x1xf32>
    %677 = arith.maximumf %676, %674 : vector<8x1xf32>
    %678 = vector.broadcast %677 : vector<8x1xf32> to vector<8x8xf32>
    %679 = arith.subf %667, %678 : vector<8x8xf32>
    %680 = math.exp %679 : vector<8x8xf32>
    %681 = arith.subf %674, %677 : vector<8x1xf32>
    %682 = math.exp %681 : vector<8x1xf32>
    %cst_236 = arith.constant dense<0.000000e+00> : vector<8xf32>
    %683 = vector.multi_reduction <add>, %680, %cst_236 [1] : vector<8x8xf32> to vector<8xf32>
    %684 = vector.shape_cast %683 : vector<8xf32> to vector<8x1xf32>
    %685 = arith.addf %684, %682 : vector<8x1xf32>
    "tpu.trace_start"() <{level = 10 : i32, message = "qk,kd->qd"}> : () -> ()
    %cst_237 = arith.constant dense<0.000000e+00> : vector<8x8xf32>
    %686 = tpu.matmul %680, %662, %cst_237 {dimension_numbers = #tpu.dot_dimension_numbers<[1], [0], [0], [1], [0, 0, 1, 1], [], []>} : vector<8x8xf32>, vector<8x8xf32>, vector<8x8xf32> -> vector<8x8xf32>
    "tpu.trace_stop"() : () -> ()
    %687 = vector.extract_strided_slice %547 {offsets = [0, 24], sizes = [1, 8], strides = [1, 1]} : vector<1x32xf32> to vector<1x8xf32>
    %688 = vector.broadcast %682 : vector<8x1xf32> to vector<8x8xf32>
    %689 = vector.broadcast %687 : vector<1x8xf32> to vector<8x8xf32>
    %690 = arith.mulf %688, %689 : vector<8x8xf32>
    %691 = arith.addf %686, %690 : vector<8x8xf32>
    %692 = vector.broadcast %685 : vector<8x1xf32> to vector<8x8xf32>
    %693 = arith.divf %691, %692 : vector<8x8xf32>
    %694 = vector.extract_strided_slice %543 {offsets = [24, 0], sizes = [8, 32], strides = [1, 1]} : vector<32x32xf32> to vector<8x32xf32>
    %cst_238 = arith.constant dense<0.000000e+00> : vector<8x32xf32>
    %695 = tpu.matmul %693, %694, %cst_238 {dimension_numbers = #tpu.dot_dimension_numbers<[1], [0], [0], [1], [0, 0, 1, 1], [], []>} : vector<8x8xf32>, vector<8x32xf32>, vector<8x32xf32> -> vector<8x32xf32>
    %696 = arith.addf %659, %695 : vector<8x32xf32>
    %697 = arith.addf %696, %512 : vector<8x32xf32>
    %c1_239 = arith.constant 1 : index
    %c0_240 = arith.constant 0 : index
    %c0_241 = arith.constant 0 : index
    %698 = vector.load %arg12[%c1_239, %c0_240, %c0_241] : memref<2x32x128xf32, #tpu.memory_space<vmem>>, vector<1x32x128xf32>
    %699 = vector.shape_cast %698 : vector<1x32x128xf32> to vector<32x128xf32>
    %cst_242 = arith.constant dense<0.000000e+00> : vector<8x128xf32>
    %700 = tpu.matmul %697, %699, %cst_242 {dimension_numbers = #tpu.dot_dimension_numbers<[1], [0], [0], [1], [0, 0, 1, 1], [], []>} : vector<8x32xf32>, vector<32x128xf32>, vector<8x128xf32> -> vector<8x128xf32>
    %cst_243 = arith.constant 5.000000e-01 : f32
    %701 = vector.broadcast %cst_243 : f32 to vector<8x128xf32>
    %702 = arith.mulf %701, %700 : vector<8x128xf32>
    %cst_244 = arith.constant 0.707106769 : f32
    %703 = vector.broadcast %cst_244 : f32 to vector<8x128xf32>
    %704 = arith.mulf %700, %703 : vector<8x128xf32>
    %705 = math.absf %704 : vector<8x128xf32>
    %cst_245 = arith.constant 0.327591091 : f32
    %706 = vector.broadcast %cst_245 : f32 to vector<8x128xf32>
    %707 = arith.mulf %706, %705 : vector<8x128xf32>
    %cst_246 = arith.constant 1.000000e+00 : f32
    %708 = vector.broadcast %cst_246 : f32 to vector<8x128xf32>
    %709 = arith.addf %708, %707 : vector<8x128xf32>
    %cst_247 = arith.constant 1.000000e+00 : f32
    %710 = vector.broadcast %cst_247 : f32 to vector<8x128xf32>
    %711 = arith.divf %710, %709 : vector<8x128xf32>
    %cst_248 = arith.constant 1.06140542 : f32
    %712 = vector.broadcast %cst_248 : f32 to vector<8x128xf32>
    %713 = arith.mulf %712, %711 : vector<8x128xf32>
    %cst_249 = arith.constant -1.45315206 : f32
    %714 = vector.broadcast %cst_249 : f32 to vector<8x128xf32>
    %715 = arith.addf %713, %714 : vector<8x128xf32>
    %716 = arith.mulf %715, %711 : vector<8x128xf32>
    %cst_250 = arith.constant 1.42141378 : f32
    %717 = vector.broadcast %cst_250 : f32 to vector<8x128xf32>
    %718 = arith.addf %716, %717 : vector<8x128xf32>
    %719 = arith.mulf %718, %711 : vector<8x128xf32>
    %cst_251 = arith.constant -0.284496725 : f32
    %720 = vector.broadcast %cst_251 : f32 to vector<8x128xf32>
    %721 = arith.addf %719, %720 : vector<8x128xf32>
    %722 = arith.mulf %721, %711 : vector<8x128xf32>
    %cst_252 = arith.constant 0.254829586 : f32
    %723 = vector.broadcast %cst_252 : f32 to vector<8x128xf32>
    %724 = arith.addf %722, %723 : vector<8x128xf32>
    %725 = arith.mulf %724, %711 : vector<8x128xf32>
    %cst_253 = arith.constant 0.000000e+00 : f32
    %726 = vector.broadcast %cst_253 : f32 to vector<8x128xf32>
    %727 = arith.subf %726, %705 : vector<8x128xf32>
    %728 = arith.mulf %727, %705 : vector<8x128xf32>
    %729 = math.exp %728 : vector<8x128xf32>
    %730 = arith.mulf %725, %729 : vector<8x128xf32>
    %cst_254 = arith.constant 1.000000e+00 : f32
    %731 = vector.broadcast %cst_254 : f32 to vector<8x128xf32>
    %732 = arith.subf %731, %730 : vector<8x128xf32>
    %cst_255 = arith.constant 0.000000e+00 : f32
    %733 = vector.broadcast %cst_255 : f32 to vector<8x128xf32>
    %734 = arith.cmpf oge, %704, %733 : vector<8x128xf32>
    %cst_256 = arith.constant 0.000000e+00 : f32
    %735 = vector.broadcast %cst_256 : f32 to vector<8x128xf32>
    %736 = arith.subf %735, %732 : vector<8x128xf32>
    %737 = arith.select %734, %732, %736 : vector<8x128xi1>, vector<8x128xf32>
    %cst_257 = arith.constant 1.000000e+00 : f32
    %738 = vector.broadcast %cst_257 : f32 to vector<8x128xf32>
    %739 = arith.addf %738, %737 : vector<8x128xf32>
    %740 = arith.mulf %702, %739 : vector<8x128xf32>
    %c1_258 = arith.constant 1 : index
    %c0_259 = arith.constant 0 : index
    %c0_260 = arith.constant 0 : index
    %741 = vector.load %arg13[%c1_258, %c0_259, %c0_260] : memref<2x1x128xf32, #tpu.memory_space<vmem>>, vector<1x1x128xf32>
    %742 = vector.shape_cast %741 : vector<1x1x128xf32> to vector<1x128xf32>
    %cst_261 = arith.constant dense<0.000000e+00> : vector<8xf32>
    %743 = vector.multi_reduction <add>, %740, %cst_261 [1] : vector<8x128xf32> to vector<8xf32>
    %744 = vector.shape_cast %743 : vector<8xf32> to vector<8x1xf32>
    %cst_262 = arith.constant 1.280000e+02 : f32
    %745 = vector.broadcast %cst_262 : f32 to vector<8x1xf32>
    %746 = arith.divf %744, %745 : vector<8x1xf32>
    %747 = vector.broadcast %746 : vector<8x1xf32> to vector<8x128xf32>
    %748 = arith.subf %740, %747 : vector<8x128xf32>
    %749 = arith.mulf %748, %748 : vector<8x128xf32>
    %cst_263 = arith.constant dense<0.000000e+00> : vector<8xf32>
    %750 = vector.multi_reduction <add>, %749, %cst_263 [1] : vector<8x128xf32> to vector<8xf32>
    %751 = vector.shape_cast %750 : vector<8xf32> to vector<8x1xf32>
    %cst_264 = arith.constant 1.280000e+02 : f32
    %752 = vector.broadcast %cst_264 : f32 to vector<8x1xf32>
    %753 = arith.divf %751, %752 : vector<8x1xf32>
    %754 = vector.broadcast %746 : vector<8x1xf32> to vector<8x128xf32>
    %755 = arith.subf %740, %754 : vector<8x128xf32>
    %cst_265 = arith.constant 9.99999974E-6 : f32
    %756 = vector.broadcast %cst_265 : f32 to vector<8x1xf32>
    %757 = arith.addf %753, %756 : vector<8x1xf32>
    %758 = math.rsqrt %757 : vector<8x1xf32>
    %759 = vector.broadcast %758 : vector<8x1xf32> to vector<8x128xf32>
    %760 = arith.mulf %755, %759 : vector<8x128xf32>
    %761 = vector.broadcast %742 : vector<1x128xf32> to vector<8x128xf32>
    %762 = arith.mulf %760, %761 : vector<8x128xf32>
    %c1_266 = arith.constant 1 : index
    %c0_267 = arith.constant 0 : index
    %c0_268 = arith.constant 0 : index
    %763 = vector.load %arg14[%c1_266, %c0_267, %c0_268] : memref<2x128x32xf32, #tpu.memory_space<vmem>>, vector<1x128x32xf32>
    %764 = vector.shape_cast %763 : vector<1x128x32xf32> to vector<128x32xf32>
    %cst_269 = arith.constant dense<0.000000e+00> : vector<8x32xf32>
    %765 = tpu.matmul %762, %764, %cst_269 {dimension_numbers = #tpu.dot_dimension_numbers<[1], [0], [0], [1], [0, 0, 1, 1], [], []>} : vector<8x128xf32>, vector<128x32xf32>, vector<8x32xf32> -> vector<8x32xf32>
    %766 = arith.addf %765, %697 : vector<8x32xf32>
    %c0_270 = arith.constant 0 : index
    %c0_271 = arith.constant 0 : index
    %767 = vector.load %arg17[%c0_270, %c0_271] : memref<1x32xf32, #tpu.memory_space<vmem>>, vector<1x32xf32>
    %cst_272 = arith.constant dense<0.000000e+00> : vector<8xf32>
    %768 = vector.multi_reduction <add>, %766, %cst_272 [1] : vector<8x32xf32> to vector<8xf32>
    %769 = vector.shape_cast %768 : vector<8xf32> to vector<8x1xf32>
    %cst_273 = arith.constant 3.200000e+01 : f32
    %770 = vector.broadcast %cst_273 : f32 to vector<8x1xf32>
    %771 = arith.divf %769, %770 : vector<8x1xf32>
    %772 = vector.broadcast %771 : vector<8x1xf32> to vector<8x32xf32>
    %773 = arith.subf %766, %772 : vector<8x32xf32>
    %774 = arith.mulf %773, %773 : vector<8x32xf32>
    %cst_274 = arith.constant dense<0.000000e+00> : vector<8xf32>
    %775 = vector.multi_reduction <add>, %774, %cst_274 [1] : vector<8x32xf32> to vector<8xf32>
    %776 = vector.shape_cast %775 : vector<8xf32> to vector<8x1xf32>
    %cst_275 = arith.constant 3.200000e+01 : f32
    %777 = vector.broadcast %cst_275 : f32 to vector<8x1xf32>
    %778 = arith.divf %776, %777 : vector<8x1xf32>
    %779 = vector.broadcast %771 : vector<8x1xf32> to vector<8x32xf32>
    %780 = arith.subf %766, %779 : vector<8x32xf32>
    %cst_276 = arith.constant 9.99999974E-6 : f32
    %781 = vector.broadcast %cst_276 : f32 to vector<8x1xf32>
    %782 = arith.addf %778, %781 : vector<8x1xf32>
    %783 = math.rsqrt %782 : vector<8x1xf32>
    %784 = vector.broadcast %783 : vector<8x1xf32> to vector<8x32xf32>
    %785 = arith.mulf %780, %784 : vector<8x32xf32>
    %786 = vector.broadcast %767 : vector<1x32xf32> to vector<8x32xf32>
    %787 = arith.mulf %785, %786 : vector<8x32xf32>
    %c0_277 = arith.constant 0 : index
    %c0_278 = arith.constant 0 : index
    %788 = vector.load %arg18[%c0_277, %c0_278] : memref<1x32xf32, #tpu.memory_space<vmem>>, vector<1x32xf32>
    %cst_279 = arith.constant dense<0.000000e+00> : vector<8xf32>
    %789 = vector.multi_reduction <add>, %787, %cst_279 [1] : vector<8x32xf32> to vector<8xf32>
    %790 = vector.shape_cast %789 : vector<8xf32> to vector<8x1xf32>
    %cst_280 = arith.constant 3.200000e+01 : f32
    %791 = vector.broadcast %cst_280 : f32 to vector<8x1xf32>
    %792 = arith.divf %790, %791 : vector<8x1xf32>
    %793 = vector.broadcast %792 : vector<8x1xf32> to vector<8x32xf32>
    %794 = arith.subf %787, %793 : vector<8x32xf32>
    %795 = arith.mulf %794, %794 : vector<8x32xf32>
    %cst_281 = arith.constant dense<0.000000e+00> : vector<8xf32>
    %796 = vector.multi_reduction <add>, %795, %cst_281 [1] : vector<8x32xf32> to vector<8xf32>
    %797 = vector.shape_cast %796 : vector<8xf32> to vector<8x1xf32>
    %cst_282 = arith.constant 3.200000e+01 : f32
    %798 = vector.broadcast %cst_282 : f32 to vector<8x1xf32>
    %799 = arith.divf %797, %798 : vector<8x1xf32>
    %800 = vector.broadcast %792 : vector<8x1xf32> to vector<8x32xf32>
    %801 = arith.subf %787, %800 : vector<8x32xf32>
    %cst_283 = arith.constant 9.99999974E-6 : f32
    %802 = vector.broadcast %cst_283 : f32 to vector<8x1xf32>
    %803 = arith.addf %799, %802 : vector<8x1xf32>
    %804 = math.rsqrt %803 : vector<8x1xf32>
    %805 = vector.broadcast %804 : vector<8x1xf32> to vector<8x32xf32>
    %806 = arith.mulf %801, %805 : vector<8x32xf32>
    %807 = vector.broadcast %788 : vector<1x32xf32> to vector<8x32xf32>
    %808 = arith.mulf %806, %807 : vector<8x32xf32>
    %c0_284 = arith.constant 0 : index
    %c0_285 = arith.constant 0 : index
    %c0_286 = arith.constant 0 : index
    %809 = vector.load %arg20[%c0_284, %c0_285, %c0_286] : memref<1x8x32xf32, #tpu.memory_space<vmem>>, vector<1x8x32xf32>
    %810 = vector.shape_cast %809 : vector<1x8x32xf32> to vector<8x32xf32>
    %811 = vector.shape_cast %808 : vector<8x32xf32> to vector<1x8x32xf32>
    tpu.vector_store %arg20[%c0_284, %c0_285, %c0_286], %811 {strides = array<i32>} : memref<1x8x32xf32, #tpu.memory_space<vmem>>, vector<1x8x32xf32>,
    %c0_287 = arith.constant 0 : index
    %c0_288 = arith.constant 0 : index
    %812 = vector.load %arg19[%c0_287, %c0_288] : memref<32x72xf32, #tpu.memory_space<vmem>>, vector<32x72xf32>
    %cst_289 = arith.constant dense<0.000000e+00> : vector<8x72xf32>
    %813 = tpu.matmul %808, %812, %cst_289 {dimension_numbers = #tpu.dot_dimension_numbers<[1], [0], [0], [1], [0, 0, 1, 1], [], []>} : vector<8x32xf32>, vector<32x72xf32>, vector<8x72xf32> -> vector<8x72xf32>
    %c0_290 = arith.constant 0 : index
    %c0_291 = arith.constant 0 : index
    %c0_292 = arith.constant 0 : index
    %814 = vector.load %arg21[%c0_290, %c0_291, %c0_292] : memref<1x8x72xf32, #tpu.memory_space<vmem>>, vector<1x8x72xf32>
    %815 = vector.shape_cast %814 : vector<1x8x72xf32> to vector<8x72xf32>
    %816 = vector.shape_cast %813 : vector<8x72xf32> to vector<1x8x72xf32>
    tpu.vector_store %arg21[%c0_290, %c0_291, %c0_292], %816 {strides = array<i32>} : memref<1x8x72xf32, #tpu.memory_space<vmem>>, vector<1x8x72xf32>,
    return
  }
  func.func @transform_0(%arg0: i32) -> (i32, i32, i32) {
    %c0_i32 = arith.constant 0 : i32
    %c0_i32_0 = arith.constant 0 : i32
    %c0_i32_1 = arith.constant 0 : i32
    return %arg0, %c0_i32, %c0_i32_0 : i32, i32, i32
  }
  func.func @transform_1(%arg0: i32) -> (i32, i32, i32) {
    %c0_i32 = arith.constant 0 : i32
    %c0_i32_0 = arith.constant 0 : i32
    %c0_i32_1 = arith.constant 0 : i32
    return %arg0, %c0_i32, %c0_i32_0 : i32, i32, i32
  }
  func.func @transform_2(%arg0: i32) -> (i32, i32, i32) {
    %c0_i32 = arith.constant 0 : i32
    %c0_i32_0 = arith.constant 0 : i32
    %c0_i32_1 = arith.constant 0 : i32
    return %arg0, %c0_i32, %c0_i32_0 : i32, i32, i32
  }
  func.func @transform_3(%arg0: i32) -> (i32, i32, i32) {
    %c0_i32 = arith.constant 0 : i32
    %c0_i32_0 = arith.constant 0 : i32
    %c0_i32_1 = arith.constant 0 : i32
    return %arg0, %c0_i32, %c0_i32_0 : i32, i32, i32
  }
  func.func @transform_4(%arg0: i32) -> (i32, i32, i32) {
    %c0_i32 = arith.constant 0 : i32
    %c0_i32_0 = arith.constant 0 : i32
    %c0_i32_1 = arith.constant 0 : i32
    %c0_i32_2 = arith.constant 0 : i32
    return %c0_i32, %c0_i32_0, %c0_i32_1 : i32, i32, i32
  }
  func.func @transform_5(%arg0: i32) -> (i32, i32, i32) {
    %c0_i32 = arith.constant 0 : i32
    %c0_i32_0 = arith.constant 0 : i32
    %c0_i32_1 = arith.constant 0 : i32
    %c0_i32_2 = arith.constant 0 : i32
    return %c0_i32, %c0_i32_0, %c0_i32_1 : i32, i32, i32
  }
  func.func @transform_6(%arg0: i32) -> (i32, i32, i32) {
    %c0_i32 = arith.constant 0 : i32
    %c0_i32_0 = arith.constant 0 : i32
    %c0_i32_1 = arith.constant 0 : i32
    %c0_i32_2 = arith.constant 0 : i32
    return %c0_i32, %c0_i32_0, %c0_i32_1 : i32, i32, i32
  }
  func.func @transform_7(%arg0: i32) -> (i32, i32, i32) {
    %c0_i32 = arith.constant 0 : i32
    %c0_i32_0 = arith.constant 0 : i32
    %c0_i32_1 = arith.constant 0 : i32
    %c0_i32_2 = arith.constant 0 : i32
    return %c0_i32, %c0_i32_0, %c0_i32_1 : i32, i32, i32
  }
  func.func @transform_8(%arg0: i32) -> (i32, i32, i32) {
    %c0_i32 = arith.constant 0 : i32
    %c0_i32_0 = arith.constant 0 : i32
    %c0_i32_1 = arith.constant 0 : i32
    %c0_i32_2 = arith.constant 0 : i32
    return %c0_i32, %c0_i32_0, %c0_i32_1 : i32, i32, i32
  }
  func.func @transform_9(%arg0: i32) -> (i32, i32, i32) {
    %c0_i32 = arith.constant 0 : i32
    %c0_i32_0 = arith.constant 0 : i32
    %c0_i32_1 = arith.constant 0 : i32
    %c0_i32_2 = arith.constant 0 : i32
    return %c0_i32, %c0_i32_0, %c0_i32_1 : i32, i32, i32
  }
  func.func @transform_10(%arg0: i32) -> (i32, i32, i32) {
    %c0_i32 = arith.constant 0 : i32
    %c0_i32_0 = arith.constant 0 : i32
    %c0_i32_1 = arith.constant 0 : i32
    %c0_i32_2 = arith.constant 0 : i32
    return %c0_i32, %c0_i32_0, %c0_i32_1 : i32, i32, i32
  }
  func.func @transform_11(%arg0: i32) -> (i32, i32, i32) {
    %c0_i32 = arith.constant 0 : i32
    %c0_i32_0 = arith.constant 0 : i32
    %c0_i32_1 = arith.constant 0 : i32
    %c0_i32_2 = arith.constant 0 : i32
    return %c0_i32, %c0_i32_0, %c0_i32_1 : i32, i32, i32
  }
  func.func @transform_12(%arg0: i32) -> (i32, i32, i32) {
    %c0_i32 = arith.constant 0 : i32
    %c0_i32_0 = arith.constant 0 : i32
    %c0_i32_1 = arith.constant 0 : i32
    %c0_i32_2 = arith.constant 0 : i32
    return %c0_i32, %c0_i32_0, %c0_i32_1 : i32, i32, i32
  }
  func.func @transform_13(%arg0: i32) -> (i32, i32, i32) {
    %c0_i32 = arith.constant 0 : i32
    %c0_i32_0 = arith.constant 0 : i32
    %c0_i32_1 = arith.constant 0 : i32
    %c0_i32_2 = arith.constant 0 : i32
    return %c0_i32, %c0_i32_0, %c0_i32_1 : i32, i32, i32
  }
  func.func @transform_14(%arg0: i32) -> (i32, i32) {
    %c0_i32 = arith.constant 0 : i32
    %c0_i32_0 = arith.constant 0 : i32
    %c0_i32_1 = arith.constant 0 : i32
    return %c0_i32, %c0_i32_0 : i32, i32
  }
  func.func @transform_15(%arg0: i32) -> (i32, i32) {
    %c0_i32 = arith.constant 0 : i32
    %c0_i32_0 = arith.constant 0 : i32
    %c0_i32_1 = arith.constant 0 : i32
    return %c0_i32, %c0_i32_0 : i32, i32
  }
  func.func @transform_16(%arg0: i32) -> (i32, i32) {
    %c0_i32 = arith.constant 0 : i32
    %c0_i32_0 = arith.constant 0 : i32
    %c0_i32_1 = arith.constant 0 : i32
    return %c0_i32, %c0_i32_0 : i32, i32
  }
  func.func @transform_17(%arg0: i32) -> (i32, i32) {
    %c0_i32 = arith.constant 0 : i32
    %c0_i32_0 = arith.constant 0 : i32
    %c0_i32_1 = arith.constant 0 : i32
    return %c0_i32, %c0_i32_0 : i32, i32
  }
  func.func @transform_18(%arg0: i32) -> (i32, i32) {
    %c0_i32 = arith.constant 0 : i32
    %c0_i32_0 = arith.constant 0 : i32
    %c0_i32_1 = arith.constant 0 : i32
    return %c0_i32, %c0_i32_0 : i32, i32
  }
  func.func @transform_19(%arg0: i32) -> (i32, i32, i32) {
    %c0_i32 = arith.constant 0 : i32
    %c0_i32_0 = arith.constant 0 : i32
    %c0_i32_1 = arith.constant 0 : i32
    return %arg0, %c0_i32, %c0_i32_0 : i32, i32, i32
  }
  func.func @transform_20(%arg0: i32) -> (i32, i32, i32) {
    %c0_i32 = arith.constant 0 : i32
    %c0_i32_0 = arith.constant 0 : i32
    %c0_i32_1 = arith.constant 0 : i32
    return %arg0, %c0_i32, %c0_i32_0 : i32, i32, i32
  }
}

</mosaic_0001>

<bundles_post_ra>
// kernel: mlm_forward.1
= control target key start
LH: loop header
LB: loop body
LE: loop exit
PB: predicated region body
PF: predicated region fallthrough
CT: control target
= control target key end

     0   :  { %s4497_s0 = inlined_call_operand.vmem [shape: f32[2,8,32], index: 0, kind: input, shape index: {}]   ;;  %s4498_s1 = inlined_call_operand.vmem [shape: f32[2,8,32], index: 1, kind: input, shape index: {}]   ;;  %s4499_s2 = inlined_call_operand.vmem [shape: f32[2,1,8], index: 2, kind: input, shape index: {}]   ;;  %s4500_s3 = inlined_call_operand.vmem [shape: f32[2,1,8], index: 3, kind: input, shape index: {}]   ;;  %s4501_s4 = inlined_call_operand.vmem [shape: f32[2,32,96], index: 4, kind: input, shape index: {}]   ;;  %s4502_s5 = inlined_call_operand.vmem [shape: f32[2,32,32], index: 5, kind: input, shape index: {}]   ;;  %s4503_s6 = inlined_call_operand.vmem [shape: f32[2,32,32], index: 6, kind: input, shape index: {}]   ;;  %s4504_s7 = inlined_call_operand.vmem [shape: f32[2,32,64], index: 7, kind: input, shape index: {}]   ;;  %s4505_s8 = inlined_call_operand.vmem [shape: f32[2,32,32], index: 8, kind: input, shape index: {}]   ;;  %s4506_s9 = inlined_call_operand.vmem [shape: f32[2,1,32], index: 9, kind: input, shape index: {}]   ;;  %s4507_s10 = inlined_call_operand.vmem [shape: f32[2,1,32], index: 10, kind: input, shape index: {}]   ;;  %s4508_s11 = inlined_call_operand.vmem [shape: f32[2,32,128], index: 11, kind: input, shape index: {}]   ;;  %s4509_s12 = inlined_call_operand.vmem [shape: f32[2,1,128], index: 12, kind: input, shape index: {}]   ;;  %s4510_s13 = inlined_call_operand.vmem [shape: f32[2,128,32], index: 13, kind: input, shape index: {}]   ;;  %s4511_s14 = inlined_call_operand.vmem [shape: f32[1,32], index: 14, kind: input, shape index: {}]   ;;  %s4512_s15 = inlined_call_operand.vmem [shape: f32[1,32], index: 15, kind: input, shape index: {}]   ;;  %s4513_s16 = inlined_call_operand.vmem [shape: f32[1,32], index: 16, kind: input, shape index: {}]   ;;  %s4514_s17 = inlined_call_operand.vmem [shape: f32[1,32], index: 17, kind: input, shape index: {}]   ;;  %s4515_s18 = inlined_call_operand.vmem [shape: f32[32,72], index: 18, kind: input, shape index: {}]   ;;  %s4516_s19 = inlined_call_operand.hbm [shape: f32[2,8,32], index: 19, kind: output, shape index: {0}]   ;;  %s4517_s20 = inlined_call_operand.vmem [shape: f32[2,8,72], index: 20, kind: output, shape index: {1}]  }
   0x1   :  { %4551 = sst [smem:[#allocation15_spill]] %s4497_s0 }
   0x2   :  { %4552 = sst [smem:[#allocation16_spill]] %s4498_s1 }
   0x3   :  { %4553 = sst [smem:[#allocation17_spill]] %s4499_s2 }
   0x4   :  { %4554 = sst [smem:[#allocation18_spill]] %s4500_s3 }
   0x5   :  { %4555 = sst [smem:[#allocation19_spill]] %s4501_s4 }
   0x6   :  { %4556 = sst [smem:[#allocation20_spill]] %s4507_s10 }
   0x7   :  { %4557 = sst [smem:[#allocation21_spill]] %s4508_s11 }
   0x8   :  { %4558 = sst [smem:[#allocation22_spill]] %s4514_s17 }
   0x9   :  { %4559 = sst [smem:[#allocation23_spill]] %s4515_s18 }
   0xa   :  { %4560 = sst [smem:[#allocation24_spill]] %s4516_s19 }
   0xb   :  { %4561 = sst [smem:[#allocation25_spill]] %s4517_s20 }
   0xc   :  { %26 = vsyncpa [#allocation3], 0 }
   0xd   :  { %28 = vsyncpa [#allocation3 + $0x1], 0  ;;  %s3789_s1 = smov 0   ;;  %s3791_s22 = smov 0  }
   0xe   :  { %s3793_s23 = smov 0   ;;  %s3795_s24 = smov 0  }
   0xf LB: > { %4562 = sst [smem:[#allocation5_spill]] %s3657_s1  ;;  %s3810_s2 = sadd.s32 4294967295, %s3669_s24   ;;  %s3669_s24 = sphi %s3795_s24, %s4606_s24   ;;  %s3665_s23 = sphi %s3793_s23, %s4609_s23   ;;  %s3661_s22 = sphi %s3791_s22, %s4608_s22   ;;  %s3657_s1 = sphi %s3789_s1, %s4607_s1  }
  0x10   : > { %4563 = sst [smem:[#allocation6_spill]] %s3661_s22  ;;  %s3299_s25 = sadd.s32 4294967294, %s3669_s24  }
  0x11   : > { %4564 = sst [smem:[#allocation7_spill]] %s3665_s23  ;;  %s3814_s3 = sadd.s32 1, %s3669_s24  }
  0x12   : > { %4565 = sst [smem:[#allocation8_spill]] %s3669_s24  ;;  %s460_s26 = sadd.s32 1, %s3665_s23 }
  0x13   : > { %4566 = sst [smem:[#allocation9_spill]] %s3810_s2  ;;  %s457_s27 = ssub.s32 %s3669_s24, %s3814_s3 }
  0x14   : > { %4567 = sst [smem:[#allocation10_spill]] %s3814_s3  ;;  %p470_p0 = scmp.ne.s32.totalorder %s3665_s23, %s3661_s22 }
  0x15   : > { %p458_p1 = scmp.eq.s32.totalorder %s457_s27, 0  ;;  %p471_p2 = scmp.eq.s32.totalorder %s3810_s2, 1 }
  0x16   : > { %p476_p3 = scmp.ne.s32.totalorder %s3661_s22, %s3657_s1  ;;  %p477_p4 = scmp.eq.s32.totalorder %s3299_s25, 1 }
  0x17   : > { %s3825_s28 = scalar_select %p458_p1, %s3665_s23, %s460_s26  }
  0x18   : > { %p3827_p5 = por %p471_p2, %p470_p0  ;;  %p3831_p6 = por %p477_p4, %p476_p3 }
  0x19   : > { %4568 = sst [smem:[#allocation11_spill]] %s3825_s28  ;;  %p3302_p7 = scmp.ge.s32.totalorder %s3669_s24, 1 }
  0x1a   : > { %s4569_s4 = scalar_select %p3827_p5, 1, 0 }
  0x1b   : > { %s4571_s29 = scalar_select %p3831_p6, 1, 0 }
  0x1c   : > { %4570 = sst [smem:[#allocation12_spill]] %s4569_s4  ;;  %p592_p8 = scmp.lt.s32.totalorder %s3669_s24, 3 }
  0x1d   : > { %4572 = sst [smem:[#allocation13_spill]] %s4571_s29 }
  0x1e   : > { %p593_p9 = pnand %p3302_p7, %p592_p8 }
  0x20   : > { %596 = sbr.rel (%p593_p9) target bundleno = 7719 (0x1e27), region = 96 }
  0x25   : > { %p663_p10 = scmp.lt.s32.totalorder %s3810_s2, 1  ;;  %s4574_s26 = sld [smem:[#allocation17_spill]]  ;;  %vm686_vm0 = vcmask 261120   ;;  %v3671_v2 = vmov 32.0   ;;  %v3481_v27 = vld [vmem:[%s4511_s14] ss:$0 sm:$0xff] }
  0x26   : > { %s4575_s3 = sld [smem:[#allocation15_spill]]  ;;  %3494 = vrcp.f32 %v3671_v2  ;;  %s4542_s1 = smov 120   ;;  %vm754_vm5 = vcmask 64512   ;;  %v747_v43 = vld [vmem:[%s4502_s5] sm:$0xff] }
  0x27   : > { %s664_s30 = scalar_select %p663_p10, %s3810_s2, 1 }
  0x28   : > { %s4576_s20 = sld [smem:[#allocation18_spill]]  ;;  %s4536_s24 = smov 96  }
  0x29   : > { %s3839_s0 = sshll.u32 %s664_s30, 3  ;;  %s4577_s23 = sld [smem:[#allocation19_spill]] }
  0x2a   : > { %4573 = sst [smem:[#allocation14_spill]] %s3839_s0  ;;  %s4534_s28 = smov 88  }
  0x2b   : > { %s3844_s27 = scalar_lea.vmem %s4574_s26, %s664_s30  ;;  %s4540_s21 = smov 104  }
  0x2c   : > { %s666_s29 = scalar_lea.vmem %s4575_s3, %s3839_s0  ;;  %v3495_v3 = vpop.eup %3494  ;;  %v3897_v35 = vld [vmem:[%s3844_s27] ss:$0 sm:$0xff]  ;;  %s4532_s25 = smov 80  }
  0x2d   : > { %v681_v0 = vld [vmem:[%s666_s29] sm:$0xff]  ;;  %v691_v4 = vmul.f32 32.0, %v3495_v3  ;;  %vm695_vm1 = vweird.f32 %v3495_v3  ;;  %s4530_s29 = smov 72   ;;  %s4528_s26 = smov 48  }
  0x2e   : > { %s3853_s19 = scalar_lea.vmem %s4576_s20, %s664_s30  ;;  %v687_v1 = vsel %vm686_vm0, %v681_v0, 0.0  ;;  %s4529_s30 = smov 56  }
  0x2f   : > { %688 = vadd.xlane.f32.xlu0 %v687_v1  ;;  %v692_v5 = vsub.f32 1.0, %v691_v4  ;;  %s4578_s3 = smov %s4577_s23  ;;  %v723_v14 = vld [vmem:[%s4577_s23 + $0x18] sm:$0xff]  ;;  %s4526_s23 = smov 64  }
  0x30   : > { %739 = vmatpush.msra.mxu0 %v723_v14  ;;  %v722_v15 = vld [vmem:[%s4578_s3 + $0x10] sm:$0xff]  ;;  %v721_v16 = vld [vmem:[%s4578_s3 + $0x8] sm:$0xff]  ;;  %v720_v17 = vld [vmem:[%s4578_s3] sm:$0xff]  ;;  %s4538_s20 = smov 112   ;;  %s4584_s10 = sld [smem:[#allocation20_spill]] }
  0x31   : > { %v693_v6 = vmul.f32 %v3495_v3, %v692_v5  ;;  %s4587_s4 = smov 72   ;;  %s4588_s11 = sld [smem:[#allocation21_spill]] }
  0x32   : > { %740 = vmatpush.msra.mxu0 %v722_v15  ;;  %s4592_s17 = smov 40  }
  0x33   : > { %v694_v7 = vadd.f32 %v3495_v3, %v693_v6 }
  0x34   : > { %741 = vmatpush.msra.mxu0 %v721_v16 }
  0x35   : > { %v3856_v8 = vsel %vm695_vm1, %v3495_v3, %v694_v7 }
  0x36   : > { %742 = vmatpush.msra.mxu0 %v720_v17 }
  0xa2   : > { %v689_v9 = vpop.xlane.xlu0 %688 }
  0xa3   : > { %v697_v10 = vmul.f32 %v3856_v8, %v689_v9 }
  0xa5   : > { %v698_v11 = vsub.f32 %v681_v0, %v697_v10 }
  0xa7   : > { %v699_v12 = vmul.f32 %v698_v11, %v698_v11 }
  0xa9   : > { %v700_v13 = vsel %vm686_vm0, %v699_v12, 0.0 }
  0xaa   : > { %701 = vadd.xlane.f32.xlu0 %v700_v13 }
 0x11d   : > { %v702_v18 = vpop.xlane.xlu0 %701 }
 0x11e   : > { %v703_v19 = vmul.f32 %v702_v18, %v3856_v8  ;;  %v748_v18 = vld [vmem:[%s4502_s5 + $0x8] sm:$0xff] }
 0x120   : > { %v704_v20 = vadd.f32 1e-05, %v703_v19 }
 0x122   : > { %3496 = vrsqrt.f32 %v704_v20  ;;  %vm711_vm3 = vweird.f32 %v704_v20 }
 0x128   : > { %v3497_v21 = vpop.eup %3496 }
 0x129   : > { %v706_v22 = vmul.f32 %v3497_v21, %v704_v20  ;;  %vm712_vm2 = vweird.f32 %v3497_v21 }
 0x12a   : > { %vm713_vm4 = vmor %vm711_vm3, %vm712_vm2 }
 0x12b   : > { %v707_v23 = vmul.f32 %v3497_v21, %v706_v22 }
 0x12d   : > { %v708_v24 = vmul.f32 0.5, %v707_v23 }
 0x12f   : > { %v709_v25 = vsub.f32 1.5, %v708_v24 }
 0x131   : > { %v710_v26 = vmul.f32 %v3497_v21, %v709_v25 }
 0x133   : > { %v714_v28 = vsel %vm713_vm4, %v3497_v21, %v710_v26 }
 0x134   : > { %v715_v29 = vmul.f32 %v714_v28, %v698_v11 }
 0x136   : > { %v3876_v30 = vmul.f32 %v3481_v27, %v715_v29 }
 0x138   : > { %3307 = vmatmul.msk.f32.vlgmr.msra.gmra.mxu0 %vm686_vm0, %v3876_v30 }
 0x1b5   : > { %v3880_v31 = vpop.f32.mrf.mxu0 }
 0x1b6   : > { %834 = vrot.lane.b32.xlu0 %v3880_v31, %s4542_s1  ;;  %790 = vrot.lane.b32.xlu2 %v3880_v31, %s4526_s23  ;;  %s4527_s23 = smov 40   ;;  %s4582_s1 = smov 112  }
 0x1b7   : > { %752 = vrot.lane.b32.xlu1 %v3880_v31, %s4536_s24  ;;  %s4579_s24 = sld [smem:[#allocation16_spill]] }
 0x1be   : > { %836 = vrot.lane.b32.xlu2 %v3880_v31, %s4534_s28  ;;  %s4581_s28 = smov 104  }
 0x1c6   : > { %1066 = vrot.lane.b32.xlu2 %v3880_v31, %s4530_s29  ;;  %s4580_s29 = smov 120  }
 0x210   : > { %v791_v32 = vpop.permute.xlu2 %790 }
 0x211   : > { %811 = vmatpush.msra.mxu3 %v791_v32 }
 0x218   : > { %v837_v33 = vpop.permute.xlu2 %836 }
 0x219   : > { %3311 = vmatpush.xpose.msk.msrb.mxu3 %vm754_vm5, %v837_v33 }
 0x220   : > { %v1067_v47 = vpop.permute.xlu2 %1066 }
 0x228   : > { %v835_v46 = vpop.permute.xlu0 %834 }
 0x229   : > { %v753_v34 = vpop.permute.xlu1 %752 }
 0x22a   : > { %3308 = vmatpush.xpose.msk.msra.mxu1 %vm754_vm5, %v753_v34 }
 0x22d   : > { %3309 = vmatmul.msk.f32.vlgmr.msra.gmra.mxu1 %vm754_vm5, %v3880_v31 }
 0x22e   : > { %932 = vmatpush.msrb.mxu1 %v748_v18 }
 0x2aa   : > { %v776_v36 = vpop.f32.mrf.mxu1 }
 0x2ab   : > { %v779_v37 = vmul.f32 0.35355338, %v776_v36 }
 0x2ad   : > { %v783_v38 = vadd.f32 %v3897_v35, %v779_v37 }
 0x2af   : > { %v784_v39 = vsel %vm754_vm5, %v783_v38, -inf }
 0x2b0   : > { %785 = vmax.xlane.f32.xlu1 %v784_v39 }
 0x2c9   : > { %870 = vrot.lane.b32.xlu1 %v3880_v31, %s4529_s30  ;;  %s4585_s30 = smov 88  }
 0x2d1   : > { %1064 = vrot.lane.b32.xlu1 %v3880_v31, %s4540_s21  ;;  %s4583_s21 = smov 96  }
 0x323   : > { %v786_v40 = vpop.xlane.xlu1 %785 }
 0x324   : > { %v787_v41 = vsub.f32 %v783_v38, %v786_v40 }
 0x326   : > { %v788_v42 = vmul.f32 1.442695, %v787_v41 }
 0x328   : > { %3498 = vpow2.f32 %v788_v42 }
 0x32e   : > { %v3499_v44 = vpop.eup %3498 }
 0x32f   : > { %3310 = vmatmul.msk.f32.vlgmr.msra.gmra.mxu3 %vm754_vm5, %v3499_v44  ;;  %v816_v45 = vsel %vm754_vm5, %v3499_v44, 0.0 }
 0x330   : > { %817 = vadd.xlane.f32.xlu2 %v816_v45  ;;  %955 = vmatpush.msra.mxu3 %v747_v43  ;;  %v750_v43 = vld [vmem:[%s4502_s5 + $0x18] sm:$0xff] }
 0x337   : > { %3312 = vmatmul.msk.f32.vlgmr.msrb.gmra.mxu3 %vm754_vm5, %v835_v46 }
 0x338   : > { %3320 = vmatpush.xpose.msk.msrb.mxu3 %vm754_vm5, %v1067_v47 }
 0x33b   : > { %v871_v48 = vpop.permute.xlu1 %870 }
 0x33c   : > { %891 = vmatpush.msrb.mxu0 %v871_v48 }
 0x343   : > { %v1065_v1 = vpop.permute.xlu1 %1064 }
 0x348   : > { %960 = vrot.lane.b32.xlu2 %v3880_v31, %s4538_s20  ;;  %s3969_s20 = scalar_lea.vmem %s4579_s24, %s3839_s0  ;;  %s4586_s24 = smov 80  }
 0x349   : > { %s4595_s0 = sld [smem:[#allocation23_spill]] }
 0x3a3   : > { %v818_v49 = vpop.xlane.xlu2 %817 }
 0x3a4   : > { %3500 = vrcp.f32 %v818_v49  ;;  %v830_v53 = vand.u32 2147483648, %v818_v49  ;;  %v828_v55 = vand.u32 2147483647, %v818_v49  ;;  %vm824_vm7 = vweird.f32 %v818_v49 }
 0x3a6   : > { %v831_v58 = vor.u32 1.1754944e-38, %v830_v53  ;;  %vm829_vm9 = vcmp.eq.f32.partialorder %v828_v55, 8.507059e+37 }
 0x3aa   : > { %v3501_v50 = vpop.eup %3500 }
 0x3ab   : > { %v820_v51 = vmul.f32 %v3501_v50, %v818_v49  ;;  %vm825_vm6 = vweird.f32 %v3501_v50  ;;  %v961_v15 = vpop.permute.xlu2 %960 }
 0x3ac   : > { %vm826_vm8 = vmor %vm824_vm7, %vm825_vm6 }
 0x3ad   : > { %v821_v52 = vsub.f32 1.0, %v820_v51 }
 0x3af   : > { %v822_v54 = vmul.f32 %v3501_v50, %v821_v52 }
 0x3b1   : > { %v823_v56 = vadd.f32 %v3501_v50, %v822_v54 }
 0x3b2   : > { %v813_v57 = vpop.f32.mrf.mxu3 }
 0x3b3   : > { %v827_v59 = vsel %vm826_vm8, %v3501_v50, %v823_v56 }
 0x3b4   : > { %v832_v60 = vsel %vm829_vm9, %v831_v58, %v827_v59 }
 0x3b5   : > { %v833_v61 = vmul.f32 %v832_v60, %v813_v57 }
 0x3b7   : > { %3315 = vmatmul.msk.f32.vlgmr.msra.gmra.mxu3 %vm754_vm5, %v833_v61  ;;  %v749_v61 = vld [vmem:[%s4502_s5 + $0x10] sm:$0xff] }
 0x3b8   : > { %1058 = vmatpush.msra.mxu1 %v749_v61 }
 0x3ba   : > { %v859_v62 = vpop.f32.mrf.mxu3 }
 0x3bb   : > { %v862_v63 = vmul.f32 0.35355338, %v859_v62 }
 0x3bd   : > { %v863_v0 = vadd.f32 %v3897_v35, %v862_v63 }
 0x3bf   : > { %3321 = vmatmul.msk.f32.vlgmr.msrb.gmra.mxu3 %vm754_vm5, %v1065_v1  ;;  %v864_v2 = vsel %vm754_vm5, %v863_v0, -inf }
 0x3c0   : > { %865 = vmax.xlane.f32.xlu0 %v864_v2 }
 0x3d4   : > { %962 = vrot.lane.b32.xlu0 %v3880_v31, %s4532_s25  ;;  %s4589_s25 = smov 56  }
 0x3dc   : > { %996 = vrot.lane.b32.xlu0 %v3880_v31, %s4528_s26  ;;  %s4590_s26 = smov 64  }
 0x3e4   : > { %1100 = vrot.lane.b32.xlu0 %v3880_v31, %s4527_s23  ;;  %s4596_s23 = sld [smem:[#allocation6_spill]] }
 0x433   : > { %v866_v3 = vpop.xlane.xlu0 %865 }
 0x434   : > { %v867_v4 = vsub.f32 %v863_v0, %v866_v3 }
 0x436   : > { %v868_v5 = vmul.f32 1.442695, %v867_v4 }
 0x438   : > { %3502 = vpow2.f32 %v868_v5 }
 0x43a   : > { %v3924_v6 = vpop.f32.mrf.mxu3 }
 0x43e   : > { %v3503_v7 = vpop.eup %3502 }
 0x43f   : > { %3313 = vmatmul.msk.f32.vlgmr.msrb.gmra.mxu0 %vm754_vm5, %v3503_v7  ;;  %v896_v9 = vsel %vm754_vm5, %v3503_v7, 0.0 }
 0x440   : > { %897 = vadd.xlane.f32.xlu0 %v896_v9 }
 0x442   : > { %v1089_v10 = vpop.f32.mrf.mxu3 }
 0x443   : > { %v1092_v11 = vmul.f32 0.35355338, %v1089_v10 }
 0x445   : > { %v1093_v12 = vadd.f32 %v3897_v35, %v1092_v11 }
 0x446   : > { %v963_v13 = vpop.permute.xlu0 %962 }
 0x447   : > { %3316 = vmatpush.xpose.msk.msra.mxu0 %vm754_vm5, %v963_v13  ;;  %v1094_v14 = vsel %vm754_vm5, %v1093_v12, -inf }
 0x448   : > { %1095 = vmax.xlane.f32.xlu2 %v1094_v14 }
 0x44a   : > { %3317 = vmatmul.msk.f32.vlgmr.msra.gmra.mxu0 %vm754_vm5, %v961_v15 }
 0x44e   : > { %v997_v16 = vpop.permute.xlu0 %996 }
 0x44f   : > { %1017 = vmatpush.msra.mxu2 %v997_v16 }
 0x451   : > { %1162 = vmatpush.msrb.mxu2 %v750_v43 }
 0x456   : > { %v1101_v17 = vpop.permute.xlu0 %1100 }
 0x457   : > { %1121 = vmatpush.msrb.mxu0 %v1101_v17 }
 0x4b3   : > { %v898_v19 = vpop.xlane.xlu0 %897 }
 0x4b4   : > { %3504 = vrcp.f32 %v898_v19  ;;  %v910_v26 = vand.u32 2147483648, %v898_v19  ;;  %v908_v29 = vand.u32 2147483647, %v898_v19  ;;  %vm904_vm11 = vweird.f32 %v898_v19 }
 0x4b6   : > { %v911_v32 = vor.u32 1.1754944e-38, %v910_v26  ;;  %vm909_vm13 = vcmp.eq.f32.partialorder %v908_v29, 8.507059e+37  ;;  %v1224_v26 = vld [vmem:[%s4504_s7 + $0x8] sm:$0xff]  ;;  %v1199_v29 = vld [vmem:[%s4503_s6 + $0x18] sm:$0xff] }
 0x4ba   : > { %v3505_v20 = vpop.eup %3504 }
 0x4bb   : > { %v900_v21 = vmul.f32 %v3505_v20, %v898_v19  ;;  %v1096_v22 = vpop.xlane.xlu2 %1095  ;;  %vm905_vm10 = vweird.f32 %v3505_v20 }
 0x4bc   : > { %v1097_v23 = vsub.f32 %v1093_v12, %v1096_v22  ;;  %v893_v27 = vpop.f32.mrf.mxu0  ;;  %vm906_vm12 = vmor %vm904_vm11, %vm905_vm10 }
 0x4bd   : > { %v901_v24 = vsub.f32 1.0, %v900_v21 }
 0x4be   : > { %v1098_v25 = vmul.f32 1.442695, %v1097_v23 }
 0x4bf   : > { %v902_v28 = vmul.f32 %v3505_v20, %v901_v24 }
 0x4c0   : > { %3506 = vpow2.f32 %v1098_v25  ;;  %v1226_v25 = vld [vmem:[%s4504_s7 + $0x18] sm:$0xff] }
 0x4c1   : > { %v903_v31 = vadd.f32 %v3505_v20, %v902_v28  ;;  %1242 = vmatpush.msra.mxu3 %v1226_v25  ;;  %v682_v28 = vld [vmem:[%s3969_s20] sm:$0xff] }
 0x4c3   : > { %v907_v33 = vsel %vm906_vm12, %v3505_v20, %v903_v31  ;;  %v1198_v31 = vld [vmem:[%s4503_s6 + $0x10] sm:$0xff] }
 0x4c4   : > { %v912_v34 = vsel %vm909_vm13, %v911_v32, %v907_v33  ;;  %v1197_v32 = vld [vmem:[%s4503_s6 + $0x8] sm:$0xff]  ;;  %v1196_v33 = vld [vmem:[%s4503_s6] sm:$0xff] }
 0x4c5   : > { %v913_v36 = vmul.f32 %v912_v34, %v893_v27  ;;  %v1223_v27 = vld [vmem:[%s4504_s7] sm:$0xff] }
 0x4c6   : > { %v3507_v37 = vpop.eup %3506 }
 0x4c7   : > { %3314 = vmatmul.msk.f32.vlgmr.msrb.gmra.mxu1 %vm754_vm5, %v913_v36  ;;  %v985_v38 = vpop.f32.mrf.mxu0  ;;  %3322 = vmatmul.msk.f32.vlgmr.msrb.gmra.mxu0 %vm754_vm5, %v3507_v37  ;;  %v1126_v42 = vsel %vm754_vm5, %v3507_v37, 0.0 }
 0x4c8   : > { %v988_v39 = vmul.f32 0.35355338, %v985_v38  ;;  %1215 = vmatpush.msrb.mxu1 %v1199_v29 }
 0x4ca   : > { %v989_v40 = vadd.f32 %v3897_v35, %v988_v39  ;;  %1216 = vmatpush.msrb.mxu1 %v1198_v31 }
 0x4cc   : > { %v990_v41 = vsel %vm754_vm5, %v989_v40, -inf  ;;  %1217 = vmatpush.msrb.mxu1 %v1197_v32 }
 0x4cd   : > { %991 = vmax.xlane.f32.xlu1 %v990_v41 }
 0x4ce   : > { %1218 = vmatpush.msrb.mxu1 %v1196_v33 }
 0x4d5   : > { %1127 = vadd.xlane.f32.xlu1 %v1126_v42 }
 0x540   : > { %v992_v44 = vpop.xlane.xlu1 %991 }
 0x541   : > { %v993_v45 = vsub.f32 %v989_v40, %v992_v44  ;;  %v3482_v44 = vld [vmem:[%s4512_s15] ss:$0 sm:$0xff] }
 0x543   : > { %v994_v46 = vmul.f32 1.442695, %v993_v45 }
 0x544   : > { %v1123_v58 = vpop.f32.mrf.mxu0  ;;  %v934_v13 = vpop.f32.mrf.mxu1 }
 0x545   : > { %3508 = vpow2.f32 %v994_v46  ;;  %v958_v14 = vadd.f32 %v3924_v6, %v934_v13 }
 0x548   : > { %v1128_v47 = vpop.xlane.xlu1 %1127 }
 0x549   : > { %3510 = vrcp.f32 %v1128_v47  ;;  %v1140_v52 = vand.u32 2147483648, %v1128_v47  ;;  %v1138_v54 = vand.u32 2147483647, %v1128_v47  ;;  %vm1134_vm15 = vweird.f32 %v1128_v47 }
 0x54b   : > { %v3509_v48 = vpop.eup %3508  ;;  %v1141_v56 = vor.u32 1.1754944e-38, %v1140_v52  ;;  %vm1139_vm2 = vcmp.eq.f32.partialorder %v1138_v54, 8.507059e+37 }
 0x54c   : > { %3318 = vmatmul.msk.f32.vlgmr.msra.gmra.mxu2 %vm754_vm5, %v3509_v48  ;;  %v1022_v35 = vsel %vm754_vm5, %v3509_v48, 0.0 }
 0x54d   : > { %1023 = vadd.xlane.f32.xlu2 %v1022_v35  ;;  %v3483_v35 = vld [vmem:[%s4506_s9] ss:$0 sm:$0xff] }
 0x54f   : > { %v3511_v49 = vpop.eup %3510 }
 0x550   : > { %v1130_v50 = vmul.f32 %v3511_v49, %v1128_v47  ;;  %vm1135_vm14 = vweird.f32 %v3511_v49 }
 0x551   : > { %vm1136_vm1 = vmor %vm1134_vm15, %vm1135_vm14 }
 0x552   : > { %v1131_v51 = vsub.f32 1.0, %v1130_v50 }
 0x554   : > { %v1132_v53 = vmul.f32 %v3511_v49, %v1131_v51 }
 0x556   : > { %v1133_v55 = vadd.f32 %v3511_v49, %v1132_v53  ;;  %v4019_v53 = vld [vmem:[%s3853_s19] ss:$0 sm:$0xff] }
 0x558   : > { %v1137_v57 = vsel %vm1136_vm1, %v3511_v49, %v1133_v55 }
 0x559   : > { %v1142_v59 = vsel %vm1139_vm2, %v1141_v56, %v1137_v57 }
 0x55a   : > { %v1143_v60 = vmul.f32 %v1142_v59, %v1123_v58 }
 0x55c   : > { %3323 = vmatmul.msk.f32.vlgmr.msrb.gmra.mxu2 %vm754_vm5, %v1143_v60 }
 0x5c0   : > { %v1024_v62 = vpop.xlane.xlu2 %1023 }
 0x5c1   : > { %3512 = vrcp.f32 %v1024_v62  ;;  %v1036_v2 = vand.u32 2147483648, %v1024_v62  ;;  %v1034_v4 = vand.u32 2147483647, %v1024_v62  ;;  %vm1030_vm4 = vweird.f32 %v1024_v62 }
 0x5c3   : > { %v1037_v7 = vor.u32 1.1754944e-38, %v1036_v2  ;;  %vm1035_vm7 = vcmp.eq.f32.partialorder %v1034_v4, 8.507059e+37 }
 0x5c7   : > { %v3513_v63 = vpop.eup %3512 }
 0x5c8   : > { %v1026_v0 = vmul.f32 %v3513_v63, %v1024_v62  ;;  %vm1031_vm3 = vweird.f32 %v3513_v63 }
 0x5c9   : > { %vm1032_vm6 = vmor %vm1030_vm4, %vm1031_vm3 }
 0x5ca   : > { %v1027_v1 = vsub.f32 1.0, %v1026_v0  ;;  %v1250_v0 = vld [vmem:[%s4505_s8] sm:$0xff] }
 0x5cc   : > { %v1028_v3 = vmul.f32 %v3513_v63, %v1027_v1 }
 0x5ce   : > { %v1029_v5 = vadd.f32 %v3513_v63, %v1028_v3 }
 0x5cf   : > { %v1019_v10 = vpop.f32.mrf.mxu2 }
 0x5d0   : > { %v1033_v9 = vsel %vm1032_vm6, %v3513_v63, %v1029_v5 }
 0x5d1   : > { %v1038_v11 = vsel %vm1035_vm7, %v1037_v7, %v1033_v9 }
 0x5d2   : > { %v1039_v12 = vmul.f32 %v1038_v11, %v1019_v10 }
 0x5d4   : > { %3319 = vmatmul.msk.f32.vlgmr.msra.gmra.mxu1 %vm754_vm5, %v1039_v12 }
 0x5df   : > { %v1164_v17 = vpop.f32.mrf.mxu2 }
 0x651   : > { %v1060_v15 = vpop.f32.mrf.mxu1 }
 0x652   : > { %v1063_v16 = vadd.f32 %v1060_v15, %v958_v14 }
 0x654   : > { %v1167_v18 = vadd.f32 %v1164_v17, %v1063_v16 }
 0x656   : > { %v3952_v19 = vadd.f32 %v1167_v18, %v3876_v30  ;;  %v1225_v30 = vld [vmem:[%s4504_s7 + $0x10] sm:$0xff] }
 0x657   : > { %1243 = vmatpush.msra.mxu3 %v1225_v30 }
 0x658   : > { %v1170_v20 = vsel %vm686_vm0, %v3952_v19, 0.0 }
 0x659   : > { %1171 = vadd.xlane.f32.xlu1 %v1170_v20  ;;  %1244 = vmatpush.msra.mxu3 %v1224_v26 }
 0x65b   : > { %1245 = vmatpush.msra.mxu3 %v1223_v27 }
 0x65c   : > { %3325 = vmatmul.msk.f32.vlgmr.msra.gmra.mxu3 %vm686_vm0, %v682_v28 }
 0x6cc   : > { %v1172_v21 = vpop.xlane.xlu1 %1171 }
 0x6cd   : > { %v1173_v22 = vmul.f32 %v1172_v21, %v3856_v8  ;;  %v4037_v21 = vld [vmem:[%s4584_s10] ss:$0 sm:$0xff] }
 0x6cf   : > { %v1174_v23 = vsub.f32 %v3952_v19, %v1173_v22 }
 0x6d1   : > { %v1175_v24 = vmul.f32 %v1174_v23, %v1174_v23 }
 0x6d3   : > { %v1176_v6 = vsel %vm686_vm0, %v1175_v24, 0.0 }
 0x6d4   : > { %1177 = vadd.xlane.f32.xlu2 %v1176_v6 }
 0x6df   : > { %v3996_v48 = vpop.f32.mrf.mxu3 }
 0x6e0   : > { %1356 = vrot.lane.b32.xlu0 %v3996_v48, %s4580_s29  ;;  %3326 = vmatpush.xpose.msk.msra.mxu0 %vm754_vm5, %v3996_v48 }
 0x747   : > { %v1178_v34 = vpop.xlane.xlu2 %1177 }
 0x748   : > { %v1179_v36 = vmul.f32 %v1178_v34, %v3856_v8 }
 0x74a   : > { %v1180_v37 = vadd.f32 1e-05, %v1179_v36 }
 0x74c   : > { %3514 = vrsqrt.f32 %v1180_v37  ;;  %vm1187_vm9 = vweird.f32 %v1180_v37 }
 0x752   : > { %v3515_v38 = vpop.eup %3514  ;;  %v1357_v52 = vpop.permute.xlu0 %1356 }
 0x753   : > { %v1182_v39 = vmul.f32 %v3515_v38, %v1180_v37  ;;  %vm1188_vm8 = vweird.f32 %v3515_v38  ;;  %3329 = vmatpush.xpose.msk.msra.mxu1 %vm754_vm5, %v1357_v52 }
 0x754   : > { %vm1189_vm10 = vmor %vm1187_vm9, %vm1188_vm8 }
 0x755   : > { %v1183_v40 = vmul.f32 %v3515_v38, %v1182_v39 }
 0x757   : > { %v1184_v41 = vmul.f32 0.5, %v1183_v40 }
 0x759   : > { %v1185_v42 = vsub.f32 1.5, %v1184_v41 }
 0x75b   : > { %v1186_v43 = vmul.f32 %v3515_v38, %v1185_v42 }
 0x75d   : > { %v1190_v45 = vsel %vm1189_vm10, %v3515_v38, %v1186_v43 }
 0x75e   : > { %v1191_v46 = vmul.f32 %v1190_v45, %v1174_v23 }
 0x760   : > { %v1195_v47 = vmul.f32 %v3482_v44, %v1191_v46 }
 0x762   : > { %3324 = vmatmul.msk.f32.vlgmr.msrb.gmra.mxu1 %vm686_vm0, %v1195_v47 }
 0x7df   : > { %v1220_v49 = vpop.f32.mrf.mxu1 }
 0x7e0   : > { %1619 = vrot.lane.b32.xlu0 %v1220_v49, %s4581_s28  ;;  %3327 = vmatmul.msk.f32.vlgmr.msra.gmra.mxu0 %vm754_vm5, %v1220_v49  ;;  %v1290_v50 = vmul.f32 %v3483_v35, %v1220_v49 }
 0x7e2   : > { %v1291_v51 = vsel %vm754_vm5, %v1290_v50, 0.0 }
 0x7e3   : > { %1292 = vadd.xlane.f32.xlu1 %v1291_v51 }
 0x7e8   : > { %1498 = vrot.lane.b32.xlu0 %v1220_v49, %s4582_s1 }
 0x7f0   : > { %1649 = vrot.lane.b32.xlu0 %v1290_v50, %s4581_s28 }
 0x7fc   : > { %1313 = vrot.lane.b32.xlu1 %v3996_v48, %s4583_s21 }
 0x804   : > { %1621 = vrot.lane.b32.xlu1 %v3996_v48, %s4581_s28 }
 0x80c   : > { %1500 = vrot.lane.b32.xlu1 %v3996_v48, %s4582_s1 }
 0x814   : > { %1528 = vrot.lane.b32.xlu1 %v1290_v50, %s4582_s1 }
 0x852   : > { %v1620_v15 = vpop.permute.xlu0 %1619 }
 0x856   : > { %v1293_v58 = vpop.xlane.xlu1 %1292 }
 0x857   : > { %v1294_v1 = vmul.f32 0.35355338, %v1293_v58 }
 0x85a   : > { %v1499_v25 = vpop.permute.xlu0 %1498 }
 0x85d   : > { %v1279_v54 = vpop.f32.mrf.mxu0 }
 0x85e   : > { %v1282_v55 = vmul.f32 0.35355338, %v1279_v54 }
 0x860   : > { %v1286_v56 = vadd.f32 %v4019_v53, %v1282_v55 }
 0x862   : > { %v1295_v57 = vsel %vm754_vm5, %v1286_v56, -inf  ;;  %v1650_v42 = vpop.permute.xlu0 %1649 }
 0x863   : > { %1296 = vmax.xlane.f32.xlu2 %v1295_v57  ;;  %v1652_v44 = vsel %vm754_vm5, %v1650_v42, 0.0  ;;  %v1253_v42 = vld [vmem:[%s4505_s8 + $0x18] sm:$0xff] }
 0x86e   : > { %v1314_v59 = vpop.permute.xlu1 %1313 }
 0x86f   : > { %1334 = vmatpush.msra.mxu2 %v1314_v59 }
 0x871   : > { %1493 = vmatpush.msrb.mxu2 %v1250_v0 }
 0x876   : > { %v1622_v60 = vpop.permute.xlu1 %1621 }
 0x87e   : > { %v1501_v61 = vpop.permute.xlu1 %1500 }
 0x87f   : > { %3334 = vmatpush.xpose.msk.msrb.mxu1 %vm754_vm5, %v1501_v61 }
 0x886   : > { %v1529_v62 = vpop.permute.xlu1 %1528 }
 0x887   : > { %v1531_v63 = vsel %vm754_vm5, %v1529_v62, 0.0 }
 0x888   : > { %1532 = vadd.xlane.f32.xlu0 %v1531_v63 }
 0x8d6   : > { %v1297_v2 = vpop.xlane.xlu2 %1296 }
 0x8d7   : > { %v1298_v3 = vmax.f32 %v1297_v2, %v1294_v1 }
 0x8d9   : > { %v1299_v4 = vsub.f32 %v1286_v56, %v1298_v3  ;;  %v1302_v5 = vsub.f32 %v1294_v1, %v1298_v3 }
 0x8db   : > { %v1300_v7 = vmul.f32 1.442695, %v1299_v4  ;;  %v1303_v11 = vmul.f32 1.442695, %v1302_v5 }
 0x8dd   : > { %3516 = vpow2.f32 %v1300_v7 }
 0x8de   : > { %3518 = vpow2.f32 %v1303_v11 }
 0x8e3   : > { %v3517_v9 = vpop.eup %3516 }
 0x8e4   : > { %3328 = vmatmul.msk.f32.vlgmr.msra.gmra.mxu2 %vm754_vm5, %v3517_v9  ;;  %v1305_v10 = vsel %vm754_vm5, %v3517_v9, 0.0  ;;  %v3519_v12 = vpop.eup %3518 }
 0x8e5   : > { %3338 = vmatpush.xpose.msk.msra.mxu2 %vm754_vm5, %v1622_v60  ;;  %1306 = vadd.xlane.f32.xlu2 %v1305_v10  ;;  %v1312_v30 = vmul.f32 %v3519_v12, %v4037_v21 }
 0x8fb   : > { %v1533_v57 = vpop.xlane.xlu0 %1532 }
 0x8fd   : > { %1354 = vrot.lane.b32.xlu2 %v1220_v49, %s4580_s29 }
 0x905   : > { %1385 = vrot.lane.b32.xlu2 %v1290_v50, %s4580_s29 }
 0x958   : > { %v1307_v13 = vpop.xlane.xlu2 %1306 }
 0x959   : > { %v1308_v14 = vadd.f32 %v3519_v12, %v1307_v13 }
 0x95b   : > { %3520 = vrcp.f32 %v1308_v14  ;;  %v1350_v22 = vand.u32 2147483648, %v1308_v14  ;;  %v1348_v24 = vand.u32 2147483647, %v1308_v14  ;;  %vm1344_vm12 = vweird.f32 %v1308_v14 }
 0x95d   : > { %v1351_v28 = vor.u32 1.1754944e-38, %v1350_v22  ;;  %vm1349_vm14 = vcmp.eq.f32.partialorder %v1348_v24, 8.507059e+37 }
 0x960   : > { %v1355_v16 = vpop.permute.xlu2 %1354 }
 0x961   : > { %v3521_v17 = vpop.eup %3520  ;;  %3330 = vmatmul.msk.f32.vlgmr.msra.gmra.mxu1 %vm754_vm5, %v1355_v16 }
 0x962   : > { %v1340_v18 = vmul.f32 %v3521_v17, %v1308_v14  ;;  %vm1345_vm11 = vweird.f32 %v3521_v17 }
 0x963   : > { %vm1346_vm13 = vmor %vm1344_vm12, %vm1345_vm11 }
 0x964   : > { %v1341_v20 = vsub.f32 1.0, %v1340_v18 }
 0x966   : > { %v1342_v23 = vmul.f32 %v3521_v17, %v1341_v20 }
 0x967   : > { %v1336_v6 = vpop.f32.mrf.mxu2 }
 0x968   : > { %v1343_v26 = vadd.f32 %v3521_v17, %v1342_v23  ;;  %v1386_v27 = vpop.permute.xlu2 %1385  ;;  %v1337_v31 = vadd.f32 %v1336_v6, %v1312_v30 }
 0x969   : > { %3335 = vmatmul.msk.f32.vlgmr.msrb.gmra.mxu1 %vm754_vm5, %v1499_v25  ;;  %v1388_v29 = vsel %vm754_vm5, %v1386_v27, 0.0  ;;  %v1251_v27 = vld [vmem:[%s4505_s8 + $0x8] sm:$0xff] }
 0x96a   : > { %v1347_v32 = vsel %vm1346_vm13, %v3521_v17, %v1343_v26  ;;  %1389 = vadd.xlane.f32.xlu2 %v1388_v29  ;;  %1470 = vmatpush.msrb.mxu0 %v1251_v27 }
 0x96b   : > { %v1352_v33 = vsel %vm1349_vm14, %v1351_v28, %v1347_v32 }
 0x96c   : > { %v1353_v34 = vmul.f32 %v1352_v33, %v1337_v31  ;;  %v1252_v31 = vld [vmem:[%s4505_s8 + $0x10] sm:$0xff] }
 0x96d   : > { %1613 = vmatpush.msra.mxu0 %v1252_v31 }
 0x96e   : > { %3333 = vmatmul.msk.f32.vlgmr.msrb.gmra.mxu2 %vm754_vm5, %v1353_v34 }
 0x976   : > { %3339 = vmatmul.msk.f32.vlgmr.msra.gmra.mxu2 %vm754_vm5, %v1620_v15 }
 0x9dd   : > { %v1390_v51 = vpop.xlane.xlu2 %1389 }
 0x9de   : > { %v1379_v36 = vpop.f32.mrf.mxu1  ;;  %v1391_v52 = vmul.f32 0.35355338, %v1390_v51 }
 0x9df   : > { %v1382_v37 = vmul.f32 0.35355338, %v1379_v36 }
 0x9e1   : > { %v1383_v38 = vadd.f32 %v4019_v53, %v1382_v37 }
 0x9e3   : > { %v1392_v39 = vsel %vm754_vm5, %v1383_v38, -inf }
 0x9e4   : > { %1393 = vmax.xlane.f32.xlu1 %v1392_v39 }
 0x9e6   : > { %v1523_v40 = vpop.f32.mrf.mxu1 }
 0x9e7   : > { %v1526_v41 = vmul.f32 0.35355338, %v1523_v40 }
 0x9e9   : > { %v1527_v43 = vadd.f32 %v4019_v53, %v1526_v41 }
 0x9eb   : > { %v1535_v45 = vsel %vm754_vm5, %v1527_v43, -inf }
 0x9ec   : > { %1653 = vadd.xlane.f32.xlu1 %v1652_v44  ;;  %1536 = vmax.xlane.f32.xlu2 %v1535_v45 }
 0x9f1   : > { %v4049_v46 = vpop.f32.mrf.mxu2 }
 0x9f9   : > { %v1644_v47 = vpop.f32.mrf.mxu2 }
 0x9fa   : > { %v1647_v35 = vmul.f32 0.35355338, %v1644_v47 }
 0x9fc   : > { %v1648_v49 = vadd.f32 %v4019_v53, %v1647_v35  ;;  %v1534_v53 = vmul.f32 0.35355338, %v1533_v57 }
 0x9fe   : > { %v1656_v50 = vsel %vm754_vm5, %v1648_v49, -inf }
 0x9ff   : > { %1657 = vmax.xlane.f32.xlu0 %v1656_v50 }
 0xa04   : > { %1407 = vrot.lane.b32.xlu2 %v3996_v48, %s4585_s30 }
 0xa05   : > { %1550 = vrot.lane.b32.xlu1 %v3996_v48, %s4586_s24 }
 0xa13   : > { %1671 = vrot.lane.b32.xlu0 %v3996_v48, %s4587_s4 }
 0xa57   : > { %v1394_v54 = vpop.xlane.xlu1 %1393 }
 0xa58   : > { %v1395_v55 = vmax.f32 %v1394_v54, %v1391_v52 }
 0xa5a   : > { %v1396_v56 = vsub.f32 %v1383_v38, %v1395_v55  ;;  %v1399_v48 = vsub.f32 %v1391_v52, %v1395_v55 }
 0xa5c   : > { %v1397_v58 = vmul.f32 1.442695, %v1396_v56  ;;  %v1400_v5 = vmul.f32 1.442695, %v1399_v48 }
 0xa5e   : > { %3522 = vpow2.f32 %v1397_v58 }
 0xa5f   : > { %v1537_v59 = vpop.xlane.xlu2 %1536  ;;  %v1654_v4 = vpop.xlane.xlu1 %1653 }
 0xa60   : > { %v1538_v60 = vmax.f32 %v1537_v59, %v1534_v53  ;;  %v1655_v7 = vmul.f32 0.35355338, %v1654_v4 }
 0xa62   : > { %v1539_v61 = vsub.f32 %v1527_v43, %v1538_v60  ;;  %v1542_v11 = vsub.f32 %v1534_v53, %v1538_v60 }
 0xa64   : > { %v3523_v62 = vpop.eup %3522  ;;  %v1540_v63 = vmul.f32 1.442695, %v1539_v61  ;;  %v1543_v15 = vmul.f32 1.442695, %v1542_v11 }
 0xa65   : > { %v1402_v0 = vsel %vm754_vm5, %v3523_v62, 0.0 }
 0xa66   : > { %3524 = vpow2.f32 %v1540_v63  ;;  %1403 = vadd.xlane.f32.xlu2 %v1402_v0 }
 0xa67   : > { %v1408_v1 = vpop.permute.xlu2 %1407  ;;  %3526 = vpow2.f32 %v1400_v5 }
 0xa68   : > { %1432 = vmatpush.msrb.mxu3 %v1408_v1 }
 0xa69   : > { %3331 = vmatmul.msk.f32.vlgmr.msrb.gmra.mxu3 %vm754_vm5, %v3523_v62 }
 0xa6c   : > { %v3525_v2 = vpop.eup %3524 }
 0xa6d   : > { %v1545_v3 = vsel %vm754_vm5, %v3525_v2, 0.0  ;;  %v3527_v16 = vpop.eup %3526 }
 0xa6e   : > { %1546 = vadd.xlane.f32.xlu1 %v1545_v3  ;;  %v1406_v17 = vmul.f32 %v3527_v16, %v4037_v21 }
 0xa72   : > { %v1658_v9 = vpop.xlane.xlu0 %1657 }
 0xa73   : > { %v1659_v10 = vmax.f32 %v1658_v9, %v1655_v7 }
 0xa75   : > { %v1660_v12 = vsub.f32 %v1648_v49, %v1659_v10  ;;  %v1663_v23 = vsub.f32 %v1655_v7, %v1659_v10 }
 0xa77   : > { %v1661_v13 = vmul.f32 1.442695, %v1660_v12  ;;  %v1551_v14 = vpop.permute.xlu1 %1550  ;;  %v1664_v25 = vmul.f32 1.442695, %v1663_v23 }
 0xa78   : > { %1575 = vmatpush.msra.mxu3 %v1551_v14 }
 0xa79   : > { %3528 = vpow2.f32 %v1661_v13  ;;  %3336 = vmatmul.msk.f32.vlgmr.msra.gmra.mxu3 %vm754_vm5, %v3525_v2 }
 0xa7a   : > { %3530 = vpow2.f32 %v1543_v15  ;;  %1734 = vmatpush.msrb.mxu3 %v1253_v42 }
 0xa7b   : > { %3532 = vpow2.f32 %v1664_v25 }
 0xa7e   : > { %1411 = vrot.lane.b32.xlu2 %v1406_v17, %s4580_s29  ;;  %v1744_v17 = vld [vmem:[%s4588_s11 + $0x18] sm:$0xff] }
 0xa7f   : > { %v3529_v18 = vpop.eup %3528 }
 0xa80   : > { %v1666_v20 = vsel %vm754_vm5, %v3529_v18, 0.0  ;;  %v3531_v22 = vpop.eup %3530 }
 0xa81   : > { %1667 = vadd.xlane.f32.xlu0 %v1666_v20  ;;  %v1549_v6 = vmul.f32 %v3531_v22, %v4037_v21  ;;  %v3533_v30 = vpop.eup %3532  ;;  %v1742_v20 = vld [vmem:[%s4588_s11 + $0x8] sm:$0xff] }
 0xa82   : > { %v1670_v26 = vmul.f32 %v3533_v30, %v4037_v21 }
 0xa85   : > { %v1672_v24 = vpop.permute.xlu0 %1671 }
 0xa86   : > { %1696 = vmatpush.msra.mxu1 %v1672_v24 }
 0xa87   : > { %3340 = vmatmul.msk.f32.vlgmr.msra.gmra.mxu1 %vm754_vm5, %v3529_v18  ;;  %1554 = vrot.lane.b32.xlu1 %v1549_v6, %s4582_s1  ;;  %v1743_v18 = vld [vmem:[%s4588_s11 + $0x10] sm:$0xff] }
 0xa95   : > { %1675 = vrot.lane.b32.xlu0 %v1670_v26, %s4581_s28 }
 0xad9   : > { %v1404_v28 = vpop.xlane.xlu2 %1403 }
 0xada   : > { %v1405_v29 = vadd.f32 %v3527_v16, %v1404_v28 }
 0xadc   : > { %3534 = vrcp.f32 %v1405_v29  ;;  %v1448_v38 = vand.u32 2147483648, %v1405_v29  ;;  %vm1442_vm1 = vweird.f32 %v1405_v29  ;;  %v1446_v40 = vand.u32 2147483647, %v1405_v29 }
 0xade   : > { %v1449_v35 = vor.u32 1.1754944e-38, %v1448_v38  ;;  %vm1447_vm3 = vcmp.eq.f32.partialorder %v1446_v40, 8.507059e+37 }
 0xae1   : > { %v1547_v32 = vpop.xlane.xlu1 %1546  ;;  %v1412_v45 = vpop.permute.xlu2 %1411 }
 0xae2   : > { %v3535_v33 = vpop.eup %3534  ;;  %v1548_v34 = vadd.f32 %v3531_v22, %v1547_v32  ;;  %v1741_v22 = vld [vmem:[%s4588_s11] sm:$0xff] }
 0xae3   : > { %v1438_v36 = vmul.f32 %v3535_v33, %v1405_v29  ;;  %vm1443_vm15 = vweird.f32 %v3535_v33 }
 0xae4   : > { %3536 = vrcp.f32 %v1548_v34  ;;  %vm1444_vm2 = vmor %vm1442_vm1, %vm1443_vm15  ;;  %v1591_v58 = vand.u32 2147483648, %v1548_v34  ;;  %vm1585_vm6 = vweird.f32 %v1548_v34  ;;  %v1589_v53 = vand.u32 2147483647, %v1548_v34 }
 0xae5   : > { %v1439_v21 = vsub.f32 1.0, %v1438_v36 }
 0xae6   : > { %v1592_v62 = vor.u32 1.1754944e-38, %v1591_v58  ;;  %vm1590_vm8 = vcmp.eq.f32.partialorder %v1589_v53, 8.507059e+37 }
 0xae7   : > { %v1440_v37 = vmul.f32 %v3535_v33, %v1439_v21 }
 0xae9   : > { %v1441_v39 = vadd.f32 %v3535_v33, %v1440_v37 }
 0xaea   : > { %v3537_v41 = vpop.eup %3536 }
 0xaeb   : > { %v1581_v43 = vmul.f32 %v3537_v41, %v1548_v34  ;;  %v1445_v44 = vsel %vm1444_vm2, %v3535_v33, %v1441_v39  ;;  %vm1586_vm4 = vweird.f32 %v3537_v41 }
 0xaec   : > { %v1434_v47 = vpop.f32.mrf.mxu3  ;;  %v1450_v50 = vsel %vm1447_vm3, %v1449_v35, %v1445_v44  ;;  %vm1587_vm7 = vmor %vm1585_vm6, %vm1586_vm4 }
 0xaed   : > { %v1435_v49 = vadd.f32 %v1434_v47, %v1412_v45  ;;  %v1582_v51 = vsub.f32 1.0, %v1581_v43 }
 0xaef   : > { %v1451_v52 = vmul.f32 %v1450_v50, %v1435_v49  ;;  %v1583_v54 = vmul.f32 %v3537_v41, %v1582_v51 }
 0xaf1   : > { %3332 = vmatmul.msk.f32.vlgmr.msrb.gmra.mxu0 %vm754_vm5, %v1451_v52  ;;  %v1584_v57 = vadd.f32 %v3537_v41, %v1583_v54 }
 0xaf2   : > { %1760 = vmatpush.msrb.mxu0 %v1744_v17  ;;  %v1849_v17 = vld [vmem:[%s4510_s13 + $0x48] sm:$0xff] }
 0xaf3   : > { %v1588_v59 = vsel %vm1587_vm7, %v3537_v41, %v1584_v57 }
 0xaf4   : > { %v1668_v55 = vpop.xlane.xlu0 %1667  ;;  %v1593_v48 = vsel %vm1590_vm8, %v1592_v62, %v1588_v59  ;;  %1761 = vmatpush.msrb.mxu0 %v1743_v18  ;;  %v1848_v18 = vld [vmem:[%s4510_s13 + $0x40] sm:$0xff] }
 0xaf5   : > { %v1669_v56 = vadd.f32 %v3533_v30, %v1668_v55 }
 0xaf6   : > { %1762 = vmatpush.msrb.mxu0 %v1742_v20  ;;  %v1847_v20 = vld [vmem:[%s4510_s13 + $0x38] sm:$0xff] }
 0xaf7   : > { %3538 = vrcp.f32 %v1669_v56  ;;  %v1712_v5 = vand.u32 2147483648, %v1669_v56  ;;  %vm1706_vm10 = vweird.f32 %v1669_v56  ;;  %v1710_v9 = vand.u32 2147483647, %v1669_v56 }
 0xaf8   : > { %1763 = vmatpush.msrb.mxu0 %v1741_v22  ;;  %v1846_v22 = vld [vmem:[%s4510_s13 + $0x30] sm:$0xff] }
 0xaf9   : > { %v1555_v60 = vpop.permute.xlu1 %1554  ;;  %v1713_v12 = vor.u32 1.1754944e-38, %v1712_v5  ;;  %vm1711_vm12 = vcmp.eq.f32.partialorder %v1710_v9, 8.507059e+37 }
 0xafc   : > { %v1577_v61 = vpop.f32.mrf.mxu3 }
 0xafd   : > { %v3539_v63 = vpop.eup %3538  ;;  %v1578_v0 = vadd.f32 %v1577_v61, %v1555_v60 }
 0xafe   : > { %v1702_v1 = vmul.f32 %v3539_v63, %v1669_v56  ;;  %vm1707_vm9 = vweird.f32 %v3539_v63 }
 0xaff   : > { %v1594_v2 = vmul.f32 %v1593_v48, %v1578_v0  ;;  %vm1708_vm11 = vmor %vm1706_vm10, %vm1707_vm9  ;;  %v1855_v0 = vld [vmem:[%s4510_s13 + $0x78] sm:$0xff]  ;;  %v1853_v48 = vld [vmem:[%s4510_s13 + $0x68] sm:$0xff] }
 0xb00   : > { %v1703_v3 = vsub.f32 1.0, %v1702_v1  ;;  %v1854_v1 = vld [vmem:[%s4510_s13 + $0x70] sm:$0xff]  ;;  %1856 = vmatpush.msrb.mxu2 %v1855_v0 }
 0xb01   : > { %3337 = vmatmul.msk.f32.vlgmr.msra.gmra.mxu0 %vm754_vm5, %v1594_v2 }
 0xb02   : > { %v1704_v4 = vmul.f32 %v3539_v63, %v1703_v3  ;;  %1857 = vmatpush.msrb.mxu2 %v1854_v1 }
 0xb04   : > { %v1705_v7 = vadd.f32 %v3539_v63, %v1704_v4  ;;  %v1698_v11 = vpop.f32.mrf.mxu1  ;;  %1858 = vmatpush.msrb.mxu2 %v1853_v48 }
 0xb06   : > { %v1709_v10 = vsel %vm1708_vm11, %v3539_v63, %v1705_v7  ;;  %v3683_v63 = vmov 128.0  }
 0xb07   : > { %v1676_v13 = vpop.permute.xlu0 %1675  ;;  %v1714_v15 = vsel %vm1711_vm12, %v1713_v12, %v1709_v10 }
 0xb08   : > { %v1699_v14 = vadd.f32 %v1698_v11, %v1676_v13 }
 0xb0a   : > { %v1715_v16 = vmul.f32 %v1714_v15, %v1699_v14  ;;  %v1852_v14 = vld [vmem:[%s4510_s13 + $0x60] sm:$0xff]  ;;  %v1851_v15 = vld [vmem:[%s4510_s13 + $0x58] sm:$0xff] }
 0xb0b   : > { %1859 = vmatpush.msrb.mxu2 %v1852_v14 }
 0xb0c   : > { %3341 = vmatmul.msk.f32.vlgmr.msrb.gmra.mxu3 %vm754_vm5, %v1715_v16  ;;  %v1850_v16 = vld [vmem:[%s4510_s13 + $0x50] sm:$0xff] }
 0xb0d   : > { %1860 = vmatpush.msrb.mxu2 %v1851_v15 }
 0xb0f   : > { %1861 = vmatpush.msrb.mxu2 %v1850_v16 }
 0xb11   : > { %1862 = vmatpush.msrb.mxu2 %v1849_v17 }
 0xb13   : > { %1863 = vmatpush.msrb.mxu2 %v1848_v18  ;;  %v3487_v18 = vld [vmem:[%s4511_s14] ss:$0 sm:$0xff] }
 0xb15   : > { %1864 = vmatpush.msrb.mxu2 %v1847_v20 }
 0xb17   : > { %1865 = vmatpush.msrb.mxu2 %v1846_v22 }
 0xb6e   : > { %v1472_v23 = vpop.f32.mrf.mxu0 }
 0xb6f   : > { %v1496_v6 = vadd.f32 %v4049_v46, %v1472_v23  ;;  %v1845_v23 = vld [vmem:[%s4510_s13 + $0x28] sm:$0xff] }
 0xb70   : > { %1866 = vmatpush.msrb.mxu2 %v1845_v23 }
 0xb7e   : > { %v1615_v24 = vpop.f32.mrf.mxu0 }
 0xb7f   : > { %v1618_v25 = vadd.f32 %v1615_v24, %v1496_v6  ;;  %v1844_v24 = vld [vmem:[%s4510_s13 + $0x20] sm:$0xff]  ;;  %v1843_v6 = vld [vmem:[%s4510_s13 + $0x18] sm:$0xff] }
 0xb80   : > { %1867 = vmatpush.msrb.mxu2 %v1844_v24 }
 0xb82   : > { %1868 = vmatpush.msrb.mxu2 %v1843_v6 }
 0xb8f   : > { %v1736_v30 = vpop.f32.mrf.mxu3 }
 0xb90   : > { %v1739_v26 = vadd.f32 %v1736_v30, %v1618_v25  ;;  %v1842_v25 = vld [vmem:[%s4510_s13 + $0x10] sm:$0xff]  ;;  %v1841_v30 = vld [vmem:[%s4510_s13 + $0x8] sm:$0xff] }
 0xb91   : > { %1869 = vmatpush.msrb.mxu2 %v1842_v25 }
 0xb92   : > { %v4097_v27 = vadd.f32 %v1739_v26, %v3952_v19  ;;  %v1840_v26 = vld [vmem:[%s4510_s13] sm:$0xff] }
 0xb93   : > { %1870 = vmatpush.msrb.mxu2 %v1841_v30 }
 0xb94   : > { %3342 = vmatmul.msk.f32.vlgmr.msrb.gmra.mxu0 %vm686_vm0, %v4097_v27 }
 0xb95   : > { %1871 = vmatpush.msrb.mxu2 %v1840_v26 }
 0xc11   : > { %v1765_v28 = vpop.f32.mrf.mxu0 }
 0xc12   : > { %v1769_v29 = vmul.f32 0.70710677, %v1765_v28  ;;  %v1768_v60 = vmul.f32 0.5, %v1765_v28 }
 0xc14   : > { %v1770_v31 = vand.u32 2147483647, %v1769_v29  ;;  %vm1803_vm2 = vcmp.ge.f32.partialorder %v1769_v29, 0.0 }
 0xc16   : > { %v1771_v32 = vmul.f32 0.3275911, %v1770_v31  ;;  %v1797_v41 = vsub.f32 0.0, %v1770_v31 }
 0xc18   : > { %v1772_v33 = vadd.f32 1.0, %v1771_v32  ;;  %v1798_v45 = vmul.f32 %v1797_v41, %v1770_v31 }
 0xc1a   : > { %3540 = vrcp.f32 %v1772_v33  ;;  %v1784_v37 = vand.u32 2147483648, %v1772_v33  ;;  %v1782_v38 = vand.u32 2147483647, %v1772_v33  ;;  %vm1778_vm14 = vweird.f32 %v1772_v33 }
 0xc1b   : > { %v1799_v49 = vmul.f32 1.442695, %v1798_v45 }
 0xc1c   : > { %v1785_v19 = vor.u32 1.1754944e-38, %v1784_v37  ;;  %vm1783_vm1 = vcmp.eq.f32.partialorder %v1782_v38, 8.507059e+37 }
 0xc1d   : > { %3542 = vpow2.f32 %v1799_v49 }
 0xc1e   : > { %3544 = vrcp.f32 %v3683_v63 }
 0xc20   : > { %v3541_v34 = vpop.eup %3540 }
 0xc21   : > { %v1774_v36 = vmul.f32 %v3541_v34, %v1772_v33  ;;  %vm1779_vm13 = vweird.f32 %v3541_v34 }
 0xc22   : > { %vm1780_vm15 = vmor %vm1778_vm14, %vm1779_vm13 }
 0xc23   : > { %v1775_v21 = vsub.f32 1.0, %v1774_v36  ;;  %v3543_v56 = vpop.eup %3542 }
 0xc24   : > { %v3545_v2 = vpop.eup %3544 }
 0xc25   : > { %v1776_v46 = vmul.f32 %v3541_v34, %v1775_v21  ;;  %v1812_v3 = vmul.f32 128.0, %v3545_v2  ;;  %vm1816_vm3 = vweird.f32 %v3545_v2 }
 0xc27   : > { %v1777_v39 = vadd.f32 %v3541_v34, %v1776_v46  ;;  %v1813_v4 = vsub.f32 1.0, %v1812_v3  ;;  %v3485_v46 = vld [vmem:[%s4509_s12] ss:$0 sm:$0xff]  ;;  %v3345_v3 = vld [vmem:[%s4578_s3 + $0x30] sm:$0xff] }
 0xc29   : > { %v1781_v40 = vsel %vm1780_vm15, %v3541_v34, %v1777_v39  ;;  %v1814_v5 = vmul.f32 %v3545_v2, %v1813_v4  ;;  %v3344_v4 = vld [vmem:[%s4578_s3 + $0x28] sm:$0xff] }
 0xc2a   : > { %v1786_v42 = vsel %vm1783_vm1, %v1785_v19, %v1781_v40 }
 0xc2b   : > { %v1788_v43 = vmul.f32 1.0614054, %v1786_v42  ;;  %v1815_v7 = vadd.f32 %v3545_v2, %v1814_v5  ;;  %v3343_v5 = vld [vmem:[%s4578_s3 + $0x20] sm:$0xff] }
 0xc2d   : > { %v1789_v44 = vadd.f32 -1.4531521, %v1788_v43  ;;  %v4110_v9 = vsel %vm1816_vm3, %v3545_v2, %v1815_v7  ;;  %v3346_v2 = vld [vmem:[%s4578_s3 + $0x38] sm:$0xff] }
 0xc2e   : > { %1950 = vmatpush.msrb.mxu1 %v3346_v2 }
 0xc2f   : > { %v1790_v47 = vmul.f32 %v1789_v44, %v1786_v42 }
 0xc30   : > { %1951 = vmatpush.msrb.mxu1 %v3345_v3 }
 0xc31   : > { %v1791_v35 = vadd.f32 1.4214138, %v1790_v47 }
 0xc32   : > { %1952 = vmatpush.msrb.mxu1 %v3344_v4 }
 0xc33   : > { %v1792_v50 = vmul.f32 %v1791_v35, %v1786_v42 }
 0xc34   : > { %1953 = vmatpush.msrb.mxu1 %v3343_v5 }
 0xc35   : > { %v1793_v51 = vadd.f32 -0.28449672, %v1792_v50 }
 0xc37   : > { %v1794_v52 = vmul.f32 %v1793_v51, %v1786_v42 }
 0xc39   : > { %v1795_v54 = vadd.f32 0.2548296, %v1794_v52 }
 0xc3b   : > { %v1796_v55 = vmul.f32 %v1795_v54, %v1786_v42 }
 0xc3d   : > { %v1801_v57 = vmul.f32 %v3543_v56, %v1796_v55 }
 0xc3f   : > { %v1802_v58 = vsub.f32 1.0, %v1801_v57 }
 0xc41   : > { %v1804_v53 = vsub.f32 0.0, %v1802_v58 }
 0xc43   : > { %v1805_v59 = vsel %vm1803_vm2, %v1802_v58, %v1804_v53  ;;  %v3486_v58 = vld [vmem:[%s4513_s16] ss:$0 sm:$0xff] }
 0xc44   : > { %v1806_v61 = vadd.f32 1.0, %v1805_v59 }
 0xc46   : > { %v1807_v62 = vmul.f32 %v1806_v61, %v1768_v60 }
 0xc48   : > { %1809 = vadd.xlane.f32.xlu0 %v1807_v62 }
 0xcbb   : > { %v1810_v10 = vpop.xlane.xlu0 %1809 }
 0xcbc   : > { %v1818_v11 = vmul.f32 %v4110_v9, %v1810_v10 }
 0xcbe   : > { %v1819_v12 = vsub.f32 %v1807_v62, %v1818_v11 }
 0xcc0   : > { %v1820_v13 = vmul.f32 %v1819_v12, %v1819_v12 }
 0xcc2   : > { %1821 = vadd.xlane.f32.xlu2 %v1820_v13 }
 0xd35   : > { %v1822_v28 = vpop.xlane.xlu2 %1821 }
 0xd36   : > { %v1823_v29 = vmul.f32 %v1822_v28, %v4110_v9 }
 0xd38   : > { %v1824_v31 = vadd.f32 1e-05, %v1823_v29 }
 0xd3a   : > { %3546 = vrsqrt.f32 %v1824_v31  ;;  %vm1831_vm6 = vweird.f32 %v1824_v31 }
 0xd40   : > { %v3547_v32 = vpop.eup %3546 }
 0xd41   : > { %v1826_v33 = vmul.f32 %v3547_v32, %v1824_v31  ;;  %vm1832_vm4 = vweird.f32 %v3547_v32 }
 0xd42   : > { %vm1833_vm7 = vmor %vm1831_vm6, %vm1832_vm4 }
 0xd43   : > { %v1827_v34 = vmul.f32 %v3547_v32, %v1826_v33  ;;  %v3604_v33 = vld [vmem:[%s3844_s27] ss:$0 sm:$0xff]  ;;  %s4591_s27 = smov 48  }
 0xd45   : > { %v1828_v36 = vmul.f32 0.5, %v1827_v34 }
 0xd47   : > { %v1829_v21 = vsub.f32 1.5, %v1828_v36 }
 0xd49   : > { %v1830_v37 = vmul.f32 %v3547_v32, %v1829_v21 }
 0xd4b   : > { %v1834_v38 = vsel %vm1833_vm7, %v3547_v32, %v1830_v37 }
 0xd4c   : > { %v1835_v39 = vmul.f32 %v1834_v38, %v1819_v12 }
 0xd4e   : > { %v1839_v19 = vmul.f32 %v3485_v46, %v1835_v39 }
 0xd50   : > { %1872 = vmatmul.f32.vlgmr.msrb.gmra.mxu2 %v1839_v19 }
 0xdd3   : > { %v1873_v40 = vpop.f32.mrf.mxu2 }
 0xdd4   : > { %v1874_v41 = vadd.f32 %v1873_v40, %v4097_v27 }
 0xdd6   : > { %v1877_v42 = vsel %vm686_vm0, %v1874_v41, 0.0 }
 0xdd7   : > { %1878 = vadd.xlane.f32.xlu1 %v1877_v42 }
 0xe4a   : > { %v1879_v43 = vpop.xlane.xlu1 %1878 }
 0xe4b   : > { %v1880_v44 = vmul.f32 %v1879_v43, %v3856_v8 }
 0xe4d   : > { %v1881_v45 = vsub.f32 %v1874_v41, %v1880_v44 }
 0xe4f   : > { %v1882_v47 = vmul.f32 %v1881_v45, %v1881_v45 }
 0xe51   : > { %v1883_v35 = vsel %vm686_vm0, %v1882_v47, 0.0 }
 0xe52   : > { %1884 = vadd.xlane.f32.xlu2 %v1883_v35 }
 0xec5   : > { %v1885_v49 = vpop.xlane.xlu2 %1884 }
 0xec6   : > { %v1886_v50 = vmul.f32 %v1885_v49, %v3856_v8 }
 0xec8   : > { %v1887_v51 = vadd.f32 1e-05, %v1886_v50 }
 0xeca   : > { %3548 = vrsqrt.f32 %v1887_v51  ;;  %vm1894_vm9 = vweird.f32 %v1887_v51 }
 0xed0   : > { %v3549_v52 = vpop.eup %3548 }
 0xed1   : > { %v1889_v54 = vmul.f32 %v3549_v52, %v1887_v51  ;;  %vm1895_vm8 = vweird.f32 %v3549_v52 }
 0xed2   : > { %vm1896_vm10 = vmor %vm1894_vm9, %vm1895_vm8 }
 0xed3   : > { %v1890_v55 = vmul.f32 %v3549_v52, %v1889_v54 }
 0xed5   : > { %v1891_v27 = vmul.f32 0.5, %v1890_v55 }
 0xed7   : > { %v1892_v56 = vsub.f32 1.5, %v1891_v27 }
 0xed9   : > { %v1893_v57 = vmul.f32 %v3549_v52, %v1892_v56  ;;  %v3349_v56 = vld [vmem:[%s4502_s5 + $0x28] sm:$0xff] }
 0xedb   : > { %v1897_v53 = vsel %vm1896_vm10, %v3549_v52, %v1893_v57 }
 0xedc   : > { %v1898_v59 = vmul.f32 %v1897_v53, %v1881_v45 }
 0xede   : > { %v1902_v60 = vmul.f32 %v3486_v58, %v1898_v59 }
 0xee0   : > { %v1904_v61 = vsel %vm686_vm0, %v1902_v60, 0.0 }
 0xee1   : > { %1905 = vadd.xlane.f32.xlu0 %v1904_v61 }
 0xf54   : > { %v1906_v62 = vpop.xlane.xlu0 %1905 }
 0xf55   : > { %v1907_v63 = vmul.f32 %v1906_v62, %v3856_v8 }
 0xf57   : > { %v1908_v0 = vsub.f32 %v1902_v60, %v1907_v63 }
 0xf59   : > { %v1909_v1 = vmul.f32 %v1908_v0, %v1908_v0 }
 0xf5b   : > { %v1910_v48 = vsel %vm686_vm0, %v1909_v1, 0.0 }
 0xf5c   : > { %1911 = vadd.xlane.f32.xlu2 %v1910_v48 }
 0xfcf   : > { %v1912_v7 = vpop.xlane.xlu2 %1911 }
 0xfd0   : > { %v1913_v10 = vmul.f32 %v1912_v7, %v3856_v8 }
 0xfd2   : > { %v1914_v11 = vadd.f32 1e-05, %v1913_v10 }
 0xfd4   : > { %3550 = vrsqrt.f32 %v1914_v11  ;;  %vm1921_vm12 = vweird.f32 %v1914_v11 }
 0xfda   : > { %v3551_v12 = vpop.eup %3550 }
 0xfdb   : > { %v1916_v13 = vmul.f32 %v3551_v12, %v1914_v11  ;;  %vm1922_vm11 = vweird.f32 %v3551_v12 }
 0xfdc   : > { %vm1923_vm13 = vmor %vm1921_vm12, %vm1922_vm11 }
 0xfdd   : > { %v1917_v14 = vmul.f32 %v3551_v12, %v1916_v13 }
 0xfdf   : > { %v1918_v15 = vmul.f32 0.5, %v1917_v14 }
 0xfe1   : > { %v1919_v16 = vsub.f32 1.5, %v1918_v15 }
 0xfe3   : > { %v1920_v17 = vmul.f32 %v3551_v12, %v1919_v16 }
 0xfe5   : > { %v1924_v20 = vsel %vm1923_vm13, %v3551_v12, %v1920_v17 }
 0xfe6   : > { %v1925_v22 = vmul.f32 %v1924_v20, %v1908_v0 }
 0xfe8   : > { %v4183_v23 = vmul.f32 %v3487_v18, %v1925_v22 }
 0xfea   : > { %3347 = vmatmul.msk.f32.vlgmr.msrb.gmra.mxu1 %vm686_vm0, %v4183_v23 }
0x1067   : > { %v1955_v24 = vpop.f32.mrf.mxu1 }
0x1068   : > { %2042 = vrot.lane.b32.xlu1 %v1955_v24, %s4580_s29  ;;  %2044 = vrot.lane.b32.xlu0 %v1955_v24, %s4585_s30 }
0x1070   : > { %2170 = vrot.lane.b32.xlu1 %v1955_v24, %s4586_s24  ;;  %2078 = vrot.lane.b32.xlu0 %v1955_v24, %s4589_s25  ;;  %s4593_s25 = sld [smem:[#allocation20_spill]] }
0x1078   : > { %2274 = vrot.lane.b32.xlu1 %v1955_v24, %s4587_s4  ;;  %2168 = vrot.lane.b32.xlu0 %v1955_v24, %s4582_s1 }
0x1080   : > { %2272 = vrot.lane.b32.xlu0 %v1955_v24, %s4581_s28 }
0x1088   : > { %1998 = vrot.lane.b32.xlu0 %v1955_v24, %s4590_s26 }
0x10da   : > { %v2045_v6 = vpop.permute.xlu0 %2044  ;;  %v2043_v25 = vpop.permute.xlu1 %2042 }
0x10db   : > { %3355 = vmatpush.xpose.msk.msra.mxu1 %vm754_vm5, %v2045_v6 }
0x10de   : > { %3356 = vmatmul.msk.f32.vlgmr.msra.gmra.mxu1 %vm754_vm5, %v2043_v25  ;;  %v3348_v25 = vld [vmem:[%s4502_s5 + $0x20] sm:$0xff] }
0x10df   : > { %2163 = vmatpush.msrb.mxu1 %v3348_v25  ;;  %v3370_v25 = vld [vmem:[%s4503_s6 + $0x30] sm:$0xff] }
0x10e2   : > { %v2079_v30 = vpop.permute.xlu0 %2078  ;;  %v2171_v39 = vpop.permute.xlu1 %2170 }
0x10ea   : > { %v2169_v26 = vpop.permute.xlu0 %2168  ;;  %v2275_v41 = vpop.permute.xlu1 %2274 }
0x10f2   : > { %v2273_v28 = vpop.permute.xlu0 %2272 }
0x10fa   : > { %v1999_v29 = vpop.permute.xlu0 %1998 }
0x10fb   : > { %2019 = vmatpush.msra.mxu0 %v1999_v29 }
0x10fd   : > { %2140 = vmatpush.msrb.mxu0 %v3349_v56 }
0x115b   : > { %v2067_v31 = vpop.f32.mrf.mxu1 }
0x115c   : > { %v2070_v32 = vmul.f32 0.35355338, %v2067_v31 }
0x115e   : > { %v2071_v34 = vadd.f32 %v3604_v33, %v2070_v32  ;;  %v3351_v32 = vld [vmem:[%s4502_s5 + $0x38] sm:$0xff] }
0x115f   : > { %2370 = vmatpush.msra.mxu2 %v3351_v32 }
0x1160   : > { %v2072_v36 = vsel %vm754_vm5, %v2071_v34, -inf }
0x1161   : > { %2073 = vmax.xlane.f32.xlu2 %v2072_v36 }
0x1179   : > { %1964 = vrot.lane.b32.xlu2 %v1955_v24, %s4583_s21 }
0x11d4   : > { %v2074_v21 = vpop.xlane.xlu2 %2073 }
0x11d5   : > { %v2075_v37 = vsub.f32 %v2071_v34, %v2074_v21 }
0x11d7   : > { %v2076_v46 = vmul.f32 1.442695, %v2075_v37 }
0x11d9   : > { %3552 = vpow2.f32 %v2076_v46 }
0x11dc   : > { %v1965_v38 = vpop.permute.xlu2 %1964 }
0x11dd   : > { %3352 = vmatpush.xpose.msk.msra.mxu3 %vm754_vm5, %v1965_v38 }
0x11df   : > { %v3553_v19 = vpop.eup %3552 }
0x11e0   : > { %3353 = vmatmul.msk.f32.vlgmr.msra.gmra.mxu3 %vm754_vm5, %v1955_v24  ;;  %v2104_v40 = vsel %vm754_vm5, %v3553_v19, 0.0 }
0x11e1   : > { %2099 = vmatpush.msrb.mxu3 %v2079_v30  ;;  %2105 = vadd.xlane.f32.xlu1 %v2104_v40 }
0x11e3   : > { %3360 = vmatpush.xpose.msk.msra.mxu3 %vm754_vm5, %v2171_v39 }
0x11e8   : > { %3357 = vmatmul.msk.f32.vlgmr.msrb.gmra.mxu3 %vm754_vm5, %v3553_v19 }
0x11e9   : > { %3364 = vmatpush.xpose.msk.msrb.mxu3 %vm754_vm5, %v2275_v41 }
0x11f0   : > { %3361 = vmatmul.msk.f32.vlgmr.msra.gmra.mxu3 %vm754_vm5, %v2169_v26  ;;  %v3350_v26 = vld [vmem:[%s4502_s5 + $0x30] sm:$0xff] }
0x11f1   : > { %2266 = vmatpush.msra.mxu1 %v3350_v26  ;;  %v3368_v26 = vld [vmem:[%s4503_s6 + $0x20] sm:$0xff] }
0x11f8   : > { %3365 = vmatmul.msk.f32.vlgmr.msrb.gmra.mxu3 %vm754_vm5, %v2273_v28 }
0x11fa   : > { %2204 = vrot.lane.b32.xlu1 %v1955_v24, %s4591_s27 }
0x1254   : > { %v2106_v57 = vpop.xlane.xlu1 %2105 }
0x1255   : > { %3554 = vrcp.f32 %v2106_v57  ;;  %v2118_v48 = vand.u32 2147483648, %v2106_v57  ;;  %vm2112_vm15 = vweird.f32 %v2106_v57  ;;  %v2116_v2 = vand.u32 2147483647, %v2106_v57 }
0x1257   : > { %v2119_v7 = vor.u32 1.1754944e-38, %v2118_v48  ;;  %vm2117_vm2 = vcmp.eq.f32.partialorder %v2116_v2, 8.507059e+37 }
0x125b   : > { %v3555_v58 = vpop.eup %3554 }
0x125c   : > { %v2108_v53 = vmul.f32 %v3555_v58, %v2106_v57  ;;  %vm2113_vm14 = vweird.f32 %v3555_v58 }
0x125d   : > { %vm2114_vm1 = vmor %vm2112_vm15, %vm2113_vm14 }
0x125e   : > { %v2109_v61 = vsub.f32 1.0, %v2108_v53 }
0x1260   : > { %v2110_v63 = vmul.f32 %v3555_v58, %v2109_v61 }
0x1262   : > { %v2111_v0 = vadd.f32 %v3555_v58, %v2110_v63 }
0x1263   : > { %v1987_v42 = vpop.f32.mrf.mxu3 }
0x1264   : > { %v1990_v43 = vmul.f32 0.35355338, %v1987_v42  ;;  %v2115_v5 = vsel %vm2114_vm1, %v3555_v58, %v2111_v0 }
0x1265   : > { %v2120_v11 = vsel %vm2117_vm2, %v2119_v7, %v2115_v5 }
0x1266   : > { %v1991_v44 = vadd.f32 %v3604_v33, %v1990_v43 }
0x1268   : > { %v1992_v45 = vsel %vm754_vm5, %v1991_v44, -inf }
0x1269   : > { %1993 = vmax.xlane.f32.xlu2 %v1992_v45 }
0x126b   : > { %v2101_v47 = vpop.f32.mrf.mxu3 }
0x126c   : > { %v2205_v3 = vpop.permute.xlu1 %2204  ;;  %v2121_v13 = vmul.f32 %v2120_v11, %v2101_v47 }
0x1273   : > { %v2193_v35 = vpop.f32.mrf.mxu3 }
0x1274   : > { %v2196_v49 = vmul.f32 0.35355338, %v2193_v35 }
0x1276   : > { %v2197_v50 = vadd.f32 %v3604_v33, %v2196_v49 }
0x1278   : > { %v2198_v51 = vsel %vm754_vm5, %v2197_v50, -inf }
0x1279   : > { %2199 = vmax.xlane.f32.xlu0 %v2198_v51 }
0x127b   : > { %v2297_v52 = vpop.f32.mrf.mxu3 }
0x127c   : > { %v2300_v54 = vmul.f32 0.35355338, %v2297_v52 }
0x127e   : > { %v2301_v55 = vadd.f32 %v3604_v33, %v2300_v54 }
0x1280   : > { %v2302_v27 = vsel %vm754_vm5, %v2301_v55, -inf }
0x1281   : > { %2303 = vmax.xlane.f32.xlu2 %v2302_v27 }
0x1299   : > { %2308 = vrot.lane.b32.xlu2 %v1955_v24, %s4592_s17  ;;  %s4594_s17 = sld [smem:[#allocation21_spill]] }
0x12dc   : > { %v1994_v59 = vpop.xlane.xlu2 %1993 }
0x12dd   : > { %v1995_v60 = vsub.f32 %v1991_v44, %v1994_v59 }
0x12df   : > { %v1996_v62 = vmul.f32 1.442695, %v1995_v60 }
0x12e1   : > { %3556 = vpow2.f32 %v1996_v62 }
0x12e7   : > { %v3557_v1 = vpop.eup %3556 }
0x12e8   : > { %3354 = vmatmul.msk.f32.vlgmr.msra.gmra.mxu0 %vm754_vm5, %v3557_v1  ;;  %v2024_v4 = vsel %vm754_vm5, %v3557_v1, 0.0 }
0x12e9   : > { %2225 = vmatpush.msra.mxu0 %v2205_v3  ;;  %2025 = vadd.xlane.f32.xlu0 %v2024_v4 }
0x12ec   : > { %v2200_v10 = vpop.xlane.xlu0 %2199 }
0x12ed   : > { %v2201_v12 = vsub.f32 %v2197_v50, %v2200_v10 }
0x12ef   : > { %v2202_v14 = vmul.f32 1.442695, %v2201_v12 }
0x12f0   : > { %3358 = vmatmul.msk.f32.vlgmr.msrb.gmra.mxu0 %vm754_vm5, %v2121_v13 }
0x12f1   : > { %3558 = vpow2.f32 %v2202_v14 }
0x12f4   : > { %v2304_v15 = vpop.xlane.xlu2 %2303 }
0x12f5   : > { %v2305_v16 = vsub.f32 %v2301_v55, %v2304_v15 }
0x12f7   : > { %v3559_v17 = vpop.eup %3558  ;;  %v2306_v18 = vmul.f32 1.442695, %v2305_v16 }
0x12f8   : > { %3362 = vmatmul.msk.f32.vlgmr.msra.gmra.mxu0 %vm754_vm5, %v3559_v17  ;;  %v2230_v20 = vsel %vm754_vm5, %v3559_v17, 0.0 }
0x12f9   : > { %3560 = vpow2.f32 %v2306_v18  ;;  %2231 = vadd.xlane.f32.xlu1 %v2230_v20  ;;  %v3376_v18 = vld [vmem:[%s4504_s7 + $0x38] sm:$0xff]  ;;  %v3374_v20 = vld [vmem:[%s4504_s7 + $0x28] sm:$0xff] }
0x12fa   : > { %2449 = vmatpush.msra.mxu3 %v3376_v18 }
0x12fc   : > { %v2309_v22 = vpop.permute.xlu2 %2308 }
0x12fd   : > { %2329 = vmatpush.msrb.mxu0 %v2309_v22  ;;  %v3373_v22 = vld [vmem:[%s4504_s7 + $0x20] sm:$0xff] }
0x12ff   : > { %v3561_v24 = vpop.eup %3560 }
0x1300   : > { %3366 = vmatmul.msk.f32.vlgmr.msrb.gmra.mxu0 %vm754_vm5, %v3561_v24  ;;  %v2334_v6 = vsel %vm754_vm5, %v3561_v24, 0.0  ;;  %v3605_v24 = vld [vmem:[%s3969_s20] sm:$0xff]  ;;  %s4600_s20 = sld [smem:[#allocation24_spill]] }
0x1301   : > { %2335 = vadd.xlane.f32.xlu0 %v2334_v6  ;;  %v3371_v6 = vld [vmem:[%s4503_s6 + $0x38] sm:$0xff] }
0x135c   : > { %v2026_v30 = vpop.xlane.xlu0 %2025 }
0x135d   : > { %3562 = vrcp.f32 %v2026_v30  ;;  %v2038_v34 = vand.u32 2147483648, %v2026_v30  ;;  %v2036_v21 = vand.u32 2147483647, %v2026_v30  ;;  %vm2032_vm4 = vweird.f32 %v2026_v30 }
0x135f   : > { %v2039_v46 = vor.u32 1.1754944e-38, %v2038_v34  ;;  %vm2037_vm7 = vcmp.eq.f32.partialorder %v2036_v21, 8.507059e+37 }
0x1363   : > { %v3563_v28 = vpop.eup %3562 }
0x1364   : > { %v2028_v29 = vmul.f32 %v3563_v28, %v2026_v30  ;;  %vm2033_vm3 = vweird.f32 %v3563_v28  ;;  %v3369_v30 = vld [vmem:[%s4503_s6 + $0x28] sm:$0xff] }
0x1365   : > { %v2021_v33 = vpop.f32.mrf.mxu0  ;;  %vm2034_vm6 = vmor %vm2032_vm4, %vm2033_vm3 }
0x1366   : > { %v2029_v31 = vsub.f32 1.0, %v2028_v29 }
0x1368   : > { %v2030_v36 = vmul.f32 %v3563_v28, %v2029_v31 }
0x136a   : > { %v2031_v37 = vadd.f32 %v3563_v28, %v2030_v36 }
0x136c   : > { %v2035_v38 = vsel %vm2034_vm6, %v3563_v28, %v2031_v37  ;;  %v2232_v39 = vpop.xlane.xlu1 %2231 }
0x136d   : > { %v2040_v19 = vsel %vm2037_vm7, %v2039_v46, %v2035_v38  ;;  %3564 = vrcp.f32 %v2232_v39  ;;  %v2142_v41 = vpop.f32.mrf.mxu0  ;;  %v2244_v47 = vand.u32 2147483648, %v2232_v39  ;;  %v2242_v49 = vand.u32 2147483647, %v2232_v39  ;;  %v3488_v46 = vld [vmem:[%s4512_s15] ss:$0 sm:$0xff] }
0x136e   : > { %v2041_v40 = vmul.f32 %v2040_v19, %v2021_v33  ;;  %vm2238_vm9 = vweird.f32 %v2232_v39 }
0x136f   : > { %v2245_v54 = vor.u32 1.1754944e-38, %v2244_v47  ;;  %vm2243_vm11 = vcmp.eq.f32.partialorder %v2242_v49, 8.507059e+37  ;;  %v4289_v49 = vld [vmem:[%s3853_s19] ss:$0 sm:$0xff] }
0x1370   : > { %3359 = vmatmul.msk.f32.vlgmr.msrb.gmra.mxu1 %vm754_vm5, %v2041_v40 }
0x1371   : > { %2424 = vmatpush.msrb.mxu1 %v3371_v6 }
0x1373   : > { %v3565_v42 = vpop.eup %3564  ;;  %2425 = vmatpush.msrb.mxu1 %v3370_v25 }
0x1374   : > { %v2234_v43 = vmul.f32 %v3565_v42, %v2232_v39  ;;  %v2336_v44 = vpop.xlane.xlu0 %2335  ;;  %vm2239_vm8 = vweird.f32 %v3565_v42 }
0x1375   : > { %3566 = vrcp.f32 %v2336_v44  ;;  %v2227_v52 = vpop.f32.mrf.mxu0  ;;  %vm2240_vm10 = vmor %vm2238_vm9, %vm2239_vm8  ;;  %v2348_v53 = vand.u32 2147483648, %v2336_v44  ;;  %v2346_v60 = vand.u32 2147483647, %v2336_v44  ;;  %vm2342_vm13 = vweird.f32 %v2336_v44  ;;  %2426 = vmatpush.msrb.mxu1 %v3369_v30 }
0x1376   : > { %v2235_v45 = vsub.f32 1.0, %v2234_v43 }
0x1377   : > { %v2349_v62 = vor.u32 1.1754944e-38, %v2348_v53  ;;  %vm2347_vm15 = vcmp.eq.f32.partialorder %v2346_v60, 8.507059e+37  ;;  %2427 = vmatpush.msrb.mxu1 %v3368_v26 }
0x1378   : > { %v2236_v35 = vmul.f32 %v3565_v42, %v2235_v45 }
0x137a   : > { %v2237_v50 = vadd.f32 %v3565_v42, %v2236_v35 }
0x137b   : > { %v3567_v51 = vpop.eup %3566 }
0x137c   : > { %v2338_v55 = vmul.f32 %v3567_v51, %v2336_v44  ;;  %v2241_v27 = vsel %vm2240_vm10, %v3565_v42, %v2237_v50  ;;  %vm2343_vm12 = vweird.f32 %v3567_v51 }
0x137d   : > { %v2246_v56 = vsel %vm2243_vm11, %v2245_v54, %v2241_v27  ;;  %vm2344_vm14 = vmor %vm2342_vm13, %vm2343_vm12  ;;  %v2331_v0 = vpop.f32.mrf.mxu0 }
0x137e   : > { %v2339_v57 = vsub.f32 1.0, %v2338_v55  ;;  %v2247_v58 = vmul.f32 %v2246_v56, %v2227_v52 }
0x1380   : > { %v2340_v59 = vmul.f32 %v3567_v51, %v2339_v57  ;;  %3363 = vmatmul.msk.f32.vlgmr.msra.gmra.mxu1 %vm754_vm5, %v2247_v58 }
0x1382   : > { %v2341_v61 = vadd.f32 %v3567_v51, %v2340_v59 }
0x1384   : > { %v2345_v63 = vsel %vm2344_vm14, %v3567_v51, %v2341_v61 }
0x1385   : > { %v2350_v1 = vsel %vm2347_vm15, %v2349_v62, %v2345_v63 }
0x1386   : > { %v2351_v48 = vmul.f32 %v2350_v1, %v2331_v0 }
0x1388   : > { %3367 = vmatmul.msk.f32.vlgmr.msra.gmra.mxu2 %vm754_vm5, %v2351_v48 }
0x13ed   : > { %v2165_v2 = vpop.f32.mrf.mxu1 }
0x13ee   : > { %v2166_v4 = vadd.f32 %v2165_v2, %v2142_v41  ;;  %v3489_v41 = vld [vmem:[%s4506_s9 + $0x1] ss:$0 sm:$0xff] }
0x13fd   : > { %v2268_v3 = vpop.f32.mrf.mxu1 }
0x13fe   : > { %v2271_v5 = vadd.f32 %v2268_v3, %v2166_v4  ;;  %v3378_v3 = vld [vmem:[%s4505_s8 + $0x20] sm:$0xff] }
0x140b   : > { %v2372_v7 = vpop.f32.mrf.mxu2 }
0x140c   : > { %v2375_v10 = vadd.f32 %v2372_v7, %v2271_v5 }
0x140e   : > { %v4236_v11 = vadd.f32 %v2375_v10, %v4183_v23  ;;  %v3375_v23 = vld [vmem:[%s4504_s7 + $0x30] sm:$0xff] }
0x140f   : > { %2450 = vmatpush.msra.mxu3 %v3375_v23 }
0x1410   : > { %v2378_v12 = vsel %vm686_vm0, %v4236_v11, 0.0 }
0x1411   : > { %2379 = vadd.xlane.f32.xlu0 %v2378_v12  ;;  %2451 = vmatpush.msra.mxu3 %v3374_v20 }
0x1413   : > { %2452 = vmatpush.msra.mxu3 %v3373_v22 }
0x1414   : > { %3377 = vmatmul.msk.f32.vlgmr.msra.gmra.mxu3 %vm686_vm0, %v3605_v24 }
0x1484   : > { %v2380_v13 = vpop.xlane.xlu0 %2379 }
0x1485   : > { %v2381_v14 = vmul.f32 %v2380_v13, %v3856_v8 }
0x1487   : > { %v2382_v15 = vsub.f32 %v4236_v11, %v2381_v14 }
0x1489   : > { %v2383_v16 = vmul.f32 %v2382_v15, %v2382_v15 }
0x148b   : > { %v2384_v17 = vsel %vm686_vm0, %v2383_v16, 0.0 }
0x148c   : > { %2385 = vadd.xlane.f32.xlu2 %v2384_v17 }
0x1497   : > { %v4274_v40 = vpop.f32.mrf.mxu3 }
0x1498   : > { %3384 = vmatpush.xpose.msk.msra.mxu0 %vm754_vm5, %v4274_v40 }
0x14a4   : > { %2563 = vrot.lane.b32.xlu2 %v4274_v40, %s4580_s29 }
0x14ff   : > { %v2386_v28 = vpop.xlane.xlu2 %2385 }
0x1500   : > { %v2387_v29 = vmul.f32 %v2386_v28, %v3856_v8 }
0x1502   : > { %v2388_v31 = vadd.f32 1e-05, %v2387_v29 }
0x1504   : > { %3568 = vrsqrt.f32 %v2388_v31  ;;  %vm2395_vm2 = vweird.f32 %v2388_v31 }
0x1507   : > { %v2564_v45 = vpop.permute.xlu2 %2563 }
0x1508   : > { %3387 = vmatpush.xpose.msk.msra.mxu1 %vm754_vm5, %v2564_v45 }
0x150a   : > { %v3569_v32 = vpop.eup %3568 }
0x150b   : > { %v2390_v33 = vmul.f32 %v3569_v32, %v2388_v31  ;;  %vm2396_vm1 = vweird.f32 %v3569_v32 }
0x150c   : > { %vm2397_vm3 = vmor %vm2395_vm2, %vm2396_vm1 }
0x150d   : > { %v2391_v34 = vmul.f32 %v3569_v32, %v2390_v33 }
0x150f   : > { %v2392_v36 = vmul.f32 0.5, %v2391_v34 }
0x1511   : > { %v2393_v21 = vsub.f32 1.5, %v2392_v36 }
0x1513   : > { %v2394_v37 = vmul.f32 %v3569_v32, %v2393_v21 }
0x1515   : > { %v2398_v38 = vsel %vm2397_vm3, %v3569_v32, %v2394_v37 }
0x1516   : > { %v2399_v39 = vmul.f32 %v2398_v38, %v2382_v15  ;;  %v4315_v15 = vld [vmem:[%s4593_s25 + $0x1] ss:$0 sm:$0xff] }
0x1518   : > { %v2403_v19 = vmul.f32 %v3488_v46, %v2399_v39 }
0x151a   : > { %3372 = vmatmul.msk.f32.vlgmr.msrb.gmra.mxu1 %vm686_vm0, %v2403_v19 }
0x1597   : > { %v2429_v42 = vpop.f32.mrf.mxu1 }
0x1598   : > { %2705 = vrot.lane.b32.xlu2 %v2429_v42, %s4582_s1  ;;  %3385 = vmatmul.msk.f32.vlgmr.msra.gmra.mxu0 %vm754_vm5, %v2429_v42  ;;  %v2497_v43 = vmul.f32 %v3489_v41, %v2429_v42 }
0x159a   : > { %v2498_v44 = vsel %vm754_vm5, %v2497_v43, 0.0 }
0x159b   : > { %2499 = vadd.xlane.f32.xlu0 %v2498_v44 }
0x15a0   : > { %2856 = vrot.lane.b32.xlu2 %v2497_v43, %s4581_s28 }
0x15f2   : > { %v2706_v0 = vpop.permute.xlu2 %2705 }
0x15fa   : > { %v2857_v34 = vpop.permute.xlu2 %2856 }
0x15fb   : > { %v2859_v21 = vsel %vm754_vm5, %v2857_v34, 0.0 }
0x160e   : > { %v2500_v52 = vpop.xlane.xlu0 %2499 }
0x160f   : > { %v2501_v54 = vmul.f32 0.35355338, %v2500_v52 }
0x1615   : > { %v2489_v47 = vpop.f32.mrf.mxu0 }
0x1616   : > { %v2492_v35 = vmul.f32 0.35355338, %v2489_v47 }
0x1618   : > { %v2493_v50 = vadd.f32 %v4289_v49, %v2492_v35 }
0x161a   : > { %v2502_v51 = vsel %vm754_vm5, %v2493_v50, -inf }
0x161b   : > { %2503 = vmax.xlane.f32.xlu0 %v2502_v51 }
0x162f   : > { %2520 = vrot.lane.b32.xlu0 %v4274_v40, %s4583_s21 }
0x1637   : > { %2561 = vrot.lane.b32.xlu0 %v2429_v42, %s4580_s29 }
0x163f   : > { %2826 = vrot.lane.b32.xlu0 %v2429_v42, %s4581_s28 }
0x1647   : > { %2707 = vrot.lane.b32.xlu0 %v4274_v40, %s4582_s1 }
0x164f   : > { %2592 = vrot.lane.b32.xlu0 %v2497_v43, %s4580_s29 }
0x168e   : > { %v2504_v55 = vpop.xlane.xlu0 %2503 }
0x168f   : > { %v2505_v27 = vmax.f32 %v2504_v55, %v2501_v54 }
0x1691   : > { %v2506_v56 = vsub.f32 %v2493_v50, %v2505_v27  ;;  %v2509_v57 = vsub.f32 %v2501_v54, %v2505_v27 }
0x1693   : > { %v2507_v58 = vmul.f32 1.442695, %v2506_v56  ;;  %v2510_v2 = vmul.f32 1.442695, %v2509_v57 }
0x1695   : > { %3570 = vpow2.f32 %v2507_v58 }
0x1696   : > { %3572 = vpow2.f32 %v2510_v2 }
0x169b   : > { %v3571_v53 = vpop.eup %3570 }
0x169c   : > { %v2512_v59 = vsel %vm754_vm5, %v3571_v53, 0.0  ;;  %v3573_v4 = vpop.eup %3572 }
0x169d   : > { %2513 = vadd.xlane.f32.xlu1 %v2512_v59  ;;  %v2519_v23 = vmul.f32 %v3573_v4, %v4315_v15 }
0x16a1   : > { %v2521_v60 = vpop.permute.xlu0 %2520 }
0x16a2   : > { %2541 = vmatpush.msrb.mxu2 %v2521_v60 }
0x16a3   : > { %3386 = vmatmul.msk.f32.vlgmr.msrb.gmra.mxu2 %vm754_vm5, %v3571_v53 }
0x16a4   : > { %2700 = vmatpush.msra.mxu2 %v3378_v3 }
0x16a9   : > { %v2562_v61 = vpop.permute.xlu0 %2561 }
0x16aa   : > { %3388 = vmatmul.msk.f32.vlgmr.msra.gmra.mxu1 %vm754_vm5, %v2562_v61 }
0x16b1   : > { %v2827_v62 = vpop.permute.xlu0 %2826 }
0x16b6   : > { %2828 = vrot.lane.b32.xlu1 %v4274_v40, %s4581_s28 }
0x16b9   : > { %v2708_v63 = vpop.permute.xlu0 %2707 }
0x16ba   : > { %3392 = vmatpush.xpose.msk.msrb.mxu1 %vm754_vm5, %v2708_v63 }
0x16bd   : > { %3393 = vmatmul.msk.f32.vlgmr.msrb.gmra.mxu1 %vm754_vm5, %v2706_v0 }
0x16be   : > { %2735 = vrot.lane.b32.xlu1 %v2497_v43, %s4582_s1 }
0x16c1   : > { %v2593_v1 = vpop.permute.xlu0 %2592 }
0x16c2   : > { %v2595_v48 = vsel %vm754_vm5, %v2593_v1, 0.0 }
0x16c3   : > { %2596 = vadd.xlane.f32.xlu0 %v2595_v48 }
0x1710   : > { %v2514_v5 = vpop.xlane.xlu1 %2513 }
0x1711   : > { %v2515_v7 = vadd.f32 %v3573_v4, %v2514_v5 }
0x1713   : > { %3574 = vrcp.f32 %v2515_v7  ;;  %v2557_v17 = vand.u32 2147483648, %v2515_v7  ;;  %vm2551_vm6 = vweird.f32 %v2515_v7  ;;  %v2555_v18 = vand.u32 2147483647, %v2515_v7 }
0x1715   : > { %v2558_v24 = vor.u32 1.1754944e-38, %v2557_v17  ;;  %vm2556_vm8 = vcmp.eq.f32.partialorder %v2555_v18, 8.507059e+37 }
0x1719   : > { %v3575_v10 = vpop.eup %3574 }
0x171a   : > { %v2547_v12 = vmul.f32 %v3575_v10, %v2515_v7  ;;  %vm2552_vm4 = vweird.f32 %v3575_v10 }
0x171b   : > { %vm2553_vm7 = vmor %vm2551_vm6, %vm2552_vm4 }
0x171c   : > { %v2548_v13 = vsub.f32 1.0, %v2547_v12 }
0x171e   : > { %v2549_v14 = vmul.f32 %v3575_v10, %v2548_v13 }
0x1720   : > { %v2550_v16 = vadd.f32 %v3575_v10, %v2549_v14 }
0x1722   : > { %v2554_v20 = vsel %vm2553_vm7, %v3575_v10, %v2550_v16  ;;  %v3379_v10 = vld [vmem:[%s4505_s8 + $0x28] sm:$0xff] }
0x1723   : > { %v2559_v30 = vsel %vm2556_vm8, %v2558_v24, %v2554_v20  ;;  %2677 = vmatpush.msrb.mxu0 %v3379_v10 }
0x1726   : > { %v2543_v22 = vpop.f32.mrf.mxu2 }
0x1727   : > { %v2544_v6 = vadd.f32 %v2543_v22, %v2519_v23  ;;  %v2586_v25 = vpop.f32.mrf.mxu1 }
0x1728   : > { %v2589_v26 = vmul.f32 0.35355338, %v2586_v25  ;;  %v2829_v28 = vpop.permute.xlu1 %2828 }
0x1729   : > { %v2560_v29 = vmul.f32 %v2559_v30, %v2544_v6  ;;  %3396 = vmatpush.xpose.msk.msrb.mxu2 %vm754_vm5, %v2829_v28 }
0x172a   : > { %v2590_v31 = vadd.f32 %v4289_v49, %v2589_v26 }
0x172b   : > { %3391 = vmatmul.msk.f32.vlgmr.msra.gmra.mxu2 %vm754_vm5, %v2560_v29 }
0x172c   : > { %v2599_v32 = vsel %vm754_vm5, %v2590_v31, -inf }
0x172d   : > { %2600 = vmax.xlane.f32.xlu1 %v2599_v32 }
0x1730   : > { %v2736_v33 = vpop.permute.xlu1 %2735 }
0x1731   : > { %v2738_v36 = vsel %vm754_vm5, %v2736_v33, 0.0 }
0x1732   : > { %2739 = vadd.xlane.f32.xlu2 %v2738_v36 }
0x1733   : > { %3397 = vmatmul.msk.f32.vlgmr.msrb.gmra.mxu2 %vm754_vm5, %v2827_v62 }
0x1735   : > { %2860 = vadd.xlane.f32.xlu1 %v2859_v21 }
0x1736   : > { %v2597_v19 = vpop.xlane.xlu0 %2596 }
0x1737   : > { %v2598_v41 = vmul.f32 0.35355338, %v2597_v19 }
0x173a   : > { %v2730_v37 = vpop.f32.mrf.mxu1 }
0x173b   : > { %v2733_v46 = vmul.f32 0.35355338, %v2730_v37 }
0x173d   : > { %v2734_v38 = vadd.f32 %v4289_v49, %v2733_v46 }
0x173f   : > { %v2742_v39 = vsel %vm754_vm5, %v2734_v38, -inf }
0x1740   : > { %2743 = vmax.xlane.f32.xlu0 %v2742_v39 }
0x174e   : > { %2757 = vrot.lane.b32.xlu1 %v4274_v40, %s4586_s24 }
0x1754   : > { %2614 = vrot.lane.b32.xlu0 %v4274_v40, %s4585_s30  ;;  %s4597_s30 = sld [smem:[#allocation9_spill]] }
0x175a   : > { %s3424_s27 = sshll.u32 %s4597_s30, 3 }
0x175b   : > { %s3178_s2 = scalar_lea.hbm %s4600_s20, %s3424_s27 }
0x175c   : > { %s3182_s21 = sshll.u32 %s3178_s2, 4  ;;  %s3183_s21 = int_to_ptr.hbm [resolvable:$true] %s3182_s21 }
0x175d   : > { %s3621_s11 = sshra.s32 %s3183_s21, 4  ;;  %s3622_s11 = int_to_ptr.hbm [resolvable:$true] %s3621_s11 }
0x175e   : > { %s3623_s25 = scalar_lea.hbm %s3622_s11, 8  ;;  %p3628_p0 = scmp.lt.s32.totalorder %s3622_s11, %s4600_s20 }
0x175f   : > { %p3624_p11 = scmp.ne.s32.totalorder %s3622_s11, %s3623_s25 }
0x1761   : > { %p3625_p12 = pnand %p3624_p11, %p3827_p5 }
0x1763   : > { %p3626_p13 = pneg %p3625_p12 }
0x17a0   : > { %v2601_v42 = vpop.xlane.xlu1 %2600 }
0x17a1   : > { %v2602_v43 = vmax.f32 %v2601_v42, %v2598_v41 }
0x17a3   : > { %v2603_v44 = vsub.f32 %v2590_v31, %v2602_v43  ;;  %v2606_v52 = vsub.f32 %v2598_v41, %v2602_v43  ;;  %v3381_v41 = vld [vmem:[%s4505_s8 + $0x38] sm:$0xff] }
0x17a5   : > { %v2604_v45 = vmul.f32 1.442695, %v2603_v44  ;;  %v2740_v51 = vpop.xlane.xlu2 %2739  ;;  %v2607_v27 = vmul.f32 1.442695, %v2606_v52  ;;  %v3380_v44 = vld [vmem:[%s4505_s8 + $0x30] sm:$0xff] }
0x17a6   : > { %v2741_v54 = vmul.f32 0.35355338, %v2740_v51  ;;  %2820 = vmatpush.msra.mxu0 %v3380_v44 }
0x17a7   : > { %3576 = vpow2.f32 %v2604_v45 }
0x17a8   : > { %3578 = vpow2.f32 %v2607_v27  ;;  %v2861_v62 = vpop.xlane.xlu1 %2860 }
0x17a9   : > { %v2862_v7 = vmul.f32 0.35355338, %v2861_v62 }
0x17ad   : > { %v3577_v47 = vpop.eup %3576 }
0x17ae   : > { %v4331_v35 = vpop.f32.mrf.mxu2  ;;  %v2609_v50 = vsel %vm754_vm5, %v3577_v47, 0.0  ;;  %v3579_v61 = vpop.eup %3578 }
0x17af   : > { %2610 = vadd.xlane.f32.xlu0 %v2609_v50  ;;  %v2613_v0 = vmul.f32 %v3579_v61, %v4315_v15 }
0x17b3   : > { %v2744_v55 = vpop.xlane.xlu0 %2743 }
0x17b4   : > { %v2745_v56 = vmax.f32 %v2744_v55, %v2741_v54 }
0x17b6   : > { %v2749_v57 = vsub.f32 %v2741_v54, %v2745_v56  ;;  %v2851_v58 = vpop.f32.mrf.mxu2  ;;  %v2746_v63 = vsub.f32 %v2734_v38, %v2745_v56 }
0x17b7   : > { %v2854_v53 = vmul.f32 0.35355338, %v2851_v58 }
0x17b8   : > { %v2747_v1 = vmul.f32 1.442695, %v2746_v63  ;;  %v2750_v31 = vmul.f32 1.442695, %v2749_v57 }
0x17b9   : > { %v2855_v59 = vadd.f32 %v4289_v49, %v2854_v53 }
0x17ba   : > { %3580 = vpow2.f32 %v2747_v1 }
0x17bb   : > { %v2863_v60 = vsel %vm754_vm5, %v2855_v59, -inf }
0x17bc   : > { %2864 = vmax.xlane.f32.xlu2 %v2863_v60 }
0x17c0   : > { %v2758_v2 = vpop.permute.xlu1 %2757  ;;  %v3581_v3 = vpop.eup %3580 }
0x17c1   : > { %v2752_v49 = vsel %vm754_vm5, %v3581_v3, 0.0 }
0x17c3   : > { %2618 = vrot.lane.b32.xlu0 %v2613_v0, %s4580_s29 }
0x17c6   : > { %v2615_v48 = vpop.permute.xlu0 %2614 }
0x17c7   : > { %2639 = vmatpush.msrb.mxu3 %v2615_v48 }
0x17c8   : > { %3389 = vmatmul.msk.f32.vlgmr.msrb.gmra.mxu3 %vm754_vm5, %v3577_v47 }
0x17c9   : > { %2782 = vmatpush.msra.mxu3 %v2758_v2 }
0x17cb   : > { %2941 = vmatpush.msrb.mxu3 %v3381_v41 }
0x17d0   : > { %3394 = vmatmul.msk.f32.vlgmr.msra.gmra.mxu3 %vm754_vm5, %v3581_v3 }
0x17d4   : > { %2878 = vrot.lane.b32.xlu2 %v4274_v40, %s4587_s4 }
0x17fd   : > { %2753 = vadd.xlane.f32.xlu2 %v2752_v49 }
0x1822   : > { %v2611_v4 = vpop.xlane.xlu0 %2610 }
0x1823   : > { %v2612_v5 = vadd.f32 %v3579_v61, %v2611_v4 }
0x1825   : > { %3582 = vrcp.f32 %v2612_v5  ;;  %v2655_v29 = vand.u32 2147483648, %v2612_v5  ;;  %vm2649_vm10 = vweird.f32 %v2612_v5  ;;  %v2653_v32 = vand.u32 2147483647, %v2612_v5 }
0x1827   : > { %v2656_v21 = vor.u32 1.1754944e-38, %v2655_v29  ;;  %vm2654_vm12 = vcmp.eq.f32.partialorder %v2653_v32, 8.507059e+37 }
0x182b   : > { %v3583_v40 = vpop.eup %3582 }
0x182c   : > { %v2645_v20 = vmul.f32 %v3583_v40, %v2612_v5  ;;  %vm2650_vm9 = vweird.f32 %v3583_v40 }
0x182d   : > { %vm2651_vm11 = vmor %vm2649_vm10, %vm2650_vm9 }
0x182e   : > { %v2646_v25 = vsub.f32 1.0, %v2645_v20 }
0x182f   : > { %v2865_v12 = vpop.xlane.xlu2 %2864 }
0x1830   : > { %v2866_v13 = vmax.f32 %v2865_v12, %v2862_v7  ;;  %v2647_v26 = vmul.f32 %v3583_v40, %v2646_v25 }
0x1832   : > { %v2867_v14 = vsub.f32 %v2855_v59, %v2866_v13  ;;  %v2870_v16 = vsub.f32 %v2862_v7, %v2866_v13  ;;  %v2648_v28 = vadd.f32 %v3583_v40, %v2647_v26 }
0x1834   : > { %v2868_v17 = vmul.f32 1.442695, %v2867_v14  ;;  %v2871_v18 = vmul.f32 1.442695, %v2870_v16  ;;  %v2652_v33 = vsel %vm2651_vm11, %v3583_v40, %v2648_v28  ;;  %v3403_v14 = vld [vmem:[%s4594_s17 + $0x38] sm:$0xff]  ;;  %v3402_v16 = vld [vmem:[%s4594_s17 + $0x30] sm:$0xff] }
0x1835   : > { %v2619_v34 = vpop.permute.xlu0 %2618  ;;  %v2657_v46 = vsel %vm2654_vm12, %v2656_v21, %v2652_v33 }
0x1836   : > { %3584 = vpow2.f32 %v2868_v17  ;;  %v3401_v17 = vld [vmem:[%s4594_s17 + $0x28] sm:$0xff] }
0x1837   : > { %3586 = vpow2.f32 %v2871_v18  ;;  %v2879_v23 = vpop.permute.xlu2 %2878  ;;  %v3400_v18 = vld [vmem:[%s4594_s17 + $0x20] sm:$0xff] }
0x1838   : > { %2903 = vmatpush.msra.mxu1 %v2879_v23  ;;  %3588 = vpow2.f32 %v2750_v31 }
0x183c   : > { %v3585_v22 = vpop.eup %3584 }
0x183d   : > { %v3587_v24 = vpop.eup %3586  ;;  %3398 = vmatmul.msk.f32.vlgmr.msra.gmra.mxu1 %vm754_vm5, %v3585_v22  ;;  %v2873_v6 = vsel %vm754_vm5, %v3585_v22, 0.0 }
0x183e   : > { %2874 = vadd.xlane.f32.xlu1 %v2873_v6  ;;  %v2877_v30 = vmul.f32 %v3587_v24, %v4315_v15  ;;  %v3589_v39 = vpop.eup %3588 }
0x183f   : > { %v2756_v19 = vmul.f32 %v3589_v39, %v4315_v15 }
0x1840   : > { %2882 = vrot.lane.b32.xlu2 %v2877_v30, %s4581_s28  ;;  %s654_s28 = sand.u32 1, %s4596_s23  }
0x1841   : > { %s3303_s24 = sshll.u32 %s654_s28, 3  ;;  %s3164_s10 = scalar_lea.sflag [#allocation3], %s654_s28 }
0x1842   : > { %s656_s19 = scalar_lea.vmem [#allocation2], %s3303_s24  ;;  %s3627_s24 = scalar_lea.hbm %s4600_s20, 16 }
0x1843   : > { %s3180_s23 = sshll.u32 %s656_s19, 4  ;;  %p3629_p1 = scmp.lt.s32.totalorder %s3627_s24, %s3623_s25  ;;  %s3181_s23 = int_to_ptr.vmem [resolvable:$true] %s3180_s23 }
0x1845   : > { %p3630_p2 = por %p3629_p1, %p3628_p0 }
0x1847   : > { %p3631_p3 = pnand %p3630_p2, %p3626_p13 }
0x184b   : > { %v2641_v36 = vpop.f32.mrf.mxu3 }
0x184c   : > { %v2642_v37 = vadd.f32 %v2641_v36, %v2619_v34 }
0x184e   : > { %v2658_v38 = vmul.f32 %v2657_v46, %v2642_v37 }
0x1850   : > { %3390 = vmatmul.msk.f32.vlgmr.msrb.gmra.mxu0 %vm754_vm5, %v2658_v38 }
0x1851   : > { %2968 = vmatpush.msrb.mxu0 %v3403_v14  ;;  %v3409_v14 = vld [vmem:[%s4510_s13 + $0x98] sm:$0xff] }
0x1853   : > { %v2784_v4 = vpop.f32.mrf.mxu3  ;;  %2969 = vmatpush.msrb.mxu0 %v3402_v16  ;;  %v3408_v16 = vld [vmem:[%s4510_s13 + $0x90] sm:$0xff] }
0x1855   : > { %2970 = vmatpush.msrb.mxu0 %v3401_v17  ;;  %v3407_v17 = vld [vmem:[%s4510_s13 + $0x88] sm:$0xff] }
0x1857   : > { %2761 = vrot.lane.b32.xlu1 %v2756_v19, %s4582_s1  ;;  %2971 = vmatpush.msrb.mxu0 %v3400_v18  ;;  %v3406_v18 = vld [vmem:[%s4510_s13 + $0x80] sm:$0xff]  ;;  %s4598_s1 = sld [smem:[#allocation22_spill]] }
0x1870   : > { %v2754_v42 = vpop.xlane.xlu2 %2753 }
0x1871   : > { %v2755_v43 = vadd.f32 %v3589_v39, %v2754_v42 }
0x1873   : > { %3590 = vrcp.f32 %v2755_v43  ;;  %v2798_v2 = vand.u32 2147483648, %v2755_v43  ;;  %vm2792_vm3 = vweird.f32 %v2755_v43  ;;  %v2796_v3 = vand.u32 2147483647, %v2755_v43 }
0x1875   : > { %v2799_v7 = vor.u32 1.1754944e-38, %v2798_v2  ;;  %vm2797_vm6 = vcmp.eq.f32.partialorder %v2796_v3, 8.507059e+37  ;;  %v3418_v2 = vld [vmem:[%s4510_s13 + $0xe0] sm:$0xff]  ;;  %v3417_v3 = vld [vmem:[%s4510_s13 + $0xd8] sm:$0xff] }
0x1879   : > { %v3591_v50 = vpop.eup %3590 }
0x187a   : > { %v2788_v15 = vmul.f32 %v3591_v50, %v2755_v43  ;;  %vm2793_vm2 = vweird.f32 %v3591_v50 }
0x187b   : > { %vm2794_vm4 = vmor %vm2792_vm3, %vm2793_vm2 }
0x187c   : > { %v2789_v54 = vsub.f32 1.0, %v2788_v15 }
0x187e   : > { %v2790_v53 = vmul.f32 %v3591_v50, %v2789_v54 }
0x1880   : > { %v2791_v1 = vadd.f32 %v3591_v50, %v2790_v53 }
0x1882   : > { %v2795_v49 = vsel %vm2794_vm4, %v3591_v50, %v2791_v1 }
0x1883   : > { %v2800_v12 = vsel %vm2797_vm6, %v2799_v7, %v2795_v49  ;;  %v3416_v49 = vld [vmem:[%s4510_s13 + $0xd0] sm:$0xff]  ;;  %v3413_v7 = vld [vmem:[%s4510_s13 + $0xb8] sm:$0xff] }
0x189a   : > { %v2883_v60 = vpop.permute.xlu2 %2882 }
0x18b1   : > { %v2875_v45 = vpop.xlane.xlu1 %2874 }
0x18b2   : > { %v2876_v47 = vadd.f32 %v3587_v24, %v2875_v45 }
0x18b4   : > { %3592 = vrcp.f32 %v2876_v47  ;;  %v2919_v27 = vand.u32 2147483648, %v2876_v47  ;;  %v2917_v57 = vand.u32 2147483647, %v2876_v47  ;;  %vm2913_vm14 = vweird.f32 %v2876_v47 }
0x18b6   : > { %v2920_v61 = vor.u32 1.1754944e-38, %v2919_v27  ;;  %vm2918_vm1 = vcmp.eq.f32.partialorder %v2917_v57, 8.507059e+37 }
0x18ba   : > { %v3593_v51 = vpop.eup %3592  ;;  %v2905_v58 = vpop.f32.mrf.mxu1 }
0x18bb   : > { %v2909_v52 = vmul.f32 %v3593_v51, %v2876_v47  ;;  %vm2914_vm13 = vweird.f32 %v3593_v51  ;;  %v2906_v62 = vadd.f32 %v2905_v58, %v2883_v60  ;;  %v3421_v60 = vld [vmem:[%s4510_s13 + $0xf8] sm:$0xff] }
0x18bc   : > { %vm2915_vm15 = vmor %vm2913_vm14, %vm2914_vm13  ;;  %3059 = vmatpush.msra.mxu2 %v3421_v60  ;;  %v3134_v60 = vld [vmem:[%s4595_s0] sm:$0xff] }
0x18bd   : > { %v2910_v55 = vsub.f32 1.0, %v2909_v52 }
0x18bf   : > { %v2911_v56 = vmul.f32 %v3593_v51, %v2910_v55 }
0x18c1   : > { %v2912_v59 = vadd.f32 %v3593_v51, %v2911_v56 }
0x18c3   : > { %v2916_v63 = vsel %vm2915_vm15, %v3593_v51, %v2912_v59 }
0x18c4   : > { %v2921_v0 = vsel %vm2918_vm1, %v2920_v61, %v2916_v63  ;;  %v3420_v61 = vld [vmem:[%s4510_s13 + $0xf0] sm:$0xff] }
0x18c5   : > { %v2922_v48 = vmul.f32 %v2921_v0, %v2906_v62  ;;  %v3419_v62 = vld [vmem:[%s4510_s13 + $0xe8] sm:$0xff]  ;;  %3060 = vmatpush.msra.mxu2 %v3420_v61 }
0x18c7   : > { %3399 = vmatmul.msk.f32.vlgmr.msrb.gmra.mxu3 %vm754_vm5, %v2922_v48  ;;  %3061 = vmatpush.msra.mxu2 %v3419_v62 }
0x18c9   : > { %v2762_v5 = vpop.permute.xlu1 %2761  ;;  %3062 = vmatpush.msra.mxu2 %v3418_v2 }
0x18ca   : > { %v2785_v10 = vadd.f32 %v2784_v4, %v2762_v5  ;;  %v3415_v4 = vld [vmem:[%s4510_s13 + $0xc8] sm:$0xff]  ;;  %v3414_v5 = vld [vmem:[%s4510_s13 + $0xc0] sm:$0xff] }
0x18cb   : > { %3063 = vmatpush.msra.mxu2 %v3417_v3 }
0x18cc   : > { %v2801_v13 = vmul.f32 %v2800_v12, %v2785_v10  ;;  %v3412_v10 = vld [vmem:[%s4510_s13 + $0xb0] sm:$0xff]  ;;  %v3411_v12 = vld [vmem:[%s4510_s13 + $0xa8] sm:$0xff] }
0x18cd   : > { %v2679_v40 = vpop.f32.mrf.mxu0  ;;  %3064 = vmatpush.msra.mxu2 %v3416_v49 }
0x18ce   : > { %3395 = vmatmul.msk.f32.vlgmr.msra.gmra.mxu0 %vm754_vm5, %v2801_v13  ;;  %v2703_v23 = vadd.f32 %v4331_v35, %v2679_v40  ;;  %v3410_v13 = vld [vmem:[%s4510_s13 + $0xa0] sm:$0xff] }
0x18cf   : > { %3065 = vmatpush.msra.mxu2 %v3415_v4  ;;  %v3493_v4 = vld [vmem:[%s4598_s1] ss:$0 sm:$0xff] }
0x18d1   : > { %3066 = vmatpush.msra.mxu2 %v3414_v5 }
0x18d3   : > { %3067 = vmatpush.msra.mxu2 %v3413_v7 }
0x18d5   : > { %3068 = vmatpush.msra.mxu2 %v3412_v10 }
0x18d7   : > { %3069 = vmatpush.msra.mxu2 %v3411_v12 }
0x18d9   : > { %3070 = vmatpush.msra.mxu2 %v3410_v13 }
0x18db   : > { %3071 = vmatpush.msra.mxu2 %v3409_v14 }
0x18dd   : > { %3072 = vmatpush.msra.mxu2 %v3408_v16 }
0x18df   : > { %3073 = vmatpush.msra.mxu2 %v3407_v17 }
0x18e1   : > { %3074 = vmatpush.msra.mxu2 %v3406_v18 }
0x194a   : > { %v2943_v24 = vpop.f32.mrf.mxu3 }
0x194b   : > { %v2822_v20 = vpop.f32.mrf.mxu0 }
0x194c   : > { %v2825_v22 = vadd.f32 %v2822_v20, %v2703_v23 }
0x194e   : > { %v2946_v6 = vadd.f32 %v2943_v24, %v2825_v22 }
0x1950   : > { %v4375_v25 = vadd.f32 %v2946_v6, %v4236_v11 }
0x1952   : > { %3404 = vmatmul.msk.f32.vlgmr.msrb.gmra.mxu0 %vm686_vm0, %v4375_v25 }
0x19cf   : > { %v2973_v30 = vpop.f32.mrf.mxu0 }
0x19d0   : > { %v2977_v26 = vmul.f32 0.70710677, %v2973_v30  ;;  %v2976_v58 = vmul.f32 0.5, %v2973_v30 }
0x19d2   : > { %v2978_v28 = vand.u32 2147483647, %v2977_v26  ;;  %vm3011_vm10 = vcmp.ge.f32.partialorder %v2977_v26, 0.0 }
0x19d4   : > { %v2979_v29 = vmul.f32 0.3275911, %v2978_v28  ;;  %v3005_v38 = vsub.f32 0.0, %v2978_v28 }
0x19d6   : > { %v2980_v31 = vadd.f32 1.0, %v2979_v29  ;;  %v3006_v42 = vmul.f32 %v3005_v38, %v2978_v28  ;;  %v3491_v29 = vld [vmem:[%s4509_s12 + $0x1] ss:$0 sm:$0xff] }
0x19d8   : > { %3594 = vrcp.f32 %v2980_v31  ;;  %v2992_v35 = vand.u32 2147483648, %v2980_v31  ;;  %v2990_v21 = vand.u32 2147483647, %v2980_v31  ;;  %vm2986_vm7 = vweird.f32 %v2980_v31 }
0x19d9   : > { %v3007_v45 = vmul.f32 1.442695, %v3006_v42 }
0x19da   : > { %v2993_v11 = vor.u32 1.1754944e-38, %v2992_v35  ;;  %vm2991_vm9 = vcmp.eq.f32.partialorder %v2990_v21, 8.507059e+37 }
0x19db   : > { %3596 = vpow2.f32 %v3007_v45 }
0x19de   : > { %v3595_v32 = vpop.eup %3594 }
0x19df   : > { %v2982_v33 = vmul.f32 %v3595_v32, %v2980_v31  ;;  %vm2987_vm5 = vweird.f32 %v3595_v32 }
0x19e0   : > { %vm2988_vm8 = vmor %vm2986_vm7, %vm2987_vm5 }
0x19e1   : > { %v2983_v34 = vsub.f32 1.0, %v2982_v33  ;;  %v3597_v54 = vpop.eup %3596 }
0x19e3   : > { %v2984_v36 = vmul.f32 %v3595_v32, %v2983_v34 }
0x19e5   : > { %v2985_v37 = vadd.f32 %v3595_v32, %v2984_v36 }
0x19e7   : > { %v2989_v46 = vsel %vm2988_vm8, %v3595_v32, %v2985_v37 }
0x19e8   : > { %v2994_v39 = vsel %vm2991_vm9, %v2993_v11, %v2989_v46 }
0x19e9   : > { %v2996_v19 = vmul.f32 1.0614054, %v2994_v39 }
0x19eb   : > { %v2997_v41 = vadd.f32 -1.4531521, %v2996_v19 }
0x19ed   : > { %v2998_v43 = vmul.f32 %v2997_v41, %v2994_v39 }
0x19ef   : > { %v2999_v44 = vadd.f32 1.4214138, %v2998_v43 }
0x19f1   : > { %v3000_v47 = vmul.f32 %v2999_v44, %v2994_v39 }
0x19f3   : > { %v3001_v50 = vadd.f32 -0.28449672, %v3000_v47  ;;  %v3492_v47 = vld [vmem:[%s4513_s16] ss:$0 sm:$0xff] }
0x19f5   : > { %v3002_v15 = vmul.f32 %v3001_v50, %v2994_v39 }
0x19f7   : > { %v3003_v51 = vadd.f32 0.2548296, %v3002_v15 }
0x19f9   : > { %v3004_v52 = vmul.f32 %v3003_v51, %v2994_v39 }
0x19fb   : > { %v3009_v55 = vmul.f32 %v3597_v54, %v3004_v52 }
0x19fd   : > { %v3010_v27 = vsub.f32 1.0, %v3009_v55 }
0x19ff   : > { %v3012_v56 = vsub.f32 0.0, %v3010_v27 }
0x1a01   : > { %v3013_v57 = vsel %vm3011_vm10, %v3010_v27, %v3012_v56 }
0x1a02   : > { %v3014_v53 = vadd.f32 1.0, %v3013_v57 }
0x1a04   : > { %v3015_v59 = vmul.f32 %v3014_v53, %v2976_v58  ;;  %v3137_v58 = vld [vmem:[%s4595_s0 + $0x18] sm:$0xff]  ;;  %v3136_v53 = vld [vmem:[%s4595_s0 + $0x10] sm:$0xff] }
0x1a05   : > { %3153 = vmatpush.msrb.mxu1 %v3137_v58 }
0x1a06   : > { %3018 = vadd.xlane.f32.xlu0 %v3015_v59 }
0x1a07   : > { %3154 = vmatpush.msrb.mxu1 %v3136_v53 }
0x1a79   : > { %v3019_v63 = vpop.xlane.xlu0 %3018 }
0x1a7a   : > { %v3020_v0 = vmul.f32 %v3019_v63, %v4110_v9 }
0x1a7c   : > { %v3021_v1 = vsub.f32 %v3015_v59, %v3020_v0  ;;  %v3135_v59 = vld [vmem:[%s4595_s0 + $0x8] sm:$0xff] }
0x1a7d   : > { %3155 = vmatpush.msrb.mxu1 %v3135_v59 }
0x1a7e   : > { %v3022_v48 = vmul.f32 %v3021_v1, %v3021_v1 }
0x1a7f   : > { %3156 = vmatpush.msrb.mxu1 %v3134_v60 }
0x1a80   : > { %3023 = vadd.xlane.f32.xlu2 %v3022_v48 }
0x1af3   : > { %v3024_v40 = vpop.xlane.xlu2 %3023 }
0x1af4   : > { %v3025_v23 = vmul.f32 %v3024_v40, %v4110_v9 }
0x1af6   : > { %v3026_v20 = vadd.f32 1e-05, %v3025_v23 }
0x1af8   : > { %3598 = vrsqrt.f32 %v3026_v20  ;;  %vm3033_vm12 = vweird.f32 %v3026_v20 }
0x1afe   : > { %v3599_v22 = vpop.eup %3598 }
0x1aff   : > { %v3028_v24 = vmul.f32 %v3599_v22, %v3026_v20  ;;  %vm3034_vm11 = vweird.f32 %v3599_v22 }
0x1b00   : > { %vm3035_vm13 = vmor %vm3033_vm12, %vm3034_vm11 }
0x1b01   : > { %v3029_v6 = vmul.f32 %v3599_v22, %v3028_v24 }
0x1b03   : > { %v3030_v30 = vmul.f32 0.5, %v3029_v6 }
0x1b05   : > { %v3031_v26 = vsub.f32 1.5, %v3030_v30 }
0x1b07   : > { %v3032_v28 = vmul.f32 %v3599_v22, %v3031_v26 }
0x1b09   : > { %v3036_v31 = vsel %vm3035_vm13, %v3599_v22, %v3032_v28 }
0x1b0a   : > { %v3037_v32 = vmul.f32 %v3036_v31, %v3021_v1 }
0x1b0c   : > { %v3041_v33 = vmul.f32 %v3491_v29, %v3037_v32 }
0x1b0e   : > { %3075 = vmatmul.f32.vlgmr.msra.gmra.mxu2 %v3041_v33 }
0x1b91   : > { %v3076_v9 = vpop.f32.mrf.mxu2 }
0x1b92   : > { %v3077_v34 = vadd.f32 %v3076_v9, %v4375_v25 }
0x1b94   : > { %v3080_v35 = vsel %vm686_vm0, %v3077_v34, 0.0 }
0x1b95   : > { %3081 = vadd.xlane.f32.xlu1 %v3080_v35 }
0x1c08   : > { %v3082_v36 = vpop.xlane.xlu1 %3081 }
0x1c09   : > { %v3083_v21 = vmul.f32 %v3082_v36, %v3856_v8 }
0x1c0b   : > { %v3084_v37 = vsub.f32 %v3077_v34, %v3083_v21 }
0x1c0d   : > { %v3085_v11 = vmul.f32 %v3084_v37, %v3084_v37 }
0x1c0f   : > { %v3086_v46 = vsel %vm686_vm0, %v3085_v11, 0.0 }
0x1c10   : > { %3087 = vadd.xlane.f32.xlu0 %v3086_v46 }
0x1c83   : > { %v3088_v38 = vpop.xlane.xlu0 %3087 }
0x1c84   : > { %v3089_v39 = vmul.f32 %v3088_v38, %v3856_v8 }
0x1c86   : > { %v3090_v19 = vadd.f32 1e-05, %v3089_v39 }
0x1c88   : > { %3600 = vrsqrt.f32 %v3090_v19  ;;  %vm3097_vm15 = vweird.f32 %v3090_v19 }
0x1c8e   : > { %v3601_v41 = vpop.eup %3600 }
0x1c8f   : > { %v3092_v42 = vmul.f32 %v3601_v41, %v3090_v19  ;;  %vm3098_vm14 = vweird.f32 %v3601_v41 }
0x1c90   : > { %vm3099_vm1 = vmor %vm3097_vm15, %vm3098_vm14 }
0x1c91   : > { %v3093_v43 = vmul.f32 %v3601_v41, %v3092_v42 }
0x1c93   : > { %v3094_v25 = vmul.f32 0.5, %v3093_v43 }
0x1c95   : > { %v3095_v44 = vsub.f32 1.5, %v3094_v25 }
0x1c97   : > { %v3096_v45 = vmul.f32 %v3601_v41, %v3095_v44 }
0x1c99   : > { %v3100_v50 = vsel %vm3099_vm1, %v3601_v41, %v3096_v45 }
0x1c9a   : > { %v3101_v15 = vmul.f32 %v3100_v50, %v3084_v37 }
0x1c9c   : > { %v3105_v51 = vmul.f32 %v3492_v47, %v3101_v15 }
0x1c9e   : > { %v3107_v52 = vsel %vm686_vm0, %v3105_v51, 0.0 }
0x1c9f   : > { %3108 = vadd.xlane.f32.xlu0 %v3107_v52 }
0x1d12   : > { %v3109_v54 = vpop.xlane.xlu0 %3108 }
0x1d13   : > { %v3110_v55 = vmul.f32 %v3109_v54, %v3856_v8 }
0x1d15   : > { %v3111_v27 = vsub.f32 %v3105_v51, %v3110_v55 }
0x1d17   : > { %v3112_v56 = vmul.f32 %v3111_v27, %v3111_v27 }
0x1d19   : > { %v3113_v57 = vsel %vm686_vm0, %v3112_v56, 0.0 }
0x1d1a   : > { %3114 = vadd.xlane.f32.xlu2 %v3113_v57 }
0x1d8d   : > { %v3115_v61 = vpop.xlane.xlu2 %3114 }
0x1d8e   : > { %v3116_v62 = vmul.f32 %v3115_v61, %v3856_v8 }
0x1d90   : > { %v3117_v63 = vadd.f32 1e-05, %v3116_v62 }
0x1d92   : > { %3602 = vrsqrt.f32 %v3117_v63  ;;  %vm3124_vm3 = vweird.f32 %v3117_v63 }
0x1d98   : > { %v3603_v0 = vpop.eup %3602 }
0x1d99   : > { %v3119_v1 = vmul.f32 %v3603_v0, %v3117_v63  ;;  %vm3125_vm2 = vweird.f32 %v3603_v0 }
0x1d9a   : > { %vm3126_vm4 = vmor %vm3124_vm3, %vm3125_vm2 }
0x1d9b   : > { %v3120_v48 = vmul.f32 %v3603_v0, %v3119_v1 }
0x1d9d   : > { %v3121_v2 = vmul.f32 0.5, %v3120_v48 }
0x1d9f   : > { %v3122_v3 = vsub.f32 1.5, %v3121_v2 }
0x1da1   : > { %v3123_v49 = vmul.f32 %v3603_v0, %v3122_v3 }
0x1da3   : > { %v3127_v5 = vsel %vm3126_vm4, %v3603_v0, %v3123_v49 }
0x1da4   : > { %v3128_v8 = vmul.f32 %v3127_v5, %v3111_v27 }
0x1da6   : > { %v3132_v7 = vmul.f32 %v3493_v4, %v3128_v8 }
0x1da8   : > { %3422 = vmatmul.msk.f32.vlgmr.msrb.gmra.mxu1 %vm686_vm0, %v3132_v7  ;;  %3133 = vst.msk [vmem:[%s656_s19] sm:$0xff] %vm686_vm0, %v3132_v7 }
0x1da9   : > { %3634 = shalt.err (!%p3631_p3)
}
0x1daa   : > { %s4601_s28 = sld [smem:[#allocation14_spill]]  ;;  %vm3161_vm0 = vcmask 588800  }
0x1dab   : > { %3427 = dma.vmem_to_hbm [thread:$0]  (%p3827_p5), %s3181_s23, 128, %s3183_s21, %s3164_s10  }
0x1dac   : > { %s4602_s18 = sld [smem:[#allocation25_spill]] }
0x1db2   : > { %s680_s22 = scalar_lea.vmem %s4602_s18, %s4601_s28 }
0x1e25   : > { %v3158_v10 = vpop.f32.mrf.mxu1 }
0x1e26   : > { %3162 = vst.msk [vmem:[%s680_s22] sm:$0xff] %vm3161_vm0, %v3158_v10 }
0x1e27 PF: > { %s4603_s2 = sld [smem:[#allocation8_spill]] }
0x1e28   : > { %s4604_s19 = sld [smem:[#allocation5_spill]] }
0x1e2d   : > { %p3433_p4 = scmp.ge.s32.totalorder %s4603_s2, 2 }
0x1e2e   : > { %s3197_s11 = sand.u32 1, %s4604_s19  }
0x1e2f   : > { %p3430_p7 = pnand %p3433_p4, %p3831_p6  ;;  %s3198_s25 = scalar_lea.sflag [#allocation3], %s3197_s11 }
0x1e31   : > { %p3431_p8 = pneg %p3430_p7 }
0x1e33   : > { %3652 = dma.done.wait (%p3431_p8), %s3198_s25, 128  }
0x1e34   : > { %3654 = vsyncadd (%p3431_p8), %s3198_s25, 4294967168  ;;  %s4606_s24 = sld [smem:[#allocation10_spill]] }
0x1e35   : > { %s4607_s1 = sld [smem:[#allocation6_spill]] }
0x1e36   : > { %s4608_s22 = sld [smem:[#allocation7_spill]] }
0x1e37   : > { %s4609_s23 = sld [smem:[#allocation11_spill]] }
0x1e3a   : > { %p31_p5 = scmp.ge.s32.totalorder %s4606_s24, 4  }
0x1e3c   :  { %33 = sbr.rel (!%p31_p5) target bundleno = 15 (0xf), region = 162 }
0x1e41   :  { %3211 = vsyncpa [#allocation3], 1 }
0x1e42   :  { %3213 = vsyncpa [#allocation3 + $0x1], 1 }

</bundles_post_ra>
